<compile_context>
chip_gen: v5e
topology: v5e:2x2
jax: 0.10.0
libtpu: 0.0.40
codegen_flags: <defaults>
</compile_context>

<pallas_src>
import functools

import jax
import jax.numpy as jnp
from jax.experimental import pallas as pl
from jax.experimental.pallas import tpu as pltpu

BN_EPS = 1e-5          # nn.BatchNorm2d default eps
LANE = 128             # TPU lane width


def _round_up(v, m):
    return (v + m - 1) // m * m


def _pick_bn(n, m):
    """Images per grid step: target >=256 matmul rows but keep >=2 grid steps."""
    cap = max(1, 512 // max(m, 1))
    if n >= 2:
        cap = min(cap, n // 2)
    cap = max(1, cap)
    bn = 1
    for d in range(1, min(cap, n) + 1):
        if n % d == 0:
            bn = d
    return bn


def _vmem_limit(in_bytes, out_bytes, scratch_bytes):
    """Scoped VMEM derived from actual block sizes (double-buffered ins/outs)."""
    est = int(1.5 * (2 * (in_bytes + out_bytes) + scratch_bytes)) + (4 << 20)
    # Stays well under v7x's 64 MiB for CIFAR-scale blocks; clamp keeps huge configs
    # within v5e/v6e physical VMEM.
    return max(16 << 20, min(est, 110 << 20))


# ----------------------------- Pallas kernels ------------------------------ #

def _conv1_kernel(x_ref, w_ref, y_ref, s_ref, q_ref, sc_ref, patch_ref, *,
                  stride, hs, ho, wo, need_pool):
    """conv1 (3x3, stride handled via parity slabs) as a single K-folded matmul,
    per-step BN1 partial stats, and the fused shortcut (avg-pool / identity)."""
    bn = x_ref.shape[0]
    cin_p = x_ref.shape[-1]
    m = ho * wo
    k = 9 * cin_p

    # Build the (bn*m, 9*cin_p) im2col patch in VMEM: taps folded into contraction dim.
    for b in range(bn):
        for kh in range(3):
            for kw in range(3):
                tap = kh * 3 + kw
                parity = (kh % stride) * stride + (kw % stride)
                r0 = parity * hs + kh // stride
                c0 = kw // stride
                patch_ref[b * ho:(b + 1) * ho, :, tap * cin_p:(tap + 1) * cin_p] = (
                    x_ref[b, r0:r0 + ho, c0:c0 + wo, :])

    y = jnp.dot(patch_ref[...].reshape(bn * m, k), w_ref[...],
                preferred_element_type=jnp.float32)
    y_ref[...] = y.reshape(bn, m, y.shape[-1]).astype(y_ref.dtype)
    s_ref[0] = jnp.sum(y, axis=0, keepdims=True)
    q_ref[0] = jnp.sum(y * y, axis=0, keepdims=True)

    # Fused shortcut from the resident padded input block (plain contiguous slices).
    for b in range(bn):
        if need_pool:
            # AvgPool2d(2) expressed on the stride-2 parity-split layout.
            t = (x_ref[b, 3 * hs:3 * hs + ho, 0:wo, :].astype(jnp.float32)
                 + x_ref[b, 2 * hs:2 * hs + ho, 1:1 + wo, :].astype(jnp.float32)
                 + x_ref[b, hs + 1:hs + 1 + ho, 0:wo, :].astype(jnp.float32)
                 + x_ref[b, 1:1 + ho, 1:1 + wo, :].astype(jnp.float32)) * 0.25
        else:
            # Identity shortcut = interior of the spatially padded image.
            t = x_ref[b, 1:1 + ho, 1:1 + wo, :].astype(jnp.float32)
        sc_ref[b] = t.reshape(m, cin_p).astype(sc_ref.dtype)


def _conv2_kernel(y1_ref, sb_ref, w_ref, y_ref, s_ref, q_ref, pad_ref, patch_ref, *,
                  ho, wo):
    """Folded BN1 affine + ReLU, spatial halo pad in VMEM, conv2 (stride 1) as one
    K-folded matmul, plus BN2 partial stats."""
    bn, m, c = y1_ref.shape
    k = 9 * c

    # Re-zero only the 1-pixel halo ring; the interior is fully overwritten per image.
    pad_ref[0:1, :, :] = jnp.zeros((1, wo + 2, c), pad_ref.dtype)
    pad_ref[ho + 1:ho + 2, :, :] = jnp.zeros((1, wo + 2, c), pad_ref.dtype)
    pad_ref[:, 0:1, :] = jnp.zeros((ho + 2, 1, c), pad_ref.dtype)
    pad_ref[:, wo + 1:wo + 2, :] = jnp.zeros((ho + 2, 1, c), pad_ref.dtype)

    scale = sb_ref[0:1, :]
    bias = sb_ref[1:2, :]
    for b in range(bn):
        a = jnp.maximum(y1_ref[b].astype(jnp.float32) * scale + bias, 0.0)
        pad_ref[1:ho + 1, 1:wo + 1, :] = a.reshape(ho, wo, c).astype(pad_ref.dtype)
        for kh in range(3):
            for kw in range(3):
                tap = kh * 3 + kw
                patch_ref[b * ho:(b + 1) * ho, :, tap * c:(tap + 1) * c] = (
                    pad_ref[kh:kh + ho, kw:kw + wo, :])

    y = jnp.dot(patch_ref[...].reshape(bn * m, k), w_ref[...],
                preferred_element_type=jnp.float32)
    y_ref[...] = y.reshape(bn, m, y.shape[-1]).astype(y_ref.dtype)
    s_ref[0] = jnp.sum(y, axis=0, keepdims=True)
    q_ref[0] = jnp.sum(y * y, axis=0, keepdims=True)


def _bn_add_relu_kernel(y2_ref, sb_ref, sc_ref, o_ref):
    """Folded BN2 affine + shortcut add (first cin_p channels) + ReLU."""
    bn, _, cout_p = y2_ref.shape
    cin_p = sc_ref.shape[-1]
    scale = sb_ref[0:1, :]
    bias = sb_ref[1:2, :]
    for b in range(bn):
        y = y2_ref[b].astype(jnp.float32) * scale + bias
        sc = sc_ref[b].astype(jnp.float32)
        if cin_p == cout_p:
            o_ref[b] = jnp.maximum(y + sc, 0.0)
        else:
            o_ref[b, :, :cin_p] = jnp.maximum(y[:, :cin_p] + sc, 0.0)
            o_ref[b, :, cin_p:] = jnp.maximum(y[:, cin_p:], 0.0)


# ------------------------------- JAX glue ---------------------------------- #

def _prep_weight(w, cin_p, cout_p):
    """(Cout, Cin, 3, 3) torch layout -> (9*Cin_pad, Cout_pad) bf16, K = tap-major."""
    cout, cin, _, _ = w.shape
    wt = jnp.transpose(w, (2, 3, 1, 0))                       # (kh, kw, cin, cout)
    wt = jnp.pad(wt, ((0, 0), (0, 0), (0, cin_p - cin), (0, cout_p - cout)))
    return wt.reshape(9 * cin_p, cout_p).astype(jnp.bfloat16)


def _fold_bn(s_part, q_part, gamma, beta, count, cout_p):
    """Combine per-step (sum, sumsq) partials into folded (scale, bias), f32."""
    s = jnp.sum(s_part, axis=(0, 1))
    q = jnp.sum(q_part, axis=(0, 1))
    mean = s / count
    var = jnp.maximum(q / count - mean * mean, 0.0)            # biased (training-mode)
    g = jnp.pad(gamma.astype(jnp.float32), (0, cout_p - gamma.shape[0]))
    b = jnp.pad(beta.astype(jnp.float32), (0, cout_p - beta.shape[0]))
    scale = g * jax.lax.rsqrt(var + BN_EPS)
    bias = b - mean * scale
    return jnp.stack([scale, bias], axis=0)                    # (2, cout_p)


def meta_basic_block_forward(x_nchw, params, in_planes, out_planes, stride):
    w1, g1, b1 = params["w1"], params["g1"], params["b1"]
    w2, g2, b2 = params["w2"], params["g2"], params["b2"]

    n, _, h, w = x_nchw.shape
    assert stride in (1, 2)
    need_pool = (stride != 1) or (in_planes != out_planes)
    if need_pool:
        # AvgPool2d(2) shortcut only matches conv spatial dims when stride == 2.
        assert stride == 2 and h % 2 == 0 and w % 2 == 0
    assert in_planes <= out_planes

    ho = (h + 2 - 3) // stride + 1
    wo = (w + 2 - 3) // stride + 1
    m = ho * wo
    assert wo % 8 == 0 and m % 8 == 0, "CIFAR-style spatial sizes expected"
    cin_p = _round_up(in_planes, LANE)
    cout_p = _round_up(out_planes, LANE)
    k1 = 9 * cin_p
    k2 = 9 * cout_p

    bn = _pick_bn(n, m)
    steps = n // bn

    x = jnp.transpose(x_nchw, (0, 2, 3, 1)).astype(jnp.float32)               # NHWC
    xp = jnp.pad(x, ((0, 0), (1, 1), (1, 1), (0, cin_p - in_planes))).astype(jnp.bfloat16)
    if stride == 1:
        hs = h + 2
        xsp = xp                                                               # (N, H+2, W+2, Cin_p)
    else:
        hs = (h + 2) // 2
        parts = [xp[:, a::2, b::2, :] for a in range(2) for b in range(2)]
        xsp = jnp.concatenate(parts, axis=1)                                   # (N, 4*hs, ws, Cin_p)
    rows, ws = xsp.shape[1], xsp.shape[2]

    w1k = _prep_weight(w1, cin_p, cout_p)                                      # (9*Cin_p, Cout_p)
    w2k = _prep_weight(w2, cout_p, cout_p)                                     # (9*Cout_p, Cout_p)

    # --- kernel 1: conv1 (K-folded im2col) + BN1 partial stats + fused shortcut ---
    k1_in = bn * rows * ws * cin_p * 2 + k1 * cout_p * 2
    k1_out = bn * m * cout_p * 2 + 2 * cout_p * 4 * 2 + bn * m * cin_p * 2
    k1_scr = bn * ho * wo * k1 * 2
    mosaic1 = pltpu.CompilerParams(dimension_semantics=("parallel",),
                                   vmem_limit_bytes=_vmem_limit(k1_in, k1_out, k1_scr))
    cost1 = pl.CostEstimate(
        flops=2 * n * m * k1 * cout_p, transcendentals=0,
        bytes_accessed=xsp.size * 2 + w1k.size * 2 + n * m * (cout_p + cin_p) * 2)
    y1, s1, q1, sc = pl.pallas_call(
        functools.partial(_conv1_kernel, stride=stride, hs=hs, ho=ho, wo=wo,
                          need_pool=need_pool),
        grid=(steps,),
        in_specs=[
            pl.BlockSpec((bn, rows, ws, cin_p), lambda i: (i, 0, 0, 0)),
            pl.BlockSpec((k1, cout_p), lambda i: (0, 0)),
        ],
        out_specs=(
            pl.BlockSpec((bn, m, cout_p), lambda i: (i, 0, 0)),
            pl.BlockSpec((1, 1, cout_p), lambda i: (i, 0, 0)),
            pl.BlockSpec((1, 1, cout_p), lambda i: (i, 0, 0)),
            pl.BlockSpec((bn, m, cin_p), lambda i: (i, 0, 0)),
        ),
        out_shape=(
            jax.ShapeDtypeStruct((n, m, cout_p), jnp.bfloat16),
            jax.ShapeDtypeStruct((steps, 1, cout_p), jnp.float32),
            jax.ShapeDtypeStruct((steps, 1, cout_p), jnp.float32),
            jax.ShapeDtypeStruct((n, m, cin_p), jnp.bfloat16),
        ),
        scratch_shapes=[pltpu.VMEM((bn * ho, wo, k1), jnp.bfloat16)],
        compiler_params=mosaic1,
        cost_estimate=cost1,
    )(xsp, w1k)

    sb1 = _fold_bn(s1, q1, g1, b1, n * m, cout_p)                              # (2, Cout_p)

    # --- kernel 2: BN1 affine + ReLU + conv2 (K-folded) + BN2 partial stats ---
    k2_in = bn * m * cout_p * 2 + 2 * cout_p * 4 + k2 * cout_p * 2
    k2_out = bn * m * cout_p * 2 + 2 * cout_p * 4 * 2
    k2_scr = (ho + 2) * (wo + 2) * cout_p * 2 + bn * ho * wo * k2 * 2
    mosaic2 = pltpu.CompilerParams(dimension_semantics=("parallel",),
                                   vmem_limit_bytes=_vmem_limit(k2_in, k2_out, k2_scr))
    cost2 = pl.CostEstimate(
        flops=2 * n * m * k2 * cout_p, transcendentals=0,
        bytes_accessed=2 * n * m * cout_p * 2 + w2k.size * 2)
    y2, s2, q2 = pl.pallas_call(
        functools.partial(_conv2_kernel, ho=ho, wo=wo),
        grid=(steps,),
        in_specs=[
            pl.BlockSpec((bn, m, cout_p), lambda i: (i, 0, 0)),
            pl.BlockSpec((2, cout_p), lambda i: (0, 0)),
            pl.BlockSpec((k2, cout_p), lambda i: (0, 0)),
        ],
        out_specs=(
            pl.BlockSpec((bn, m, cout_p), lambda i: (i, 0, 0)),
            pl.BlockSpec((1, 1, cout_p), lambda i: (i, 0, 0)),
            pl.BlockSpec((1, 1, cout_p), lambda i: (i, 0, 0)),
        ),
        out_shape=(
            jax.ShapeDtypeStruct((n, m, cout_p), jnp.bfloat16),
            jax.ShapeDtypeStruct((steps, 1, cout_p), jnp.float32),
            jax.ShapeDtypeStruct((steps, 1, cout_p), jnp.float32),
        ),
        scratch_shapes=[pltpu.VMEM((ho + 2, wo + 2, cout_p), jnp.bfloat16),
                        pltpu.VMEM((bn * ho, wo, k2), jnp.bfloat16)],
        compiler_params=mosaic2,
        cost_estimate=cost2,
    )(y1, sb1, w2k)

    sb2 = _fold_bn(s2, q2, g2, b2, n * m, cout_p)

    # --- kernel 3: BN2 affine + shortcut add + ReLU ---
    k3_in = bn * m * cout_p * 2 + 2 * cout_p * 4 + bn * m * cin_p * 2
    k3_out = bn * m * cout_p * 4
    mosaic3 = pltpu.CompilerParams(dimension_semantics=("parallel",),
                                   vmem_limit_bytes=_vmem_limit(k3_in, k3_out, 0))
    out = pl.pallas_call(
        _bn_add_relu_kernel,
        grid=(steps,),
        in_specs=[
            pl.BlockSpec((bn, m, cout_p), lambda i: (i, 0, 0)),
            pl.BlockSpec((2, cout_p), lambda i: (0, 0)),
            pl.BlockSpec((bn, m, cin_p), lambda i: (i, 0, 0)),
        ],
        out_specs=pl.BlockSpec((bn, m, cout_p), lambda i: (i, 0, 0)),
        out_shape=jax.ShapeDtypeStruct((n, m, cout_p), jnp.float32),
        compiler_params=mosaic3,
    )(y2, sb2, sc)

    out = out.reshape(n, ho, wo, cout_p)[:, :, :, :out_planes]
    return jnp.transpose(out, (0, 3, 1, 2))                                   # back to NCHW


# --------------------------- pure-JAX reference ----------------------------- #

def reference_forward(x, params, in_planes, out_planes, stride):
    def conv3x3(x, w, s):
        return jax.lax.conv_general_dilated(
            x, w, (s, s), ((1, 1), (1, 1)),
            dimension_numbers=("NCHW", "OIHW", "NCHW"))

    def bn(x, g, b):
        mean = jnp.mean(x, axis=(0, 2, 3), keepdims=True)
        var = jnp.mean(jnp.square(x - mean), axis=(0, 2, 3), keepdims=True)
        return ((x - mean) * jax.lax.rsqrt(var + BN_EPS)
                * g.reshape(1, -1, 1, 1) + b.reshape(1, -1, 1, 1))

    out = jax.nn.relu(bn(conv3x3(x, params["w1"], stride), params["g1"], params["b1"]))
    out = bn(conv3x3(out, params["w2"], 1), params["g2"], params["b2"])
    if stride != 1 or in_planes != out_planes:
        n, c, h, w = x.shape
        scut = x.reshape(n, c, h // 2, 2, w // 2, 2).mean(axis=(3, 5))  # AvgPool2d(2)
        if in_planes != out_planes:
            scut = jnp.concatenate([scut, jnp.zeros_like(scut)], axis=1)
        out = out + scut
    else:
        out = out + x
    return jax.nn.relu(out)


# ---------------------------------- main ------------------------------------ #

if __name__ == "__main__":
    key = jax.random.PRNGKey(0)
    kx, k1, k2, k3, k4 = jax.random.split(key, 5)

    in_planes, out_planes, stride = 4, 8, 2   # exercises avg-pool + zero-pad shortcut
    x = jax.random.normal(kx, (2, in_planes, 16, 16), dtype=jnp.float32)

    params = {
        "w1": jax.random.normal(k1, (out_planes, in_planes, 3, 3), jnp.float32) * 0.1,
        "g1": 1.0 + 0.1 * jax.random.normal(k3, (out_planes,), jnp.float32),
        "b1": 0.1 * jax.random.normal(k4, (out_planes,), jnp.float32),
        "w2": jax.random.normal(k2, (out_planes, out_planes, 3, 3), jnp.float32) * 0.1,
        "g2": jnp.ones((out_planes,), jnp.float32),
        "b2": jnp.zeros((out_planes,), jnp.float32),
    }

    fwd = jax.jit(functools.partial(
        meta_basic_block_forward,
        in_planes=in_planes, out_planes=out_planes, stride=stride))

    out = jax.block_until_ready(fwd(x, params))
    ref = jax.block_until_ready(
        reference_forward(x, params, in_planes, out_planes, stride))

    assert out.shape == (2, out_planes, 8, 8), out.shape
    max_err = float(jnp.max(jnp.abs(out - ref)))
    # bf16 MXU operands / bf16 inter-kernel activations (f32 accumulation) -> loosened
    # tolerance vs the f32 reference; intentional mixed-precision trade-off.
    assert jnp.allclose(out, ref, atol=5e-2, rtol=5e-2), max_err
    print("KERNEL_OK")
</pallas_src>

<mosaic_0001>
module attributes {stable_mosaic.version = 11 : i64} {
  func.func @_conv1_kernel(%arg0: i32, %arg1: memref<1x36x9x128xbf16, #tpu.memory_space<vmem>>, %arg2: memref<1152x128xbf16, #tpu.memory_space<vmem>>, %arg3: memref<1x64x128xbf16, #tpu.memory_space<vmem>>, %arg4: memref<1x1x128xf32, #tpu.memory_space<vmem>>, %arg5: memref<1x1x128xf32, #tpu.memory_space<vmem>>, %arg6: memref<1x64x128xbf16, #tpu.memory_space<vmem>>, %arg7: memref<8x8x1152xbf16, #tpu.memory_space<vmem>>) attributes {dimension_semantics = [#tpu.dimension_semantics<parallel>], iteration_bounds = array<i64: 2>, scalar_prefetch = 0 : i64, scratch_operands = 1 : i64, tpu.core_type = #tpu.core_type<tc>, window_params = [{transform_indices = @transform_0, window_bounds = array<i64: 1, 36, 9, 128>}, {pipeline_mode = #tpu.pipeline_mode<synchronous>, transform_indices = @transform_1, window_bounds = array<i64: 1152, 128>}, {transform_indices = @transform_2, window_bounds = array<i64: 1, 64, 128>}, {transform_indices = @transform_3, window_bounds = array<i64: 1, 1, 128>}, {transform_indices = @transform_4, window_bounds = array<i64: 1, 1, 128>}, {transform_indices = @transform_5, window_bounds = array<i64: 1, 64, 128>}]} {
    %c0 = arith.constant 0 : index
    %c0_0 = arith.constant 0 : index
    %c0_1 = arith.constant 0 : index
    %c0_2 = arith.constant 0 : index
    %0 = vector.load %arg1[%c0, %c0_0, %c0_1, %c0_2] : memref<1x36x9x128xbf16, #tpu.memory_space<vmem>>, vector<1x8x8x128xbf16>
    %1 = vector.shape_cast %0 : vector<1x8x8x128xbf16> to vector<8x8x128xbf16>
    %c0_3 = arith.constant 0 : index
    %c0_4 = arith.constant 0 : index
    %c0_5 = arith.constant 0 : index
    %2 = vector.load %arg7[%c0_3, %c0_4, %c0_5] : memref<8x8x1152xbf16, #tpu.memory_space<vmem>>, vector<8x8x128xbf16>
    tpu.vector_store %arg7[%c0_3, %c0_4, %c0_5], %1 {strides = array<i32>} : memref<8x8x1152xbf16, #tpu.memory_space<vmem>>, vector<8x8x128xbf16>,
    %c0_6 = arith.constant 0 : index
    %c9 = arith.constant 9 : index
    %c0_7 = arith.constant 0 : index
    %c0_8 = arith.constant 0 : index
    %3 = vector.load %arg1[%c0_6, %c9, %c0_7, %c0_8] : memref<1x36x9x128xbf16, #tpu.memory_space<vmem>>, vector<1x8x8x128xbf16>
    %4 = vector.shape_cast %3 : vector<1x8x8x128xbf16> to vector<8x8x128xbf16>
    %c0_9 = arith.constant 0 : index
    %c0_10 = arith.constant 0 : index
    %c128 = arith.constant 128 : index
    %5 = vector.load %arg7[%c0_9, %c0_10, %c128] : memref<8x8x1152xbf16, #tpu.memory_space<vmem>>, vector<8x8x128xbf16>
    tpu.vector_store %arg7[%c0_9, %c0_10, %c128], %4 {strides = array<i32>} : memref<8x8x1152xbf16, #tpu.memory_space<vmem>>, vector<8x8x128xbf16>,
    %c0_11 = arith.constant 0 : index
    %c0_12 = arith.constant 0 : index
    %c1 = arith.constant 1 : index
    %c0_13 = arith.constant 0 : index
    %6 = vector.load %arg1[%c0_11, %c0_12, %c1, %c0_13] : memref<1x36x9x128xbf16, #tpu.memory_space<vmem>>, vector<1x8x8x128xbf16>
    %7 = vector.shape_cast %6 : vector<1x8x8x128xbf16> to vector<8x8x128xbf16>
    %c0_14 = arith.constant 0 : index
    %c0_15 = arith.constant 0 : index
    %c256 = arith.constant 256 : index
    %8 = vector.load %arg7[%c0_14, %c0_15, %c256] : memref<8x8x1152xbf16, #tpu.memory_space<vmem>>, vector<8x8x128xbf16>
    tpu.vector_store %arg7[%c0_14, %c0_15, %c256], %7 {strides = array<i32>} : memref<8x8x1152xbf16, #tpu.memory_space<vmem>>, vector<8x8x128xbf16>,
    %c0_16 = arith.constant 0 : index
    %c18 = arith.constant 18 : index
    %c0_17 = arith.constant 0 : index
    %c0_18 = arith.constant 0 : index
    %9 = vector.load %arg1[%c0_16, %c18, %c0_17, %c0_18] : memref<1x36x9x128xbf16, #tpu.memory_space<vmem>>, vector<1x8x8x128xbf16>
    %10 = vector.shape_cast %9 : vector<1x8x8x128xbf16> to vector<8x8x128xbf16>
    %c0_19 = arith.constant 0 : index
    %c0_20 = arith.constant 0 : index
    %c384 = arith.constant 384 : index
    %11 = vector.load %arg7[%c0_19, %c0_20, %c384] : memref<8x8x1152xbf16, #tpu.memory_space<vmem>>, vector<8x8x128xbf16>
    tpu.vector_store %arg7[%c0_19, %c0_20, %c384], %10 {strides = array<i32>} : memref<8x8x1152xbf16, #tpu.memory_space<vmem>>, vector<8x8x128xbf16>,
    %c0_21 = arith.constant 0 : index
    %c27 = arith.constant 27 : index
    %c0_22 = arith.constant 0 : index
    %c0_23 = arith.constant 0 : index
    %12 = vector.load %arg1[%c0_21, %c27, %c0_22, %c0_23] : memref<1x36x9x128xbf16, #tpu.memory_space<vmem>>, vector<1x8x8x128xbf16>
    %13 = vector.shape_cast %12 : vector<1x8x8x128xbf16> to vector<8x8x128xbf16>
    %c0_24 = arith.constant 0 : index
    %c0_25 = arith.constant 0 : index
    %c512 = arith.constant 512 : index
    %14 = vector.load %arg7[%c0_24, %c0_25, %c512] : memref<8x8x1152xbf16, #tpu.memory_space<vmem>>, vector<8x8x128xbf16>
    tpu.vector_store %arg7[%c0_24, %c0_25, %c512], %13 {strides = array<i32>} : memref<8x8x1152xbf16, #tpu.memory_space<vmem>>, vector<8x8x128xbf16>,
    %c0_26 = arith.constant 0 : index
    %c18_27 = arith.constant 18 : index
    %c1_28 = arith.constant 1 : index
    %c0_29 = arith.constant 0 : index
    %15 = vector.load %arg1[%c0_26, %c18_27, %c1_28, %c0_29] : memref<1x36x9x128xbf16, #tpu.memory_space<vmem>>, vector<1x8x8x128xbf16>
    %16 = vector.shape_cast %15 : vector<1x8x8x128xbf16> to vector<8x8x128xbf16>
    %c0_30 = arith.constant 0 : index
    %c0_31 = arith.constant 0 : index
    %c640 = arith.constant 640 : index
    %17 = vector.load %arg7[%c0_30, %c0_31, %c640] : memref<8x8x1152xbf16, #tpu.memory_space<vmem>>, vector<8x8x128xbf16>
    tpu.vector_store %arg7[%c0_30, %c0_31, %c640], %16 {strides = array<i32>} : memref<8x8x1152xbf16, #tpu.memory_space<vmem>>, vector<8x8x128xbf16>,
    %c0_32 = arith.constant 0 : index
    %c1_33 = arith.constant 1 : index
    %c0_34 = arith.constant 0 : index
    %c0_35 = arith.constant 0 : index
    %18 = vector.load %arg1[%c0_32, %c1_33, %c0_34, %c0_35] : memref<1x36x9x128xbf16, #tpu.memory_space<vmem>>, vector<1x8x8x128xbf16>
    %19 = vector.shape_cast %18 : vector<1x8x8x128xbf16> to vector<8x8x128xbf16>
    %c0_36 = arith.constant 0 : index
    %c0_37 = arith.constant 0 : index
    %c768 = arith.constant 768 : index
    %20 = vector.load %arg7[%c0_36, %c0_37, %c768] : memref<8x8x1152xbf16, #tpu.memory_space<vmem>>, vector<8x8x128xbf16>
    tpu.vector_store %arg7[%c0_36, %c0_37, %c768], %19 {strides = array<i32>} : memref<8x8x1152xbf16, #tpu.memory_space<vmem>>, vector<8x8x128xbf16>,
    %c0_38 = arith.constant 0 : index
    %c10 = arith.constant 10 : index
    %c0_39 = arith.constant 0 : index
    %c0_40 = arith.constant 0 : index
    %21 = vector.load %arg1[%c0_38, %c10, %c0_39, %c0_40] : memref<1x36x9x128xbf16, #tpu.memory_space<vmem>>, vector<1x8x8x128xbf16>
    %22 = vector.shape_cast %21 : vector<1x8x8x128xbf16> to vector<8x8x128xbf16>
    %c0_41 = arith.constant 0 : index
    %c0_42 = arith.constant 0 : index
    %c896 = arith.constant 896 : index
    %23 = vector.load %arg7[%c0_41, %c0_42, %c896] : memref<8x8x1152xbf16, #tpu.memory_space<vmem>>, vector<8x8x128xbf16>
    tpu.vector_store %arg7[%c0_41, %c0_42, %c896], %22 {strides = array<i32>} : memref<8x8x1152xbf16, #tpu.memory_space<vmem>>, vector<8x8x128xbf16>,
    %c0_43 = arith.constant 0 : index
    %c1_44 = arith.constant 1 : index
    %c1_45 = arith.constant 1 : index
    %c0_46 = arith.constant 0 : index
    %24 = vector.load %arg1[%c0_43, %c1_44, %c1_45, %c0_46] : memref<1x36x9x128xbf16, #tpu.memory_space<vmem>>, vector<1x8x8x128xbf16>
    %25 = vector.shape_cast %24 : vector<1x8x8x128xbf16> to vector<8x8x128xbf16>
    %c0_47 = arith.constant 0 : index
    %c0_48 = arith.constant 0 : index
    %c1024 = arith.constant 1024 : index
    %26 = vector.load %arg7[%c0_47, %c0_48, %c1024] : memref<8x8x1152xbf16, #tpu.memory_space<vmem>>, vector<8x8x128xbf16>
    tpu.vector_store %arg7[%c0_47, %c0_48, %c1024], %25 {strides = array<i32>} : memref<8x8x1152xbf16, #tpu.memory_space<vmem>>, vector<8x8x128xbf16>,
    %c0_49 = arith.constant 0 : index
    %c0_50 = arith.constant 0 : index
    %c0_51 = arith.constant 0 : index
    %27 = vector.load %arg7[%c0_49, %c0_50, %c0_51] : memref<8x8x1152xbf16, #tpu.memory_space<vmem>>, vector<8x8x1152xbf16>
    %28 = vector.shape_cast %27 : vector<8x8x1152xbf16> to vector<64x1152xbf16>
    %c0_52 = arith.constant 0 : index
    %c0_53 = arith.constant 0 : index
    %29 = vector.load %arg2[%c0_52, %c0_53] : memref<1152x128xbf16, #tpu.memory_space<vmem>>, vector<1152x128xbf16>
    %cst = arith.constant dense<0.000000e+00> : vector<64x128xf32>
    %30 = tpu.matmul %28, %29, %cst {dimension_numbers = #tpu.dot_dimension_numbers<[1], [0], [0], [1], [0, 0, 1, 1], [], []>} : vector<64x1152xbf16>, vector<1152x128xbf16>, vector<64x128xf32> -> vector<64x128xf32>
    %31 = vector.shape_cast %30 : vector<64x128xf32> to vector<1x64x128xf32>
    %32 = arith.truncf %31 : vector<1x64x128xf32> to vector<1x64x128xbf16>
    %c0_54 = arith.constant 0 : index
    %c0_55 = arith.constant 0 : index
    %c0_56 = arith.constant 0 : index
    %33 = vector.load %arg3[%c0_54, %c0_55, %c0_56] : memref<1x64x128xbf16, #tpu.memory_space<vmem>>, vector<1x64x128xbf16>
    tpu.vector_store %arg3[%c0_54, %c0_55, %c0_56], %32 {strides = array<i32>} : memref<1x64x128xbf16, #tpu.memory_space<vmem>>, vector<1x64x128xbf16>,
    %cst_57 = arith.constant dense<0.000000e+00> : vector<128xf32>
    %34 = vector.multi_reduction <add>, %30, %cst_57 [0] : vector<64x128xf32> to vector<128xf32>
    %35 = vector.shape_cast %34 : vector<128xf32> to vector<1x128xf32>
    %c0_58 = arith.constant 0 : index
    %c0_59 = arith.constant 0 : index
    %c0_60 = arith.constant 0 : index
    %36 = vector.load %arg4[%c0_58, %c0_59, %c0_60] : memref<1x1x128xf32, #tpu.memory_space<vmem>>, vector<1x1x128xf32>
    %37 = vector.shape_cast %36 : vector<1x1x128xf32> to vector<1x128xf32>
    %38 = vector.shape_cast %35 : vector<1x128xf32> to vector<1x1x128xf32>
    tpu.vector_store %arg4[%c0_58, %c0_59, %c0_60], %38 {strides = array<i32>} : memref<1x1x128xf32, #tpu.memory_space<vmem>>, vector<1x1x128xf32>,
    %39 = arith.mulf %30, %30 : vector<64x128xf32>
    %cst_61 = arith.constant dense<0.000000e+00> : vector<128xf32>
    %40 = vector.multi_reduction <add>, %39, %cst_61 [0] : vector<64x128xf32> to vector<128xf32>
    %41 = vector.shape_cast %40 : vector<128xf32> to vector<1x128xf32>
    %c0_62 = arith.constant 0 : index
    %c0_63 = arith.constant 0 : index
    %c0_64 = arith.constant 0 : index
    %42 = vector.load %arg5[%c0_62, %c0_63, %c0_64] : memref<1x1x128xf32, #tpu.memory_space<vmem>>, vector<1x1x128xf32>
    %43 = vector.shape_cast %42 : vector<1x1x128xf32> to vector<1x128xf32>
    %44 = vector.shape_cast %41 : vector<1x128xf32> to vector<1x1x128xf32>
    tpu.vector_store %arg5[%c0_62, %c0_63, %c0_64], %44 {strides = array<i32>} : memref<1x1x128xf32, #tpu.memory_space<vmem>>, vector<1x1x128xf32>,
    %c0_65 = arith.constant 0 : index
    %c27_66 = arith.constant 27 : index
    %c0_67 = arith.constant 0 : index
    %c0_68 = arith.constant 0 : index
    %45 = vector.load %arg1[%c0_65, %c27_66, %c0_67, %c0_68] : memref<1x36x9x128xbf16, #tpu.memory_space<vmem>>, vector<1x8x8x128xbf16>
    %46 = vector.shape_cast %45 : vector<1x8x8x128xbf16> to vector<8x8x128xbf16>
    %47 = arith.extf %46 : vector<8x8x128xbf16> to vector<8x8x128xf32>
    %c0_69 = arith.constant 0 : index
    %c18_70 = arith.constant 18 : index
    %c1_71 = arith.constant 1 : index
    %c0_72 = arith.constant 0 : index
    %48 = vector.load %arg1[%c0_69, %c18_70, %c1_71, %c0_72] : memref<1x36x9x128xbf16, #tpu.memory_space<vmem>>, vector<1x8x8x128xbf16>
    %49 = vector.shape_cast %48 : vector<1x8x8x128xbf16> to vector<8x8x128xbf16>
    %50 = arith.extf %49 : vector<8x8x128xbf16> to vector<8x8x128xf32>
    %51 = arith.addf %47, %50 : vector<8x8x128xf32>
    %c0_73 = arith.constant 0 : index
    %c10_74 = arith.constant 10 : index
    %c0_75 = arith.constant 0 : index
    %c0_76 = arith.constant 0 : index
    %52 = vector.load %arg1[%c0_73, %c10_74, %c0_75, %c0_76] : memref<1x36x9x128xbf16, #tpu.memory_space<vmem>>, vector<1x8x8x128xbf16>
    %53 = vector.shape_cast %52 : vector<1x8x8x128xbf16> to vector<8x8x128xbf16>
    %54 = arith.extf %53 : vector<8x8x128xbf16> to vector<8x8x128xf32>
    %55 = arith.addf %51, %54 : vector<8x8x128xf32>
    %c0_77 = arith.constant 0 : index
    %c1_78 = arith.constant 1 : index
    %c1_79 = arith.constant 1 : index
    %c0_80 = arith.constant 0 : index
    %56 = vector.load %arg1[%c0_77, %c1_78, %c1_79, %c0_80] : memref<1x36x9x128xbf16, #tpu.memory_space<vmem>>, vector<1x8x8x128xbf16>
    %57 = vector.shape_cast %56 : vector<1x8x8x128xbf16> to vector<8x8x128xbf16>
    %58 = arith.extf %57 : vector<8x8x128xbf16> to vector<8x8x128xf32>
    %59 = arith.addf %55, %58 : vector<8x8x128xf32>
    %cst_81 = arith.constant 2.500000e-01 : f32
    %60 = vector.broadcast %cst_81 : f32 to vector<8x8x128xf32>
    %61 = arith.mulf %59, %60 : vector<8x8x128xf32>
    %62 = vector.shape_cast %61 : vector<8x8x128xf32> to vector<64x128xf32>
    %63 = arith.truncf %62 : vector<64x128xf32> to vector<64x128xbf16>
    %c0_82 = arith.constant 0 : index
    %c0_83 = arith.constant 0 : index
    %c0_84 = arith.constant 0 : index
    %64 = vector.load %arg6[%c0_82, %c0_83, %c0_84] : memref<1x64x128xbf16, #tpu.memory_space<vmem>>, vector<1x64x128xbf16>
    %65 = vector.shape_cast %64 : vector<1x64x128xbf16> to vector<64x128xbf16>
    %66 = vector.shape_cast %63 : vector<64x128xbf16> to vector<1x64x128xbf16>
    tpu.vector_store %arg6[%c0_82, %c0_83, %c0_84], %66 {strides = array<i32>} : memref<1x64x128xbf16, #tpu.memory_space<vmem>>, vector<1x64x128xbf16>,
    return
  }
  func.func @transform_0(%arg0: i32) -> (i32, i32, i32, i32) {
    %c0_i32 = arith.constant 0 : i32
    %c0_i32_0 = arith.constant 0 : i32
    %c0_i32_1 = arith.constant 0 : i32
    %c0_i32_2 = arith.constant 0 : i32
    return %arg0, %c0_i32, %c0_i32_0, %c0_i32_1 : i32, i32, i32, i32
  }
  func.func @transform_1(%arg0: i32) -> (i32, i32) {
    %c0_i32 = arith.constant 0 : i32
    %c0_i32_0 = arith.constant 0 : i32
    %c0_i32_1 = arith.constant 0 : i32
    return %c0_i32, %c0_i32_0 : i32, i32
  }
  func.func @transform_2(%arg0: i32) -> (i32, i32, i32) {
    %c0_i32 = arith.constant 0 : i32
    %c0_i32_0 = arith.constant 0 : i32
    %c0_i32_1 = arith.constant 0 : i32
    return %arg0, %c0_i32, %c0_i32_0 : i32, i32, i32
  }
  func.func @transform_3(%arg0: i32) -> (i32, i32, i32) {
    %c0_i32 = arith.constant 0 : i32
    %c0_i32_0 = arith.constant 0 : i32
    %c0_i32_1 = arith.constant 0 : i32
    return %arg0, %c0_i32, %c0_i32_0 : i32, i32, i32
  }
  func.func @transform_4(%arg0: i32) -> (i32, i32, i32) {
    %c0_i32 = arith.constant 0 : i32
    %c0_i32_0 = arith.constant 0 : i32
    %c0_i32_1 = arith.constant 0 : i32
    return %arg0, %c0_i32, %c0_i32_0 : i32, i32, i32
  }
  func.func @transform_5(%arg0: i32) -> (i32, i32, i32) {
    %c0_i32 = arith.constant 0 : i32
    %c0_i32_0 = arith.constant 0 : i32
    %c0_i32_1 = arith.constant 0 : i32
    return %arg0, %c0_i32, %c0_i32_0 : i32, i32, i32
  }
}

module attributes {stable_mosaic.version = 11 : i64} {
  func.func @_bn_add_relu_kernel(%arg0: i32, %arg1: memref<1x64x128xbf16, #tpu.memory_space<vmem>>, %arg2: memref<2x128xf32, #tpu.memory_space<vmem>>, %arg3: memref<1x64x128xbf16, #tpu.memory_space<vmem>>, %arg4: memref<1x64x128xf32, #tpu.memory_space<vmem>>) attributes {dimension_semantics = [#tpu.dimension_semantics<parallel>], iteration_bounds = array<i64: 2>, scalar_prefetch = 0 : i64, scratch_operands = 0 : i64, tpu.core_type = #tpu.core_type<tc>, window_params = [{transform_indices = @transform_0, window_bounds = array<i64: 1, 64, 128>}, {pipeline_mode = #tpu.pipeline_mode<synchronous>, transform_indices = @transform_1, window_bounds = array<i64: 2, 128>}, {transform_indices = @transform_2, window_bounds = array<i64: 1, 64, 128>}, {transform_indices = @transform_3, window_bounds = array<i64: 1, 64, 128>}]} {
    %c0 = arith.constant 0 : index
    %c0_0 = arith.constant 0 : index
    %0 = vector.load %arg2[%c0, %c0_0] : memref<2x128xf32, #tpu.memory_space<vmem>>, vector<1x128xf32>
    %c1 = arith.constant 1 : index
    %c0_1 = arith.constant 0 : index
    %1 = vector.load %arg2[%c1, %c0_1] : memref<2x128xf32, #tpu.memory_space<vmem>>, vector<1x128xf32>
    %c0_2 = arith.constant 0 : index
    %c0_3 = arith.constant 0 : index
    %c0_4 = arith.constant 0 : index
    %2 = vector.load %arg1[%c0_2, %c0_3, %c0_4] : memref<1x64x128xbf16, #tpu.memory_space<vmem>>, vector<1x64x128xbf16>
    %3 = vector.shape_cast %2 : vector<1x64x128xbf16> to vector<64x128xbf16>
    %4 = arith.extf %3 : vector<64x128xbf16> to vector<64x128xf32>
    %5 = vector.broadcast %0 : vector<1x128xf32> to vector<64x128xf32>
    %6 = arith.mulf %4, %5 : vector<64x128xf32>
    %7 = vector.broadcast %1 : vector<1x128xf32> to vector<64x128xf32>
    %8 = arith.addf %6, %7 : vector<64x128xf32>
    %c0_5 = arith.constant 0 : index
    %c0_6 = arith.constant 0 : index
    %c0_7 = arith.constant 0 : index
    %9 = vector.load %arg3[%c0_5, %c0_6, %c0_7] : memref<1x64x128xbf16, #tpu.memory_space<vmem>>, vector<1x64x128xbf16>
    %10 = vector.shape_cast %9 : vector<1x64x128xbf16> to vector<64x128xbf16>
    %11 = arith.extf %10 : vector<64x128xbf16> to vector<64x128xf32>
    %12 = arith.addf %8, %11 : vector<64x128xf32>
    %cst = arith.constant 0.000000e+00 : f32
    %13 = vector.broadcast %cst : f32 to vector<64x128xf32>
    %14 = arith.maximumf %12, %13 : vector<64x128xf32>
    %c0_8 = arith.constant 0 : index
    %c0_9 = arith.constant 0 : index
    %c0_10 = arith.constant 0 : index
    %15 = vector.load %arg4[%c0_8, %c0_9, %c0_10] : memref<1x64x128xf32, #tpu.memory_space<vmem>>, vector<1x64x128xf32>
    %16 = vector.shape_cast %15 : vector<1x64x128xf32> to vector<64x128xf32>
    %17 = vector.shape_cast %14 : vector<64x128xf32> to vector<1x64x128xf32>
    tpu.vector_store %arg4[%c0_8, %c0_9, %c0_10], %17 {strides = array<i32>} : memref<1x64x128xf32, #tpu.memory_space<vmem>>, vector<1x64x128xf32>,
    return
  }
  func.func @transform_0(%arg0: i32) -> (i32, i32, i32) {
    %c0_i32 = arith.constant 0 : i32
    %c0_i32_0 = arith.constant 0 : i32
    %c0_i32_1 = arith.constant 0 : i32
    return %arg0, %c0_i32, %c0_i32_0 : i32, i32, i32
  }
  func.func @transform_1(%arg0: i32) -> (i32, i32) {
    %c0_i32 = arith.constant 0 : i32
    %c0_i32_0 = arith.constant 0 : i32
    %c0_i32_1 = arith.constant 0 : i32
    return %c0_i32, %c0_i32_0 : i32, i32
  }
  func.func @transform_2(%arg0: i32) -> (i32, i32, i32) {
    %c0_i32 = arith.constant 0 : i32
    %c0_i32_0 = arith.constant 0 : i32
    %c0_i32_1 = arith.constant 0 : i32
    return %arg0, %c0_i32, %c0_i32_0 : i32, i32, i32
  }
  func.func @transform_3(%arg0: i32) -> (i32, i32, i32) {
    %c0_i32 = arith.constant 0 : i32
    %c0_i32_0 = arith.constant 0 : i32
    %c0_i32_1 = arith.constant 0 : i32
    return %arg0, %c0_i32, %c0_i32_0 : i32, i32, i32
  }
}

module attributes {stable_mosaic.version = 11 : i64} {
  func.func @_conv2_kernel(%arg0: i32, %arg1: memref<1x64x128xbf16, #tpu.memory_space<vmem>>, %arg2: memref<2x128xf32, #tpu.memory_space<vmem>>, %arg3: memref<1152x128xbf16, #tpu.memory_space<vmem>>, %arg4: memref<1x64x128xbf16, #tpu.memory_space<vmem>>, %arg5: memref<1x1x128xf32, #tpu.memory_space<vmem>>, %arg6: memref<1x1x128xf32, #tpu.memory_space<vmem>>, %arg7: memref<10x10x128xbf16, #tpu.memory_space<vmem>>, %arg8: memref<8x8x1152xbf16, #tpu.memory_space<vmem>>) attributes {dimension_semantics = [#tpu.dimension_semantics<parallel>], iteration_bounds = array<i64: 2>, scalar_prefetch = 0 : i64, scratch_operands = 2 : i64, tpu.core_type = #tpu.core_type<tc>, window_params = [{transform_indices = @transform_0, window_bounds = array<i64: 1, 64, 128>}, {pipeline_mode = #tpu.pipeline_mode<synchronous>, transform_indices = @transform_1, window_bounds = array<i64: 2, 128>}, {pipeline_mode = #tpu.pipeline_mode<synchronous>, transform_indices = @transform_2, window_bounds = array<i64: 1152, 128>}, {transform_indices = @transform_3, window_bounds = array<i64: 1, 64, 128>}, {transform_indices = @transform_4, window_bounds = array<i64: 1, 1, 128>}, {transform_indices = @transform_5, window_bounds = array<i64: 1, 1, 128>}]} {
    %cst = arith.constant 0.000000e+00 : bf16
    %0 = vector.broadcast %cst : bf16 to vector<1x10x128xbf16>
    %c0 = arith.constant 0 : index
    %c0_0 = arith.constant 0 : index
    %c0_1 = arith.constant 0 : index
    %1 = vector.load %arg7[%c0, %c0_0, %c0_1] : memref<10x10x128xbf16, #tpu.memory_space<vmem>>, vector<1x10x128xbf16>
    tpu.vector_store %arg7[%c0, %c0_0, %c0_1], %0 {strides = array<i32>} : memref<10x10x128xbf16, #tpu.memory_space<vmem>>, vector<1x10x128xbf16>,
    %cst_2 = arith.constant 0.000000e+00 : bf16
    %2 = vector.broadcast %cst_2 : bf16 to vector<1x10x128xbf16>
    %c9 = arith.constant 9 : index
    %c0_3 = arith.constant 0 : index
    %c0_4 = arith.constant 0 : index
    %3 = vector.load %arg7[%c9, %c0_3, %c0_4] : memref<10x10x128xbf16, #tpu.memory_space<vmem>>, vector<1x10x128xbf16>
    tpu.vector_store %arg7[%c9, %c0_3, %c0_4], %2 {strides = array<i32>} : memref<10x10x128xbf16, #tpu.memory_space<vmem>>, vector<1x10x128xbf16>,
    %cst_5 = arith.constant 0.000000e+00 : bf16
    %4 = vector.broadcast %cst_5 : bf16 to vector<10x1x128xbf16>
    %c0_6 = arith.constant 0 : index
    %c0_7 = arith.constant 0 : index
    %c0_8 = arith.constant 0 : index
    %5 = vector.load %arg7[%c0_6, %c0_7, %c0_8] : memref<10x10x128xbf16, #tpu.memory_space<vmem>>, vector<10x1x128xbf16>
    tpu.vector_store %arg7[%c0_6, %c0_7, %c0_8], %4 {strides = array<i32>} : memref<10x10x128xbf16, #tpu.memory_space<vmem>>, vector<10x1x128xbf16>,
    %cst_9 = arith.constant 0.000000e+00 : bf16
    %6 = vector.broadcast %cst_9 : bf16 to vector<10x1x128xbf16>
    %c0_10 = arith.constant 0 : index
    %c9_11 = arith.constant 9 : index
    %c0_12 = arith.constant 0 : index
    %7 = vector.load %arg7[%c0_10, %c9_11, %c0_12] : memref<10x10x128xbf16, #tpu.memory_space<vmem>>, vector<10x1x128xbf16>
    tpu.vector_store %arg7[%c0_10, %c9_11, %c0_12], %6 {strides = array<i32>} : memref<10x10x128xbf16, #tpu.memory_space<vmem>>, vector<10x1x128xbf16>,
    %c0_13 = arith.constant 0 : index
    %c0_14 = arith.constant 0 : index
    %8 = vector.load %arg2[%c0_13, %c0_14] : memref<2x128xf32, #tpu.memory_space<vmem>>, vector<1x128xf32>
    %c1 = arith.constant 1 : index
    %c0_15 = arith.constant 0 : index
    %9 = vector.load %arg2[%c1, %c0_15] : memref<2x128xf32, #tpu.memory_space<vmem>>, vector<1x128xf32>
    %c0_16 = arith.constant 0 : index
    %c0_17 = arith.constant 0 : index
    %c0_18 = arith.constant 0 : index
    %10 = vector.load %arg1[%c0_16, %c0_17, %c0_18] : memref<1x64x128xbf16, #tpu.memory_space<vmem>>, vector<1x64x128xbf16>
    %11 = vector.shape_cast %10 : vector<1x64x128xbf16> to vector<64x128xbf16>
    %12 = arith.extf %11 : vector<64x128xbf16> to vector<64x128xf32>
    %13 = vector.broadcast %8 : vector<1x128xf32> to vector<64x128xf32>
    %14 = arith.mulf %12, %13 : vector<64x128xf32>
    %15 = vector.broadcast %9 : vector<1x128xf32> to vector<64x128xf32>
    %16 = arith.addf %14, %15 : vector<64x128xf32>
    %cst_19 = arith.constant 0.000000e+00 : f32
    %17 = vector.broadcast %cst_19 : f32 to vector<64x128xf32>
    %18 = arith.maximumf %16, %17 : vector<64x128xf32>
    %19 = vector.shape_cast %18 : vector<64x128xf32> to vector<8x8x128xf32>
    %20 = arith.truncf %19 : vector<8x8x128xf32> to vector<8x8x128xbf16>
    %c1_20 = arith.constant 1 : index
    %c1_21 = arith.constant 1 : index
    %c0_22 = arith.constant 0 : index
    %21 = vector.load %arg7[%c1_20, %c1_21, %c0_22] : memref<10x10x128xbf16, #tpu.memory_space<vmem>>, vector<8x8x128xbf16>
    tpu.vector_store %arg7[%c1_20, %c1_21, %c0_22], %20 {strides = array<i32>} : memref<10x10x128xbf16, #tpu.memory_space<vmem>>, vector<8x8x128xbf16>,
    %c0_23 = arith.constant 0 : index
    %c0_24 = arith.constant 0 : index
    %c0_25 = arith.constant 0 : index
    %22 = vector.load %arg7[%c0_23, %c0_24, %c0_25] : memref<10x10x128xbf16, #tpu.memory_space<vmem>>, vector<8x8x128xbf16>
    %c0_26 = arith.constant 0 : index
    %c0_27 = arith.constant 0 : index
    %c0_28 = arith.constant 0 : index
    %23 = vector.load %arg8[%c0_26, %c0_27, %c0_28] : memref<8x8x1152xbf16, #tpu.memory_space<vmem>>, vector<8x8x128xbf16>
    tpu.vector_store %arg8[%c0_26, %c0_27, %c0_28], %22 {strides = array<i32>} : memref<8x8x1152xbf16, #tpu.memory_space<vmem>>, vector<8x8x128xbf16>,
    %c0_29 = arith.constant 0 : index
    %c1_30 = arith.constant 1 : index
    %c0_31 = arith.constant 0 : index
    %24 = vector.load %arg7[%c0_29, %c1_30, %c0_31] : memref<10x10x128xbf16, #tpu.memory_space<vmem>>, vector<8x8x128xbf16>
    %c0_32 = arith.constant 0 : index
    %c0_33 = arith.constant 0 : index
    %c128 = arith.constant 128 : index
    %25 = vector.load %arg8[%c0_32, %c0_33, %c128] : memref<8x8x1152xbf16, #tpu.memory_space<vmem>>, vector<8x8x128xbf16>
    tpu.vector_store %arg8[%c0_32, %c0_33, %c128], %24 {strides = array<i32>} : memref<8x8x1152xbf16, #tpu.memory_space<vmem>>, vector<8x8x128xbf16>,
    %c0_34 = arith.constant 0 : index
    %c2 = arith.constant 2 : index
    %c0_35 = arith.constant 0 : index
    %26 = vector.load %arg7[%c0_34, %c2, %c0_35] : memref<10x10x128xbf16, #tpu.memory_space<vmem>>, vector<8x8x128xbf16>
    %c0_36 = arith.constant 0 : index
    %c0_37 = arith.constant 0 : index
    %c256 = arith.constant 256 : index
    %27 = vector.load %arg8[%c0_36, %c0_37, %c256] : memref<8x8x1152xbf16, #tpu.memory_space<vmem>>, vector<8x8x128xbf16>
    tpu.vector_store %arg8[%c0_36, %c0_37, %c256], %26 {strides = array<i32>} : memref<8x8x1152xbf16, #tpu.memory_space<vmem>>, vector<8x8x128xbf16>,
    %c1_38 = arith.constant 1 : index
    %c0_39 = arith.constant 0 : index
    %c0_40 = arith.constant 0 : index
    %28 = vector.load %arg7[%c1_38, %c0_39, %c0_40] : memref<10x10x128xbf16, #tpu.memory_space<vmem>>, vector<8x8x128xbf16>
    %c0_41 = arith.constant 0 : index
    %c0_42 = arith.constant 0 : index
    %c384 = arith.constant 384 : index
    %29 = vector.load %arg8[%c0_41, %c0_42, %c384] : memref<8x8x1152xbf16, #tpu.memory_space<vmem>>, vector<8x8x128xbf16>
    tpu.vector_store %arg8[%c0_41, %c0_42, %c384], %28 {strides = array<i32>} : memref<8x8x1152xbf16, #tpu.memory_space<vmem>>, vector<8x8x128xbf16>,
    %c1_43 = arith.constant 1 : index
    %c1_44 = arith.constant 1 : index
    %c0_45 = arith.constant 0 : index
    %30 = vector.load %arg7[%c1_43, %c1_44, %c0_45] : memref<10x10x128xbf16, #tpu.memory_space<vmem>>, vector<8x8x128xbf16>
    %c0_46 = arith.constant 0 : index
    %c0_47 = arith.constant 0 : index
    %c512 = arith.constant 512 : index
    %31 = vector.load %arg8[%c0_46, %c0_47, %c512] : memref<8x8x1152xbf16, #tpu.memory_space<vmem>>, vector<8x8x128xbf16>
    tpu.vector_store %arg8[%c0_46, %c0_47, %c512], %30 {strides = array<i32>} : memref<8x8x1152xbf16, #tpu.memory_space<vmem>>, vector<8x8x128xbf16>,
    %c1_48 = arith.constant 1 : index
    %c2_49 = arith.constant 2 : index
    %c0_50 = arith.constant 0 : index
    %32 = vector.load %arg7[%c1_48, %c2_49, %c0_50] : memref<10x10x128xbf16, #tpu.memory_space<vmem>>, vector<8x8x128xbf16>
    %c0_51 = arith.constant 0 : index
    %c0_52 = arith.constant 0 : index
    %c640 = arith.constant 640 : index
    %33 = vector.load %arg8[%c0_51, %c0_52, %c640] : memref<8x8x1152xbf16, #tpu.memory_space<vmem>>, vector<8x8x128xbf16>
    tpu.vector_store %arg8[%c0_51, %c0_52, %c640], %32 {strides = array<i32>} : memref<8x8x1152xbf16, #tpu.memory_space<vmem>>, vector<8x8x128xbf16>,
    %c2_53 = arith.constant 2 : index
    %c0_54 = arith.constant 0 : index
    %c0_55 = arith.constant 0 : index
    %34 = vector.load %arg7[%c2_53, %c0_54, %c0_55] : memref<10x10x128xbf16, #tpu.memory_space<vmem>>, vector<8x8x128xbf16>
    %c0_56 = arith.constant 0 : index
    %c0_57 = arith.constant 0 : index
    %c768 = arith.constant 768 : index
    %35 = vector.load %arg8[%c0_56, %c0_57, %c768] : memref<8x8x1152xbf16, #tpu.memory_space<vmem>>, vector<8x8x128xbf16>
    tpu.vector_store %arg8[%c0_56, %c0_57, %c768], %34 {strides = array<i32>} : memref<8x8x1152xbf16, #tpu.memory_space<vmem>>, vector<8x8x128xbf16>,
    %c2_58 = arith.constant 2 : index
    %c1_59 = arith.constant 1 : index
    %c0_60 = arith.constant 0 : index
    %36 = vector.load %arg7[%c2_58, %c1_59, %c0_60] : memref<10x10x128xbf16, #tpu.memory_space<vmem>>, vector<8x8x128xbf16>
    %c0_61 = arith.constant 0 : index
    %c0_62 = arith.constant 0 : index
    %c896 = arith.constant 896 : index
    %37 = vector.load %arg8[%c0_61, %c0_62, %c896] : memref<8x8x1152xbf16, #tpu.memory_space<vmem>>, vector<8x8x128xbf16>
    tpu.vector_store %arg8[%c0_61, %c0_62, %c896], %36 {strides = array<i32>} : memref<8x8x1152xbf16, #tpu.memory_space<vmem>>, vector<8x8x128xbf16>,
    %c2_63 = arith.constant 2 : index
    %c2_64 = arith.constant 2 : index
    %c0_65 = arith.constant 0 : index
    %38 = vector.load %arg7[%c2_63, %c2_64, %c0_65] : memref<10x10x128xbf16, #tpu.memory_space<vmem>>, vector<8x8x128xbf16>
    %c0_66 = arith.constant 0 : index
    %c0_67 = arith.constant 0 : index
    %c1024 = arith.constant 1024 : index
    %39 = vector.load %arg8[%c0_66, %c0_67, %c1024] : memref<8x8x1152xbf16, #tpu.memory_space<vmem>>, vector<8x8x128xbf16>
    tpu.vector_store %arg8[%c0_66, %c0_67, %c1024], %38 {strides = array<i32>} : memref<8x8x1152xbf16, #tpu.memory_space<vmem>>, vector<8x8x128xbf16>,
    %c0_68 = arith.constant 0 : index
    %c0_69 = arith.constant 0 : index
    %c0_70 = arith.constant 0 : index
    %40 = vector.load %arg8[%c0_68, %c0_69, %c0_70] : memref<8x8x1152xbf16, #tpu.memory_space<vmem>>, vector<8x8x1152xbf16>
    %41 = vector.shape_cast %40 : vector<8x8x1152xbf16> to vector<64x1152xbf16>
    %c0_71 = arith.constant 0 : index
    %c0_72 = arith.constant 0 : index
    %42 = vector.load %arg3[%c0_71, %c0_72] : memref<1152x128xbf16, #tpu.memory_space<vmem>>, vector<1152x128xbf16>
    %cst_73 = arith.constant dense<0.000000e+00> : vector<64x128xf32>
    %43 = tpu.matmul %41, %42, %cst_73 {dimension_numbers = #tpu.dot_dimension_numbers<[1], [0], [0], [1], [0, 0, 1, 1], [], []>} : vector<64x1152xbf16>, vector<1152x128xbf16>, vector<64x128xf32> -> vector<64x128xf32>
    %44 = vector.shape_cast %43 : vector<64x128xf32> to vector<1x64x128xf32>
    %45 = arith.truncf %44 : vector<1x64x128xf32> to vector<1x64x128xbf16>
    %c0_74 = arith.constant 0 : index
    %c0_75 = arith.constant 0 : index
    %c0_76 = arith.constant 0 : index
    %46 = vector.load %arg4[%c0_74, %c0_75, %c0_76] : memref<1x64x128xbf16, #tpu.memory_space<vmem>>, vector<1x64x128xbf16>
    tpu.vector_store %arg4[%c0_74, %c0_75, %c0_76], %45 {strides = array<i32>} : memref<1x64x128xbf16, #tpu.memory_space<vmem>>, vector<1x64x128xbf16>,
    %cst_77 = arith.constant dense<0.000000e+00> : vector<128xf32>
    %47 = vector.multi_reduction <add>, %43, %cst_77 [0] : vector<64x128xf32> to vector<128xf32>
    %48 = vector.shape_cast %47 : vector<128xf32> to vector<1x128xf32>
    %c0_78 = arith.constant 0 : index
    %c0_79 = arith.constant 0 : index
    %c0_80 = arith.constant 0 : index
    %49 = vector.load %arg5[%c0_78, %c0_79, %c0_80] : memref<1x1x128xf32, #tpu.memory_space<vmem>>, vector<1x1x128xf32>
    %50 = vector.shape_cast %49 : vector<1x1x128xf32> to vector<1x128xf32>
    %51 = vector.shape_cast %48 : vector<1x128xf32> to vector<1x1x128xf32>
    tpu.vector_store %arg5[%c0_78, %c0_79, %c0_80], %51 {strides = array<i32>} : memref<1x1x128xf32, #tpu.memory_space<vmem>>, vector<1x1x128xf32>,
    %52 = arith.mulf %43, %43 : vector<64x128xf32>
    %cst_81 = arith.constant dense<0.000000e+00> : vector<128xf32>
    %53 = vector.multi_reduction <add>, %52, %cst_81 [0] : vector<64x128xf32> to vector<128xf32>
    %54 = vector.shape_cast %53 : vector<128xf32> to vector<1x128xf32>
    %c0_82 = arith.constant 0 : index
    %c0_83 = arith.constant 0 : index
    %c0_84 = arith.constant 0 : index
    %55 = vector.load %arg6[%c0_82, %c0_83, %c0_84] : memref<1x1x128xf32, #tpu.memory_space<vmem>>, vector<1x1x128xf32>
    %56 = vector.shape_cast %55 : vector<1x1x128xf32> to vector<1x128xf32>
    %57 = vector.shape_cast %54 : vector<1x128xf32> to vector<1x1x128xf32>
    tpu.vector_store %arg6[%c0_82, %c0_83, %c0_84], %57 {strides = array<i32>} : memref<1x1x128xf32, #tpu.memory_space<vmem>>, vector<1x1x128xf32>,
    return
  }
  func.func @transform_0(%arg0: i32) -> (i32, i32, i32) {
    %c0_i32 = arith.constant 0 : i32
    %c0_i32_0 = arith.constant 0 : i32
    %c0_i32_1 = arith.constant 0 : i32
    return %arg0, %c0_i32, %c0_i32_0 : i32, i32, i32
  }
  func.func @transform_1(%arg0: i32) -> (i32, i32) {
    %c0_i32 = arith.constant 0 : i32
    %c0_i32_0 = arith.constant 0 : i32
    %c0_i32_1 = arith.constant 0 : i32
    return %c0_i32, %c0_i32_0 : i32, i32
  }
  func.func @transform_2(%arg0: i32) -> (i32, i32) {
    %c0_i32 = arith.constant 0 : i32
    %c0_i32_0 = arith.constant 0 : i32
    %c0_i32_1 = arith.constant 0 : i32
    return %c0_i32, %c0_i32_0 : i32, i32
  }
  func.func @transform_3(%arg0: i32) -> (i32, i32, i32) {
    %c0_i32 = arith.constant 0 : i32
    %c0_i32_0 = arith.constant 0 : i32
    %c0_i32_1 = arith.constant 0 : i32
    return %arg0, %c0_i32, %c0_i32_0 : i32, i32, i32
  }
  func.func @transform_4(%arg0: i32) -> (i32, i32, i32) {
    %c0_i32 = arith.constant 0 : i32
    %c0_i32_0 = arith.constant 0 : i32
    %c0_i32_1 = arith.constant 0 : i32
    return %arg0, %c0_i32, %c0_i32_0 : i32, i32, i32
  }
  func.func @transform_5(%arg0: i32) -> (i32, i32, i32) {
    %c0_i32 = arith.constant 0 : i32
    %c0_i32_0 = arith.constant 0 : i32
    %c0_i32_1 = arith.constant 0 : i32
    return %arg0, %c0_i32, %c0_i32_0 : i32, i32, i32
  }
}

</mosaic_0001>

<bundles_post_ra>
// kernel: meta_basic_block_forward.5
= control target key start
LH: loop header
LB: loop body
LE: loop exit
PB: predicated region body
PF: predicated region fallthrough
CT: control target
= control target key end

     0   :  { %s426_s12 = smov 0   ;;  %s456_s0 = inlined_call_operand.vmem [shape: bf16[2,64,128], index: 0, kind: input, shape index: {}]   ;;  %s457_s1 = inlined_call_operand.vmem [shape: f32[2,128], index: 1, kind: input, shape index: {}]   ;;  %s458_s2 = inlined_call_operand.vmem [shape: bf16[2,64,128], index: 2, kind: input, shape index: {}]   ;;  %s459_s3 = inlined_call_operand.vmem [shape: f32[2,64,128], index: 3, kind: output, shape index: {}]  }
   0x1 LB: > { %s334_s13 = sadd.s32 4294967295, %s404_s12   ;;  %p338_p0 = scmp.ge.s32.totalorder %s404_s12, 1  ;;  %s404_s12 = sphi %s426_s12, %s13_s12  }
   0x2   : > { %p147_p1 = scmp.lt.s32.totalorder %s404_s12, 3 }
   0x4   : > { %p148_p2 = pnand %p338_p0, %p147_p1 }
   0x5   : > { %p176_p3 = scmp.lt.s32.totalorder (!%p148_p2), %s334_s13, 1 }
   0x6   : > { %151 = sbr.rel (%p148_p2) target bundleno = 33 (0x21), region = 32 }
   0xb   : > { %s461_s13 = smov (!%p176_p3, %s334_s13), 1  ;;  %v396_v0 = vld [vmem:[%s457_s1] ss:$0 sm:$0xff]  ;;  %v397_v1 = vld [vmem:[%s457_s1 + $0x1] ss:$0 sm:$0xff] }
   0xc   : > { %s347_s14 = sshll.u32 %s461_s13, 5  ;;  %s349_s25 = sshll.u32 %s461_s13, 6 }
   0xd   : > { %s180_s17 = scalar_lea.vmem %s456_s0, %s347_s14  ;;  %s185_s20 = scalar_lea.vmem %s458_s2, %s347_s14 }
   0xe   : > { %v351_v2 = vld [vmem:[%s180_s17] sm:$0xff]   ;;  %v382_v4 = vld [vmem:[%s180_s17 + $0x8] sm:$0xff]   ;;  %v383_v10 = vld [vmem:[%s180_s17 + $0x10] sm:$0xff]   ;;  %s190_s28 = scalar_lea.vmem %s459_s3, %s349_s25 }
   0xf   : > { %v367_v3 = vld [vmem:[%s185_s20] sm:$0xff]   ;;  %v352_v5 = vunpack.c.l.bf16 %v351_v2  ;;  %v353_v7 = vunpack.c.h.bf16 %v351_v2  ;;  %v385_v9 = vld [vmem:[%s185_s20 + $0x8] sm:$0xff]   ;;  %v386_v11 = vld [vmem:[%s185_s20 + $0x10] sm:$0xff]   ;;  %v356_v12 = vunpack.c.l.bf16 %v382_v4  ;;  %v357_v14 = vunpack.c.h.bf16 %v382_v4 }
  0x10   : > { %v368_v6 = vunpack.c.l.bf16 %v367_v3  ;;  %v369_v8 = vunpack.c.h.bf16 %v367_v3  ;;  %v372_v13 = vunpack.c.l.bf16 %v385_v9  ;;  %v373_v15 = vunpack.c.h.bf16 %v385_v9  ;;  %v384_v16 = vld [vmem:[%s180_s17 + $0x18] sm:$0xff]  }
  0x11   : > { %v210_v17 = vmul.f32 %v396_v0, %v352_v5  ;;  %v211_v18 = vmul.f32 %v396_v0, %v353_v7  ;;  %v360_v19 = vunpack.c.l.bf16 %v383_v10  ;;  %v376_v20 = vunpack.c.l.bf16 %v386_v11  ;;  %v387_v21 = vld [vmem:[%s185_s20 + $0x18] sm:$0xff]  }
  0x12   : > { %v212_v22 = vmul.f32 %v396_v0, %v356_v12  ;;  %v213_v23 = vmul.f32 %v396_v0, %v357_v14  ;;  %v361_v24 = vunpack.c.h.bf16 %v383_v10  ;;  %v377_v25 = vunpack.c.h.bf16 %v386_v11 }
  0x13   : > { %v219_v26 = vadd.f32 %v397_v1, %v210_v17  ;;  %v220_v27 = vadd.f32 %v397_v1, %v211_v18  ;;  %v214_v28 = vmul.f32 %v396_v0, %v360_v19  ;;  %v364_v29 = vunpack.c.l.bf16 %v384_v16 }
  0x14   : > { %v221_v30 = vadd.f32 %v397_v1, %v212_v22  ;;  %v222_v31 = vadd.f32 %v397_v1, %v213_v23  ;;  %v215_v32 = vmul.f32 %v396_v0, %v361_v24  ;;  %v380_v33 = vunpack.c.l.bf16 %v387_v21 }
  0x15   : > { %v243_v34 = vadd.f32 %v368_v6, %v219_v26  ;;  %v244_v35 = vadd.f32 %v369_v8, %v220_v27  ;;  %v223_v36 = vadd.f32 %v397_v1, %v214_v28  ;;  %v216_v37 = vmul.f32 %v396_v0, %v364_v29 }
  0x16   : > { %v245_v38 = vadd.f32 %v372_v13, %v221_v30  ;;  %v246_v39 = vadd.f32 %v373_v15, %v222_v31  ;;  %v224_v40 = vadd.f32 %v397_v1, %v215_v32  ;;  %v365_v41 = vunpack.c.h.bf16 %v384_v16 }
  0x17   : > { %v251_v42 = vmax.f32 %v243_v34, 0.0  ;;  %v252_v43 = vmax.f32 %v244_v35, 0.0  ;;  %v247_v44 = vadd.f32 %v376_v20, %v223_v36  ;;  %v225_v45 = vadd.f32 %v397_v1, %v216_v37 }
  0x18   : > { %v253_v46 = vmax.f32 %v245_v38, 0.0  ;;  %v254_v47 = vmax.f32 %v246_v39, 0.0  ;;  %v248_v48 = vadd.f32 %v377_v25, %v224_v40  ;;  %v217_v49 = vmul.f32 %v396_v0, %v365_v41 }
  0x19   : > { %259 = vst [vmem:[%s190_s28] sm:$0xff] %v251_v42  ;;  %v255_v50 = vmax.f32 %v247_v44, 0.0  ;;  %v249_v51 = vadd.f32 %v380_v33, %v225_v45  ;;  %v381_v52 = vunpack.c.h.bf16 %v387_v21 }
  0x1a   : > { %260 = vst [vmem:[%s190_s28 + $0x8] sm:$0xff] %v252_v43  ;;  %v256_v53 = vmax.f32 %v248_v48, 0.0  ;;  %v226_v54 = vadd.f32 %v397_v1, %v217_v49 }
  0x1b   : > { %261 = vst [vmem:[%s190_s28 + $0x10] sm:$0xff] %v253_v46  ;;  %v257_v55 = vmax.f32 %v249_v51, 0.0 }
  0x1c   : > { %262 = vst [vmem:[%s190_s28 + $0x18] sm:$0xff] %v254_v47  ;;  %v250_v56 = vadd.f32 %v381_v52, %v226_v54 }
  0x1d   : > { %263 = vst [vmem:[%s190_s28 + $0x20] sm:$0xff] %v255_v50 }
  0x1e   : > { %264 = vst [vmem:[%s190_s28 + $0x28] sm:$0xff] %v256_v53  ;;  %v258_v57 = vmax.f32 %v250_v56, 0.0 }
  0x1f   : > { %265 = vst [vmem:[%s190_s28 + $0x30] sm:$0xff] %v257_v55 }
  0x20   : > { %266 = vst [vmem:[%s190_s28 + $0x38] sm:$0xff] %v258_v57 }
  0x21 PF: > { %s13_s12 = sadd.s32 1, %s404_s12  }
  0x22   : > { %p10_p4 = scmp.ge.s32.totalorder %s13_s12, 4  }
  0x24   :  { %12 = sbr.rel (!%p10_p4) target bundleno = 1 (0x1), region = 65 }

// kernel: meta_basic_block_forward.3
= control target key start
LH: loop header
LB: loop body
LE: loop exit
PB: predicated region body
PF: predicated region fallthrough
CT: control target
= control target key end

     0   :  { %s3065_s18 = smov 0   ;;  %s3701_s0 = inlined_call_operand.vmem [shape: bf16[2,36,9,128], index: 0, kind: input, shape index: {}]   ;;  %s3702_s1 = inlined_call_operand.vmem [shape: bf16[1152,128], index: 1, kind: input, shape index: {}]   ;;  %s3703_s2 = inlined_call_operand.vmem [shape: bf16[2,64,128], index: 2, kind: output, shape index: {0}]   ;;  %s3704_s3 = inlined_call_operand.vmem [shape: f32[2,1,128], index: 3, kind: output, shape index: {1}]   ;;  %s3705_s4 = inlined_call_operand.vmem [shape: f32[2,1,128], index: 4, kind: output, shape index: {2}]   ;;  %s3706_s5 = inlined_call_operand.vmem [shape: bf16[2,64,128], index: 5, kind: output, shape index: {3}]  }
   0x1 LB: > { %s2282_s19 = sadd.s32 4294967295, %s3033_s18   ;;  %p2286_p0 = scmp.ge.s32.totalorder %s3033_s18, 1  ;;  %s3033_s18 = sphi %s3065_s18, %s16_s18  }
   0x2   : > { %p194_p1 = scmp.lt.s32.totalorder %s3033_s18, 3 }
   0x4   : > { %p195_p2 = pnand %p2286_p0, %p194_p1 }
   0x5   : > { %p233_p3 = scmp.lt.s32.totalorder (!%p195_p2), %s2282_s19, 1 }
   0x6   : > { %198 = sbr.rel (%p195_p2) target bundleno = 346 (0x15a), region = 28 }
   0xb   : > { %v2891_v0 = vld [vmem:[%s3702_s1 + $0x38] sm:$0xff]  ;;  %v2890_v2 = vld [vmem:[%s3702_s1 + $0x30] sm:$0xff]  ;;  %s3713_s19 = smov (!%p233_p3, %s2282_s19), 1  ;;  %v2889_v6 = vld [vmem:[%s3702_s1 + $0x28] sm:$0xff]  ;;  %vm303_vm0 = vsmask.f32 3328 }
   0xc   : > { %v2907_v1 = vld [vmem:[%s3702_s1 + $0xb8] sm:$0xff]  ;;  %3002 = vmatpush.bf16.msra.mxu1 %v2891_v0  ;;  %1590 = vmatpush.bf16.msra.mxu0 %v2891_v0  ;;  %v2906_v3 = vld [vmem:[%s3702_s1 + $0xb0] sm:$0xff]  ;;  %s3018_s30 = smul.u32 288, %s3713_s19  ;;  %v2905_v7 = vld [vmem:[%s3702_s1 + $0xa8] sm:$0xff]  ;;  %vm304_vm1 = vsmask.f32 7440  ;;  %s245_s21 = scalar_lea.vmem %s3704_s3, %s3713_s19 }
   0xd   : > { %1648 = vmatpush.bf16.msra.mxu2 %v2907_v1  ;;  %v2915_v4 = vld [vmem:[%s3702_s1 + $0xf8] sm:$0xff]  ;;  %v2914_v5 = vld [vmem:[%s3702_s1 + $0xf0] sm:$0xff]  ;;  %v2888_v12 = vld [vmem:[%s3702_s1 + $0x20] sm:$0xff]  ;;  %vm1967_vm3 = vcmask 1046528   ;;  %s2846_s10 = sshll.u32 %s3713_s19, 5  ;;  %s248_s24 = scalar_lea.vmem %s3705_s4, %s3713_s19 }
   0xe   : > { %1677 = vmatpush.bf16.msra.mxu3 %v2915_v4  ;;  %s3100_s12 = scalar_lea.vmem %s3701_s0, %s3018_s30  ;;  %v2904_v13 = vld [vmem:[%s3702_s1 + $0xa0] sm:$0xff]  ;;  %v2913_v14 = vld [vmem:[%s3702_s1 + $0xe8] sm:$0xff]  ;;  %v2887_v26 = vld [vmem:[%s3702_s1 + $0x18] sm:$0xff]  ;;  %s3645_s13 = scalar_lea.vmem %s3703_s2, %s2846_s10 }
   0xf   : > { %v258_v8 = vld [vmem:[%s3100_s12 + $0x20] sm:$0xf]  ;;  %v259_v9 = vld [vmem:[%s3100_s12 + $0x28] sm:$0xf]  ;;  %v288_v16 = vld [vmem:[%s3100_s12 + $0x4] sm:$0x1]  ;;  %s253_s16 = scalar_lea.vmem %s3706_s5, %s2846_s10 }
  0x10   : > { %3003 = vmatpush.bf16.msra.mxu1 %v2890_v2  ;;  %1591 = vmatpush.bf16.msra.mxu0 %v2890_v2  ;;  %266 = vst [vmem:[#allocation2 + $0x90] sm:$0xf] %v258_v8  ;;  %v254_v10 = vld [vmem:[%s3100_s12] sm:$0xf]  ;;  %v255_v11 = vld [vmem:[%s3100_s12 + $0x8] sm:$0xf]  ;;  %vm3138_vm2 = vmor %vm303_vm0, %vm304_vm1 }
  0x11   : > { %1649 = vmatpush.bf16.msra.mxu2 %v2906_v3  ;;  %267 = vst [vmem:[#allocation2 + $0xb4] sm:$0xf] %v259_v9  ;;  %v287_v15 = vld [vmem:[%s3100_s12] sm:$0xf]  ;;  %v289_v17 = vld [vmem:[%s3100_s12 + $0x8] sm:$0xf] }
  0x12   : > { %1678 = vmatpush.bf16.msra.mxu3 %v2914_v5  ;;  %262 = vst [vmem:[#allocation2] sm:$0xf] %v254_v10  ;;  %v290_v18 = vld [vmem:[%s3100_s12 + $0xc] sm:$0x1]  ;;  %v307_v19 = vshrl.u32 %v287_v15, 16  ;;  %v310_v20 = vshll.u32 %v287_v15, 16 }
  0x13   : > { %263 = vst [vmem:[#allocation2 + $0x24] sm:$0xf] %v255_v11  ;;  %v316_v21 = vshll.u32 %v288_v16, 16  ;;  %v321_v22 = vshrl.u32 %v289_v17, 16  ;;  %v2912_v23 = vld [vmem:[%s3702_s1 + $0xe0] sm:$0xff]  ;;  %v324_v24 = vshll.u32 %v289_v17, 16 }
  0x14   : > { %3004 = vmatpush.bf16.msra.mxu1 %v2889_v6  ;;  %1592 = vmatpush.bf16.msra.mxu0 %v2889_v6  ;;  %v330_v25 = vshll.u32 %v290_v18, 16  ;;  %v309_v27 = vrot.slane %v307_v19, 4  ;;  %v312_v28 = vrot.slane %v310_v20, 5  ;;  %v260_v30 = vld [vmem:[%s3100_s12 + $0x30] sm:$0xf]  ;;  %v2903_v31 = vld [vmem:[%s3702_s1 + $0x98] sm:$0xff] }
  0x15   : > { %1650 = vmatpush.bf16.msra.mxu2 %v2905_v7  ;;  %v323_v29 = vrot.slane %v321_v22, 4  ;;  %v326_v32 = vrot.slane %v324_v24, 5  ;;  %v261_v33 = vld [vmem:[%s3100_s12 + $0x38] sm:$0xf]  ;;  %v318_v35 = vrot.slane %v316_v21, 5  ;;  %v2886_v40 = vld [vmem:[%s3702_s1 + $0x10] sm:$0xff] }
  0x16   : > { %1679 = vmatpush.bf16.msra.mxu3 %v2913_v14  ;;  %v313_v34 = vor.u32 %v312_v28, %v309_v27  ;;  %268 = vst [vmem:[#allocation2 + $0xd8] sm:$0xf] %v260_v30  ;;  %v2911_v36 = vld [vmem:[%s3702_s1 + $0xd8] sm:$0xff]  ;;  %v332_v39 = vrot.slane %v330_v25, 5  ;;  %v2902_v42 = vld [vmem:[%s3702_s1 + $0x90] sm:$0xff]  ;;  %v2885_v46 = vld [vmem:[%s3702_s1 + $0x8] sm:$0xff] }
  0x17   : > { %v327_v38 = vor.u32 %v326_v32, %v323_v29  ;;  %269 = vst [vmem:[#allocation2 + $0xfc] sm:$0xf] %v261_v33  ;;  %v2910_v44 = vld [vmem:[%s3702_s1 + $0xd0] sm:$0xff]  ;;  %v257_v48 = vld [vmem:[%s3100_s12 + $0x18] sm:$0xf]  ;;  %v2901_v55 = vld [vmem:[%s3702_s1 + $0x88] sm:$0xff] }
  0x18   : > { %3005 = vmatpush.bf16.msra.mxu1 %v2888_v12  ;;  %1593 = vmatpush.bf16.msra.mxu0 %v2888_v12  ;;  %v314_v41 = vrot.slane %v313_v34, 4  ;;  %v256_v45 = vld [vmem:[%s3100_s12 + $0x10] sm:$0xf]  ;;  %v2301_v51 = vld [vmem:[%s3100_s12 + $0x98] sm:$0xf]  ;;  %v2884_v57 = vld [vmem:[%s3702_s1] sm:$0xff] }
  0x19   : > { %1651 = vmatpush.bf16.msra.mxu2 %v2904_v13  ;;  %v328_v43 = vrot.slane %v327_v38, 4  ;;  %264 = vst [vmem:[#allocation2 + $0x48] sm:$0xf] %v256_v45  ;;  %v2300_v49 = vld [vmem:[%s3100_s12 + $0x90] sm:$0xf]  ;;  %v2909_v63 = vld [vmem:[%s3702_s1 + $0xc8] sm:$0xff] }
  0x1a   : > { %1680 = vmatpush.bf16.msra.mxu3 %v2912_v23  ;;  %v319_v47 = vsel %vm3138_vm2, %v314_v41, %v318_v35  ;;  %v291_v52 = vld [vmem:[%s3100_s12 + $0x10] sm:$0xf]  ;;  %v292_v53 = vld [vmem:[%s3100_s12 + $0x14] sm:$0x1]  ;;  %v293_v54 = vld [vmem:[%s3100_s12 + $0x18] sm:$0xf] }
  0x1b   : > { %v333_v50 = vsel %vm3138_vm2, %v328_v43, %v332_v39  ;;  %426 = vst [vmem:[#allocation2 + $0x8] sm:$0xf] %v319_v47  ;;  %v294_v56 = vld [vmem:[%s3100_s12 + $0x1c] sm:$0x1]  ;;  %v2438_v58 = vld [vmem:[#allocation2 + $0x90] sm:$0xf] }
  0x1c   : > { %3006 = vmatpush.bf16.msra.mxu1 %v2887_v26  ;;  %1594 = vmatpush.bf16.msra.mxu0 %v2887_v26  ;;  %427 = vst [vmem:[#allocation2 + $0x2c] sm:$0xf] %v333_v50  ;;  %v2870_v59 = vld [vmem:[#allocation2 + $0xb0] sm:$0xf0]  ;;  %v2366_v60 = vld [vmem:[#allocation2] sm:$0xf] }
  0x1d   : > { %1652 = vmatpush.bf16.msra.mxu2 %v2903_v31  ;;  %265 = vst [vmem:[#allocation2 + $0x6c] sm:$0xf] %v257_v48  ;;  %v335_v61 = vshrl.u32 %v291_v52, 16  ;;  %v338_v62 = vshll.u32 %v291_v52, 16  ;;  %v344_v0 = vshll.u32 %v292_v53, 16  ;;  %v349_v1 = vshrl.u32 %v293_v54, 16 }
  0x1e   : > { %1681 = vmatpush.bf16.msra.mxu3 %v2911_v36  ;;  %443 = vst [vmem:[#allocation2 + $0xc] sm:$0xf] %v2300_v49  ;;  %v352_v2 = vshll.u32 %v293_v54, 16  ;;  %v2899_v3 = vld [vmem:[%s3702_s1 + $0x78] sm:$0xff]  ;;  %v2852_v4 = vld [vmem:[#allocation2 + $0x20] sm:$0xf0]  ;;  %v2439_v18 = vor.u32 %v2870_v59, %v2438_v58 }
  0x1f   : > { %444 = vst [vmem:[#allocation2 + $0x30] sm:$0xf] %v2301_v51  ;;  %v337_v5 = vrot.slane %v335_v61, 4  ;;  %v340_v6 = vrot.slane %v338_v62, 5  ;;  %v358_v7 = vshll.u32 %v294_v56, 16  ;;  %v2900_v8 = vld [vmem:[%s3702_s1 + $0x80] sm:$0xff]  ;;  %v2367_v20 = vor.u32 %v2852_v4, %v2366_v60 }
  0x20   : > { %3007 = vmatpush.bf16.msra.mxu1 %v2886_v40  ;;  %1595 = vmatpush.bf16.msra.mxu0 %v2886_v40  ;;  %v2923_v9 = vld [vmem:[%s3702_s1 + $0x138] sm:$0xff]  ;;  %v351_v11 = vrot.slane %v349_v1, 4  ;;  %v354_v12 = vrot.slane %v352_v2, 5  ;;  %v346_v15 = vrot.slane %v344_v0, 5  ;;  %v2292_v17 = vld [vmem:[%s3100_s12 + $0x48] sm:$0xf] }
  0x21   : > { %1653 = vmatpush.bf16.msra.mxu2 %v2902_v42  ;;  %v2939_v10 = vld [vmem:[%s3702_s1 + $0x1b8] sm:$0xff]  ;;  %v341_v14 = vor.u32 %v340_v6, %v337_v5  ;;  %v360_v16 = vrot.slane %v358_v7, 5  ;;  %v2898_v19 = vld [vmem:[%s3702_s1 + $0x70] sm:$0xff]  ;;  %279 = vst [vmem:[#allocation2 + $0x4] sm:$0xf] %v2292_v17  ;;  %v2908_v26 = vld [vmem:[%s3702_s1 + $0xc0] sm:$0xff] }
  0x22   : > { %1682 = vmatpush.bf16.msra.mxu3 %v2910_v44  ;;  %v2374_v13 = vld [vmem:[#allocation2 + $0x8] sm:$0xf]  ;;  %v355_v22 = vor.u32 %v354_v12, %v351_v11  ;;  %v2293_v23 = vld [vmem:[%s3100_s12 + $0x50] sm:$0xf]  ;;  %v2947_v31 = vld [vmem:[%s3702_s1 + $0x1f8] sm:$0xff] }
  0x23   : > { %v2853_v21 = vld [vmem:[#allocation2 + $0x28] sm:$0xf0]  ;;  %v2922_v25 = vld [vmem:[%s3702_s1 + $0x130] sm:$0xff]  ;;  %v342_v27 = vrot.slane %v341_v14, 4  ;;  %280 = vst [vmem:[#allocation2 + $0x28] sm:$0xf] %v2293_v23 }
  0x24   : > { %3008 = vmatpush.bf16.msra.mxu1 %v2885_v46  ;;  %1596 = vmatpush.bf16.msra.mxu0 %v2885_v46  ;;  %v2375_v24 = vor.u32 %v2853_v21, %v2374_v13  ;;  %v2938_v28 = vld [vmem:[%s3702_s1 + $0x1b0] sm:$0xff]  ;;  %v356_v30 = vrot.slane %v355_v22, 4  ;;  %v2302_v32 = vld [vmem:[%s3100_s12 + $0xa0] sm:$0xf]  ;;  %v2303_v35 = vld [vmem:[%s3100_s12 + $0xa8] sm:$0xf] }
  0x25   : > { %1654 = vmatpush.bf16.msra.mxu2 %v2901_v55  ;;  %v2849_v29 = vld [vmem:[#allocation2 + $0xc] sm:$0xf]  ;;  %v347_v34 = vsel %vm3138_vm2, %v342_v27, %v346_v15  ;;  %445 = vst [vmem:[#allocation2 + $0x54] sm:$0xf] %v2302_v32  ;;  %v2308_v39 = vld [vmem:[%s3100_s12 + $0xd8] sm:$0xf] }
  0x26   : > { %1683 = vmatpush.bf16.msra.mxu3 %v2909_v63  ;;  %v2376_v33 = vld [vmem:[#allocation2 + $0x2c] sm:$0xf0]  ;;  %v361_v38 = vsel %vm3138_vm2, %v356_v30, %v360_v16  ;;  %428 = vst [vmem:[#allocation2 + $0x50] sm:$0xf] %v347_v34  ;;  %v2309_v40 = vld [vmem:[%s3100_s12 + $0xe0] sm:$0xf] }
  0x27   : > { %v2379_v36 = vor.u32 %v2849_v29, %v2376_v33  ;;  %429 = vst [vmem:[#allocation2 + $0x74] sm:$0xf] %v361_v38  ;;  %v2897_v41 = vld [vmem:[%s3702_s1 + $0x68] sm:$0xff]  ;;  %v2946_v42 = vld [vmem:[%s3702_s1 + $0x1f0] sm:$0xff]  ;;  %v295_v43 = vld [vmem:[%s3100_s12 + $0x20] sm:$0xf] }
  0x28   : > { %3009 = vmatpush.bf16.msra.mxu1 %v2884_v57  ;;  %1597 = vmatpush.bf16.msra.mxu0 %v2884_v57  ;;  %446 = vst [vmem:[#allocation2 + $0x78] sm:$0xf] %v2303_v35  ;;  %v2921_v44 = vld [vmem:[%s3702_s1 + $0x128] sm:$0xff]  ;;  %v296_v46 = vld [vmem:[%s3100_s12 + $0x24] sm:$0x1]  ;;  %v363_v49 = vshrl.u32 %v295_v43, 16 }
  0x29   : > { %1655 = vmatpush.bf16.msra.mxu2 %v2900_v8  ;;  %v2937_v45 = vld [vmem:[%s3702_s1 + $0x1a8] sm:$0xff]  ;;  %460 = vst [vmem:[#allocation2 + $0x10] sm:$0xf] %v2308_v39  ;;  %v366_v50 = vshll.u32 %v295_v43, 16  ;;  %v372_v51 = vshll.u32 %v296_v46, 16  ;;  %v2896_v52 = vld [vmem:[%s3702_s1 + $0x60] sm:$0xff] }
  0x2a   : > { %1684 = vmatpush.bf16.msra.mxu3 %v2908_v26  ;;  %461 = vst [vmem:[#allocation2 + $0x34] sm:$0xf] %v2309_v40  ;;  %v297_v47 = vld [vmem:[%s3100_s12 + $0x28] sm:$0xf]  ;;  %v298_v48 = vld [vmem:[%s3100_s12 + $0x2c] sm:$0x1] }
  0x2b   : > { %1608 = vmatmul.bf16.vlgmr.msra.gmra.mxu1 %v2439_v18  ;;  %1598 = vmatmul.bf16.vlgmr.msra.gmra.mxu0 %v2367_v20  ;;  %v377_v53 = vshrl.u32 %v297_v47, 16  ;;  %v380_v54 = vshll.u32 %v297_v47, 16  ;;  %v386_v55 = vshll.u32 %v298_v48, 16  ;;  %v2945_v56 = vld [vmem:[%s3702_s1 + $0x1e8] sm:$0xff]  ;;  %v2474_v57 = vld [vmem:[#allocation2 + $0xd8] sm:$0xf] }
  0x2c   : > { %1619 = vmatpush.bf16.msrb.mxu1 %v2899_v3  ;;  %1706 = vmatpush.bf16.msrb.mxu0 %v2923_v9  ;;  %v2879_v58 = vld [vmem:[#allocation2 + $0xf8] sm:$0xf0]  ;;  %v2920_v59 = vld [vmem:[%s3702_s1 + $0x120] sm:$0xff]  ;;  %v2402_v60 = vld [vmem:[#allocation2 + $0x48] sm:$0xf]  ;;  %v365_v62 = vrot.slane %v363_v49, 4 }
  0x2d   : > { %1764 = vmatpush.bf16.msrb.mxu2 %v2939_v10  ;;  %1685 = vmatmul.bf16.vlgmr.msra.gmra.mxu3 %v2379_v36  ;;  %v2861_v61 = vld [vmem:[#allocation2 + $0x68] sm:$0xf0]  ;;  %v368_v63 = vrot.slane %v366_v50, 5  ;;  %v2936_v0 = vld [vmem:[%s3702_s1 + $0x1a0] sm:$0xff]  ;;  %v2895_v1 = vld [vmem:[%s3702_s1 + $0x58] sm:$0xff]  ;;  %v374_v3 = vrot.slane %v372_v51, 5  ;;  %v2475_v17 = vor.u32 %v2879_v58, %v2474_v57 }
  0x2e   : > { %1656 = vmatmul.bf16.vlgmr.msra.gmra.mxu2 %v2375_v24  ;;  %1793 = vmatpush.bf16.msrb.mxu3 %v2947_v31  ;;  %v2410_v2 = vld [vmem:[#allocation2 + $0x50] sm:$0xf]  ;;  %v379_v4 = vrot.slane %v377_v53, 4  ;;  %v382_v5 = vrot.slane %v380_v54, 5  ;;  %v2862_v6 = vld [vmem:[#allocation2 + $0x70] sm:$0xf0] }
  0x2f   : > { %v369_v7 = vor.u32 %v368_v63, %v365_v62  ;;  %v2294_v8 = vld [vmem:[%s3100_s12 + $0x58] sm:$0xf]  ;;  %v2295_v9 = vld [vmem:[%s3100_s12 + $0x60] sm:$0xf]  ;;  %v388_v12 = vrot.slane %v386_v55, 5  ;;  %v2894_v18 = vld [vmem:[%s3702_s1 + $0x50] sm:$0xff]  ;;  %v2411_v24 = vor.u32 %v2862_v6, %v2410_v2 }
  0x30   : > { %1620 = vmatpush.bf16.msrb.mxu1 %v2898_v19  ;;  %1707 = vmatpush.bf16.msrb.mxu0 %v2922_v25  ;;  %v2919_v10 = vld [vmem:[%s3702_s1 + $0x118] sm:$0xff]  ;;  %v383_v11 = vor.u32 %v382_v5, %v379_v4  ;;  %281 = vst [vmem:[#allocation2 + $0x4c] sm:$0xf] %v2294_v8  ;;  %v299_v13 = vld [vmem:[%s3100_s12 + $0x30] sm:$0xf]  ;;  %v2403_v19 = vor.u32 %v2861_v61, %v2402_v60  ;;  %v2944_v40 = vld [vmem:[%s3702_s1 + $0x1e0] sm:$0xff] }
  0x31   : > { %1765 = vmatpush.bf16.msrb.mxu2 %v2938_v28  ;;  %v2858_v14 = vld [vmem:[#allocation2 + $0x54] sm:$0xf]  ;;  %v370_v15 = vrot.slane %v369_v7, 4  ;;  %282 = vst [vmem:[#allocation2 + $0x70] sm:$0xf] %v2295_v9  ;;  %v391_v16 = vshrl.u32 %v299_v13, 16 }
  0x32   : > { %1794 = vmatpush.bf16.msrb.mxu3 %v2946_v42  ;;  %v2412_v20 = vld [vmem:[#allocation2 + $0x74] sm:$0xf0]  ;;  %v384_v21 = vrot.slane %v383_v11, 4  ;;  %v2304_v22 = vld [vmem:[%s3100_s12 + $0xb0] sm:$0xf]  ;;  %v394_v23 = vshll.u32 %v299_v13, 16 }
  0x33   : > { %v2918_v25 = vld [vmem:[%s3702_s1 + $0x110] sm:$0xff]  ;;  %v375_v26 = vsel %vm3138_vm2, %v370_v15, %v374_v3  ;;  %v2305_v27 = vld [vmem:[%s3100_s12 + $0xb8] sm:$0xf]  ;;  %447 = vst [vmem:[#allocation2 + $0x9c] sm:$0xf] %v2304_v22  ;;  %v393_v33 = vrot.slane %v391_v16, 4  ;;  %v2415_v35 = vor.u32 %v2858_v14, %v2412_v20 }
  0x34   : > { %1621 = vmatpush.bf16.msrb.mxu1 %v2897_v41  ;;  %1708 = vmatpush.bf16.msrb.mxu0 %v2921_v44  ;;  %v2310_v28 = vld [vmem:[%s3100_s12 + $0xe8] sm:$0xf]  ;;  %v389_v29 = vsel %vm3138_vm2, %v384_v21, %v388_v12  ;;  %430 = vst [vmem:[#allocation2 + $0x98] sm:$0xf] %v375_v26  ;;  %v300_v30 = vld [vmem:[%s3100_s12 + $0x34] sm:$0x1] }
  0x35   : > { %1766 = vmatpush.bf16.msrb.mxu2 %v2937_v45  ;;  %v301_v31 = vld [vmem:[%s3100_s12 + $0x38] sm:$0xf]  ;;  %431 = vst [vmem:[#allocation2 + $0xbc] sm:$0xf] %v389_v29  ;;  %v2311_v32 = vld [vmem:[%s3100_s12 + $0xf0] sm:$0xf] }
  0x36   : > { %1795 = vmatpush.bf16.msrb.mxu3 %v2945_v56  ;;  %v396_v34 = vrot.slane %v394_v23, 5  ;;  %v2935_v36 = vld [vmem:[%s3702_s1 + $0x198] sm:$0xff]  ;;  %448 = vst [vmem:[#allocation2 + $0xc0] sm:$0xf] %v2305_v27  ;;  %v400_v39 = vshll.u32 %v300_v30, 16  ;;  %v405_v42 = vshrl.u32 %v301_v31, 16 }
  0x37   : > { %v302_v38 = vld [vmem:[%s3100_s12 + $0x3c] sm:$0x1]  ;;  %462 = vst [vmem:[#allocation2 + $0x58] sm:$0xf] %v2310_v28  ;;  %v2893_v43 = vld [vmem:[%s3702_s1 + $0x48] sm:$0xff]  ;;  %v408_v45 = vshll.u32 %v301_v31, 16 }
  0x38   : > { %1622 = vmatpush.bf16.msrb.mxu1 %v2896_v52  ;;  %1709 = vmatpush.bf16.msrb.mxu0 %v2920_v59  ;;  %v397_v41 = vor.u32 %v396_v34, %v393_v33  ;;  %463 = vst [vmem:[#allocation2 + $0x7c] sm:$0xf] %v2311_v32  ;;  %v402_v44 = vrot.slane %v400_v39, 5  ;;  %v2917_v46 = vld [vmem:[%s3702_s1 + $0x108] sm:$0xff]  ;;  %v407_v48 = vrot.slane %v405_v42, 4  ;;  %v414_v49 = vshll.u32 %v302_v38, 16 }
  0x39   : > { %1767 = vmatpush.bf16.msrb.mxu2 %v2936_v0  ;;  %v2934_v50 = vld [vmem:[%s3702_s1 + $0x190] sm:$0xff]  ;;  %v410_v51 = vrot.slane %v408_v45, 5  ;;  %v2943_v52 = vld [vmem:[%s3702_s1 + $0x1d8] sm:$0xff]  ;;  %v2296_v53 = vld [vmem:[%s3100_s12 + $0x68] sm:$0xf] }
  0x3a   : > { %1796 = vmatpush.bf16.msrb.mxu3 %v2944_v40  ;;  %v398_v47 = vrot.slane %v397_v41, 4  ;;  %v2297_v55 = vld [vmem:[%s3100_s12 + $0x70] sm:$0xf]  ;;  %v2892_v56 = vld [vmem:[%s3702_s1 + $0x40] sm:$0xff]  ;;  %v416_v58 = vrot.slane %v414_v49, 5  ;;  %v2931_v59 = vld [vmem:[%s3702_s1 + $0x178] sm:$0xff] }
  0x3b   : > { %1613 = vmatmul.bf16.gmra.mxu1 %v2475_v17  ;;  %1603 = vmatmul.bf16.gmra.mxu0 %v2403_v19  ;;  %v411_v57 = vor.u32 %v410_v51, %v407_v48  ;;  %v2916_v60 = vld [vmem:[%s3702_s1 + $0x100] sm:$0xff]  ;;  %283 = vst [vmem:[#allocation2 + $0x94] sm:$0xf] %v2296_v53  ;;  %v2955_v62 = vld [vmem:[%s3702_s1 + $0x238] sm:$0xff]  ;;  %v2368_v0 = vld [vmem:[#allocation2 + $0x24] sm:$0xf0] }
  0x3c   : > { %1623 = vmatpush.bf16.msrb.mxu1 %v2895_v1  ;;  %1710 = vmatpush.bf16.msrb.mxu0 %v2919_v10  ;;  %v403_v54 = vsel %vm3138_vm2, %v398_v47, %v402_v44  ;;  %v2848_v61 = vld [vmem:[#allocation2 + $0x4] sm:$0xf]  ;;  %284 = vst [vmem:[#allocation2 + $0xb8] sm:$0xf] %v2297_v55  ;;  %v2382_v1 = vld [vmem:[#allocation2 + $0x10] sm:$0xf] }
  0x3d   : > { %1768 = vmatpush.bf16.msrb.mxu2 %v2935_v36  ;;  %1690 = vmatmul.bf16.gmra.mxu3 %v2415_v35  ;;  %432 = vst [vmem:[#allocation2 + $0xe0] sm:$0xf] %v403_v54  ;;  %v412_v63 = vrot.slane %v411_v57, 4  ;;  %v2854_v2 = vld [vmem:[#allocation2 + $0x30] sm:$0xf0]  ;;  %v2371_v11 = vor.u32 %v2848_v61, %v2368_v0  ;;  %v2929_v19 = vld [vmem:[%s3702_s1 + $0x168] sm:$0xff] }
  0x3e   : > { %1661 = vmatmul.bf16.gmra.mxu2 %v2411_v24  ;;  %1797 = vmatpush.bf16.msrb.mxu3 %v2943_v52  ;;  %v2446_v3 = vld [vmem:[#allocation2 + $0x98] sm:$0xf]  ;;  %v2871_v4 = vld [vmem:[#allocation2 + $0xb8] sm:$0xf0]  ;;  %v2930_v5 = vld [vmem:[%s3702_s1 + $0x170] sm:$0xff]  ;;  %v2383_v12 = vor.u32 %v2854_v2, %v2382_v1 }
  0x3f   : > { %v417_v6 = vsel %vm3138_vm2, %v412_v63, %v416_v58  ;;  %v2867_v7 = vld [vmem:[#allocation2 + $0x9c] sm:$0xf]  ;;  %v3308_v8 = vld [vmem:[%s3702_s1 + $0x230] sm:$0xff]  ;;  %v2306_v9 = vld [vmem:[%s3100_s12 + $0xc0] sm:$0xf]  ;;  %v2447_v15 = vor.u32 %v2871_v4, %v2446_v3 }
  0x40   : > { %1624 = vmatpush.bf16.msrb.mxu1 %v2894_v18  ;;  %1711 = vmatpush.bf16.msrb.mxu0 %v2918_v25  ;;  %433 = vst [vmem:[#allocation2 + $0x104] sm:$0xf] %v417_v6  ;;  %v2307_v10 = vld [vmem:[%s3100_s12 + $0xc8] sm:$0xf]  ;;  %v2312_v13 = vld [vmem:[%s3100_s12 + $0xf8] sm:$0xf] }
  0x41   : > { %1769 = vmatpush.bf16.msrb.mxu2 %v2934_v50  ;;  %449 = vst [vmem:[#allocation2 + $0xe4] sm:$0xf] %v2306_v9  ;;  %v2313_v14 = vld [vmem:[%s3100_s12 + $0x100] sm:$0xf]  ;;  %v2332_v17 = vld [vmem:[%s3100_s12 + $0x8] sm:$0xf] }
  0x42   : > { %v2448_v16 = vld [vmem:[#allocation2 + $0xbc] sm:$0xf0]  ;;  %450 = vst [vmem:[#allocation2 + $0x108] sm:$0xf] %v2307_v10  ;;  %v2333_v18 = vld [vmem:[%s3100_s12 + $0x10] sm:$0xf] }
  0x43   : > { %464 = vst [vmem:[#allocation2 + $0xa0] sm:$0xf] %v2312_v13  ;;  %v2933_v20 = vld [vmem:[%s3702_s1 + $0x188] sm:$0xff]  ;;  %v2451_v21 = vor.u32 %v2867_v7, %v2448_v16  ;;  %v2942_v23 = vld [vmem:[%s3702_s1 + $0x1d0] sm:$0xff]  ;;  %v2932_v24 = vld [vmem:[%s3702_s1 + $0x180] sm:$0xff] }
  0x44   : > { %1625 = vmatpush.bf16.msrb.mxu1 %v2893_v43  ;;  %1712 = vmatpush.bf16.msrb.mxu0 %v2917_v46  ;;  %465 = vst [vmem:[#allocation2 + $0xc4] sm:$0xf] %v2313_v14  ;;  %v3326_v22 = vld [vmem:[%s3702_s1 + $0x228] sm:$0xff]  ;;  %v2298_v25 = vld [vmem:[%s3100_s12 + $0x78] sm:$0xf]  ;;  %v2928_v26 = vld [vmem:[%s3702_s1 + $0x160] sm:$0xff] }
  0x45   : > { %621 = vst [vmem:[#allocation2 + $0x18] sm:$0xf] %v2332_v17  ;;  %1770 = vmatpush.bf16.msrb.mxu2 %v2933_v20  ;;  %1798 = vmatpush.bf16.msrb.mxu3 %v2942_v23  ;;  %v2941_v27 = vld [vmem:[%s3702_s1 + $0x1c8] sm:$0xff]  ;;  %v2299_v28 = vld [vmem:[%s3100_s12 + $0x80] sm:$0xf]  ;;  %v2927_v30 = vld [vmem:[%s3702_s1 + $0x158] sm:$0xff] }
  0x46   : > { %622 = vst [vmem:[#allocation2 + $0x3c] sm:$0xf] %v2333_v18  ;;  %v3346_v29 = vld [vmem:[%s3702_s1 + $0x220] sm:$0xff]  ;;  %v2857_v31 = vld [vmem:[#allocation2 + $0x4c] sm:$0xf]  ;;  %v2926_v38 = vld [vmem:[%s3702_s1 + $0x150] sm:$0xff] }
  0x47   : > { %285 = vst [vmem:[#allocation2 + $0xdc] sm:$0xf] %v2298_v25  ;;  %v2404_v32 = vld [vmem:[#allocation2 + $0x6c] sm:$0xf0]  ;;  %v2418_v33 = vld [vmem:[#allocation2 + $0x58] sm:$0xf] }
  0x48   : > { %1626 = vmatpush.bf16.msrb.mxu1 %v2892_v56  ;;  %1713 = vmatpush.bf16.msrb.mxu0 %v2916_v60  ;;  %286 = vst [vmem:[#allocation2 + $0x100] sm:$0xf] %v2299_v28  ;;  %v2863_v34 = vld [vmem:[#allocation2 + $0x78] sm:$0xf0]  ;;  %v2482_v35 = vld [vmem:[#allocation2 + $0xe0] sm:$0xf]  ;;  %v2407_v43 = vor.u32 %v2857_v31, %v2404_v32 }
  0x49   : > { %1771 = vmatpush.bf16.msrb.mxu2 %v2932_v24  ;;  %1799 = vmatpush.bf16.msrb.mxu3 %v2941_v27  ;;  %v2880_v36 = vld [vmem:[#allocation2 + $0x100] sm:$0xf0]  ;;  %v2484_v40 = vld [vmem:[#allocation2 + $0x104] sm:$0xf0]  ;;  %v2315_v42 = vld [vmem:[%s3100_s12 + $0x110] sm:$0xf]  ;;  %v2419_v44 = vor.u32 %v2863_v34, %v2418_v33 }
  0x4a   : > { %v2876_v39 = vld [vmem:[#allocation2 + $0xe4] sm:$0xf]  ;;  %v2314_v41 = vld [vmem:[%s3100_s12 + $0x108] sm:$0xf]  ;;  %v2340_v45 = vld [vmem:[%s3100_s12 + $0x50] sm:$0xf]  ;;  %v2483_v47 = vor.u32 %v2880_v36, %v2482_v35 }
  0x4b   : > { %1627 = vmatmul.bf16.vlgmr.msrb.gmra.mxu1 %v2371_v11  ;;  %1714 = vmatmul.bf16.vlgmr.msrb.gmra.mxu0 %v2383_v12  ;;  %466 = vst [vmem:[#allocation2 + $0xe8] sm:$0xf] %v2314_v41  ;;  %v2341_v46 = vld [vmem:[%s3100_s12 + $0x58] sm:$0xf]  ;;  %v2335_v49 = vld [vmem:[%s3100_s12 + $0x20] sm:$0xf]  ;;  %v2487_v56 = vor.u32 %v2876_v39, %v2484_v40 }
  0x4c   : > { %1735 = vmatpush.bf16.msra.mxu1 %v2931_v59  ;;  %1822 = vmatpush.bf16.msra.mxu0 %v2955_v62  ;;  %467 = vst [vmem:[#allocation2 + $0x10c] sm:$0xf] %v2315_v42  ;;  %v2334_v48 = vld [vmem:[%s3100_s12 + $0x18] sm:$0xf]  ;;  %v2316_v50 = vld [vmem:[%s3100_s12 + $0x90] sm:$0xf] }
  0x4d   : > { %1695 = vmatmul.bf16.gmra.mxu3 %v2451_v21  ;;  %3010 = vmatpush.bf16.msra.mxu2 %v2955_v62  ;;  %638 = vst [vmem:[#allocation2 + $0x1c] sm:$0xf] %v2340_v45  ;;  %v2318_v51 = vld [vmem:[%s3100_s12 + $0x98] sm:$0xf]  ;;  %v485_v52 = vshrl.u32 %v2316_v50, 16  ;;  %v488_v53 = vshll.u32 %v2316_v50, 16 }
  0x4e   : > { %1666 = vmatmul.bf16.gmra.mxu2 %v2447_v15  ;;  %639 = vst [vmem:[#allocation2 + $0x40] sm:$0xf] %v2341_v46  ;;  %v499_v54 = vshrl.u32 %v2318_v51, 16  ;;  %v502_v55 = vshll.u32 %v2318_v51, 16  ;;  %v2925_v57 = vld [vmem:[%s3702_s1 + $0x148] sm:$0xff]  ;;  %v2951_v58 = vld [vmem:[%s3702_s1 + $0x218] sm:$0xff] }
  0x4f   : > { %v2940_v59 = vld [vmem:[%s3702_s1 + $0x1c0] sm:$0xff]  ;;  %623 = vst [vmem:[#allocation2 + $0x60] sm:$0xf] %v2334_v48  ;;  %v3376_v60 = vld [vmem:[%s3702_s1 + $0x210] sm:$0xff]  ;;  %v487_v61 = vrot.slane %v485_v52, 4  ;;  %v490_v0 = vrot.slane %v488_v53, 5 }
  0x50   : > { %1736 = vmatpush.bf16.msra.mxu1 %v2930_v5  ;;  %1823 = vmatpush.bf16.msra.mxu0 %v3308_v8  ;;  %624 = vst [vmem:[#allocation2 + $0x84] sm:$0xf] %v2335_v49  ;;  %v2317_v62 = vld [vmem:[%s3100_s12 + $0x94] sm:$0x1]  ;;  %v2319_v63 = vld [vmem:[%s3100_s12 + $0x9c] sm:$0x1] }
  0x51   : > { %3011 = vmatpush.bf16.msra.mxu2 %v3308_v8  ;;  %1800 = vmatpush.bf16.msrb.mxu3 %v2940_v59  ;;  %v501_v1 = vrot.slane %v499_v54, 4  ;;  %v2924_v2 = vld [vmem:[%s3702_s1 + $0x140] sm:$0xff]  ;;  %v494_v3 = vshll.u32 %v2317_v62, 16  ;;  %v504_v4 = vrot.slane %v502_v55, 5  ;;  %v508_v5 = vshll.u32 %v2319_v63, 16  ;;  %v3390_v12 = vld [vmem:[%s3702_s1 + $0x208] sm:$0xff] }
  0x52   : > { %v491_v6 = vor.u32 %v490_v0, %v487_v61  ;;  %v2348_v7 = vld [vmem:[%s3100_s12 + $0x8] sm:$0xf]  ;;  %v2350_v11 = vld [vmem:[%s3100_s12 + $0x10] sm:$0xf]  ;;  %v2349_v14 = vld [vmem:[%s3100_s12 + $0xc] sm:$0x1] }
  0x53   : > { %v496_v8 = vrot.slane %v494_v3, 5  ;;  %v505_v9 = vor.u32 %v504_v4, %v501_v1  ;;  %v510_v10 = vrot.slane %v508_v5, 5  ;;  %v663_v15 = vshrl.u32 %v2348_v7, 16  ;;  %v2866_v16 = vld [vmem:[#allocation2 + $0x94] sm:$0xf] }
  0x54   : > { %1737 = vmatpush.bf16.msra.mxu1 %v2929_v19  ;;  %1824 = vmatpush.bf16.msra.mxu0 %v3326_v22  ;;  %v492_v13 = vrot.slane %v491_v6, 4  ;;  %v2440_v17 = vld [vmem:[#allocation2 + $0xb4] sm:$0xf0]  ;;  %v2454_v18 = vld [vmem:[#allocation2 + $0xa0] sm:$0xf]  ;;  %v666_v21 = vshll.u32 %v2348_v7, 16 }
  0x55   : > { %3012 = vmatpush.bf16.msra.mxu2 %v3326_v22  ;;  %v506_v19 = vrot.slane %v505_v9, 4  ;;  %v2351_v20 = vld [vmem:[%s3100_s12 + $0x14] sm:$0x1]  ;;  %v2872_v22 = vld [vmem:[#allocation2 + $0xc0] sm:$0xf0]  ;;  %v665_v24 = vrot.slane %v663_v15, 4  ;;  %v2443_v42 = vor.u32 %v2866_v16, %v2440_v17 }
  0x56   : > { %v497_v23 = vsel %vm3138_vm2, %v492_v13, %v496_v8  ;;  %v672_v25 = vshll.u32 %v2349_v14, 16  ;;  %v2390_v27 = vld [vmem:[#allocation2 + $0x18] sm:$0xf]  ;;  %v680_v31 = vshll.u32 %v2350_v11, 16  ;;  %v2855_v32 = vld [vmem:[#allocation2 + $0x38] sm:$0xf0] }
  0x57   : > { %v511_v28 = vsel %vm3138_vm2, %v506_v19, %v510_v10  ;;  %604 = vst [vmem:[#allocation2 + $0x14] sm:$0xf] %v497_v23  ;;  %v686_v33 = vshll.u32 %v2351_v20, 16  ;;  %v2851_v34 = vld [vmem:[#allocation2 + $0x1c] sm:$0xf]  ;;  %v2391_v46 = vor.u32 %v2855_v32, %v2390_v27 }
  0x58   : > { %1738 = vmatpush.bf16.msra.mxu1 %v2928_v26  ;;  %1825 = vmatpush.bf16.msra.mxu0 %v3346_v29  ;;  %v677_v26 = vshrl.u32 %v2350_v11, 16  ;;  %605 = vst [vmem:[#allocation2 + $0x38] sm:$0xf] %v511_v28  ;;  %v2392_v35 = vld [vmem:[#allocation2 + $0x3c] sm:$0xf0]  ;;  %v674_v40 = vrot.slane %v672_v25, 5 }
  0x59   : > { %3013 = vmatpush.bf16.msra.mxu2 %v3346_v29  ;;  %v2342_v36 = vld [vmem:[%s3100_s12 + $0x60] sm:$0xf]  ;;  %v682_v41 = vrot.slane %v680_v31, 5  ;;  %v2336_v49 = vld [vmem:[%s3100_s12 + $0x28] sm:$0xf] }
  0x5a   : > { %v679_v29 = vrot.slane %v677_v26, 4  ;;  %640 = vst [vmem:[#allocation2 + $0x64] sm:$0xf] %v2342_v36  ;;  %v2320_v45 = vld [vmem:[%s3100_s12 + $0xa0] sm:$0xf] }
  0x5b   : > { %1632 = vmatmul.bf16.gmra.mxu1 %v2407_v43  ;;  %1719 = vmatmul.bf16.gmra.mxu0 %v2419_v44  ;;  %v2455_v43 = vor.u32 %v2872_v22, %v2454_v18  ;;  %v688_v44 = vrot.slane %v686_v33, 5  ;;  %v513_v50 = vshrl.u32 %v2320_v45, 16  ;;  %v2337_v51 = vld [vmem:[%s3100_s12 + $0x30] sm:$0xf]  ;;  %625 = vst [vmem:[#allocation2 + $0xa8] sm:$0xf] %v2336_v49 }
  0x5c   : > { %1739 = vmatpush.bf16.msra.mxu1 %v2927_v30  ;;  %1826 = vmatpush.bf16.msra.mxu0 %v2951_v58  ;;  %v668_v30 = vrot.slane %v666_v21, 5  ;;  %v683_v48 = vor.u32 %v682_v41, %v679_v29  ;;  %v2322_v52 = vld [vmem:[%s3100_s12 + $0xa8] sm:$0xf]  ;;  %626 = vst [vmem:[#allocation2 + $0xcc] sm:$0xf] %v2337_v51  ;;  %v516_v55 = vshll.u32 %v2320_v45, 16 }
  0x5d   : > { %1700 = vmatmul.bf16.gmra.mxu3 %v2487_v56  ;;  %3014 = vmatpush.bf16.msra.mxu2 %v2951_v58  ;;  %v2395_v56 = vor.u32 %v2851_v34, %v2392_v35  ;;  %v515_v58 = vrot.slane %v513_v50, 4  ;;  %v527_v59 = vshrl.u32 %v2322_v52, 16  ;;  %v2321_v62 = vld [vmem:[%s3100_s12 + $0xa4] sm:$0x1]  ;;  %v2323_v63 = vld [vmem:[%s3100_s12 + $0xac] sm:$0x1] }
  0x5e   : > { %1671 = vmatmul.bf16.gmra.mxu2 %v2483_v47  ;;  %v669_v39 = vor.u32 %v668_v30, %v665_v24  ;;  %v684_v54 = vrot.slane %v683_v48, 4  ;;  %v522_v0 = vshll.u32 %v2321_v62, 16  ;;  %v536_v3 = vshll.u32 %v2323_v63, 16  ;;  %v2352_v4 = vld [vmem:[%s3100_s12 + $0x18] sm:$0xf] }
  0x5f   : > { %v529_v1 = vrot.slane %v527_v59, 4  ;;  %v691_v7 = vshrl.u32 %v2352_v4, 16  ;;  %v2354_v9 = vld [vmem:[%s3100_s12 + $0x20] sm:$0xf]  ;;  %v694_v10 = vshll.u32 %v2352_v4, 16 }
  0x60   : > { %1740 = vmatpush.bf16.msra.mxu1 %v2926_v38  ;;  %1827 = vmatpush.bf16.msra.mxu0 %v3376_v60  ;;  %v2343_v38 = vld [vmem:[%s3100_s12 + $0x68] sm:$0xf]  ;;  %v670_v47 = vrot.slane %v669_v39, 4  ;;  %v689_v61 = vsel %vm3138_vm2, %v684_v54, %v688_v44  ;;  %v524_v6 = vrot.slane %v522_v0, 5  ;;  %v2353_v13 = vld [vmem:[%s3100_s12 + $0x1c] sm:$0x1] }
  0x61   : > { %641 = vst [vmem:[#allocation2 + $0x88] sm:$0xf] %v2343_v38  ;;  %3015 = vmatpush.bf16.msra.mxu2 %v3376_v60  ;;  %v518_v60 = vrot.slane %v516_v55, 5  ;;  %v693_v14 = vrot.slane %v691_v7, 4  ;;  %v2875_v15 = vld [vmem:[#allocation2 + $0xdc] sm:$0xf] }
  0x62   : > { %v675_v53 = vsel %vm3138_vm2, %v670_v47, %v674_v40  ;;  %783 = vst [vmem:[#allocation2 + $0x44] sm:$0xf] %v689_v61  ;;  %v2476_v16 = vld [vmem:[#allocation2 + $0xfc] sm:$0xf0]  ;;  %v538_v18 = vrot.slane %v536_v3, 5  ;;  %v696_v20 = vrot.slane %v694_v10, 5 }
  0x63   : > { %782 = vst [vmem:[#allocation2 + $0x20] sm:$0xf] %v675_v53  ;;  %v519_v5 = vor.u32 %v518_v60, %v515_v58  ;;  %v2355_v19 = vld [vmem:[%s3100_s12 + $0x24] sm:$0x1]  ;;  %v700_v21 = vshll.u32 %v2353_v13, 16  ;;  %v705_v23 = vshrl.u32 %v2354_v9, 16  ;;  %v2479_v41 = vor.u32 %v2875_v15, %v2476_v16 }
  0x64   : > { %1741 = vmatpush.bf16.msra.mxu1 %v2925_v57  ;;  %1828 = vmatpush.bf16.msra.mxu0 %v3390_v12  ;;  %v2948_v57 = vld [vmem:[%s3702_s1 + $0x200] sm:$0xff]  ;;  %v2490_v22 = vld [vmem:[#allocation2 + $0xe8] sm:$0xf]  ;;  %v708_v24 = vshll.u32 %v2354_v9, 16  ;;  %v714_v25 = vshll.u32 %v2355_v19, 16  ;;  %v697_v28 = vor.u32 %v696_v20, %v693_v14 }
  0x65   : > { %3016 = vmatpush.bf16.msra.mxu2 %v3390_v12  ;;  %v520_v11 = vrot.slane %v519_v5, 4  ;;  %v2881_v26 = vld [vmem:[#allocation2 + $0x108] sm:$0xf0]  ;;  %v702_v30 = vrot.slane %v700_v21, 5  ;;  %v2426_v31 = vld [vmem:[#allocation2 + $0x60] sm:$0xf] }
  0x66   : > { %v2864_v32 = vld [vmem:[#allocation2 + $0x80] sm:$0xf0]  ;;  %v707_v29 = vrot.slane %v705_v23, 4  ;;  %v710_v33 = vrot.slane %v708_v24, 5  ;;  %v2344_v36 = vld [vmem:[%s3100_s12 + $0x70] sm:$0xf] }
  0x67   : > { %v525_v12 = vsel %vm3138_vm2, %v520_v11, %v524_v6  ;;  %v2860_v34 = vld [vmem:[#allocation2 + $0x64] sm:$0xf]  ;;  %v2345_v38 = vld [vmem:[%s3100_s12 + $0x78] sm:$0xf]  ;;  %v698_v39 = vrot.slane %v697_v28, 4  ;;  %v716_v40 = vrot.slane %v714_v25, 5 }
  0x68   : > { %1742 = vmatpush.bf16.msra.mxu1 %v2924_v2  ;;  %1829 = vmatpush.bf16.msra.mxu0 %v2948_v57  ;;  %v530_v2 = vshll.u32 %v2322_v52, 16  ;;  %606 = vst [vmem:[#allocation2 + $0x5c] sm:$0xf] %v525_v12  ;;  %v2324_v44 = vld [vmem:[%s3100_s12 + $0xb0] sm:$0xf] }
  0x69   : > { %3017 = vmatpush.bf16.msra.mxu2 %v2948_v57  ;;  %v2326_v45 = vld [vmem:[%s3100_s12 + $0xb8] sm:$0xf]  ;;  %v2428_v47 = vld [vmem:[#allocation2 + $0x84] sm:$0xf0]  ;;  %642 = vst [vmem:[#allocation2 + $0xac] sm:$0xf] %v2344_v36  ;;  %v703_v48 = vsel %vm3138_vm2, %v698_v39, %v702_v30 }
  0x6a   : > { %v532_v8 = vrot.slane %v530_v2, 5  ;;  %v2338_v49 = vld [vmem:[%s3100_s12 + $0x38] sm:$0xf]  ;;  %643 = vst [vmem:[#allocation2 + $0xd0] sm:$0xf] %v2345_v38  ;;  %v541_v51 = vshrl.u32 %v2324_v44, 16 }
  0x6b   : > { %1637 = vmatmul.bf16.gmra.mxu1 %v2443_v42  ;;  %1724 = vmatmul.bf16.gmra.mxu0 %v2455_v43  ;;  %v2491_v42 = vor.u32 %v2881_v26, %v2490_v22  ;;  %v711_v43 = vor.u32 %v710_v33, %v707_v29  ;;  %v544_v52 = vshll.u32 %v2324_v44, 16  ;;  %v555_v53 = vshrl.u32 %v2326_v45, 16  ;;  %784 = vst [vmem:[#allocation2 + $0x68] sm:$0xf] %v703_v48  ;;  %v2339_v54 = vld [vmem:[%s3100_s12 + $0x40] sm:$0xf] }
  0x6c   : > { %v533_v17 = vor.u32 %v532_v8, %v529_v1  ;;  %v558_v55 = vshll.u32 %v2326_v45, 16  ;;  %627 = vst [vmem:[#allocation2 + $0xf0] sm:$0xf] %v2338_v49  ;;  %v2325_v58 = vld [vmem:[%s3100_s12 + $0xb4] sm:$0x1]  ;;  %v543_v61 = vrot.slane %v541_v51, 4 }
  0x6d   : > { %1801 = vmatmul.bf16.vlgmr.msrb.gmra.mxu3 %v2395_v56  ;;  %v712_v50 = vrot.slane %v711_v43, 4  ;;  %v2431_v56 = vor.u32 %v2860_v34, %v2428_v47  ;;  %v2327_v59 = vld [vmem:[%s3100_s12 + $0xbc] sm:$0x1]  ;;  %v546_v62 = vrot.slane %v544_v52, 5  ;;  %628 = vst [vmem:[#allocation2 + $0x114] sm:$0xf] %v2339_v54 }
  0x6e   : > { %1772 = vmatmul.bf16.vlgmr.msrb.gmra.mxu2 %v2391_v46  ;;  %v534_v27 = vrot.slane %v533_v17, 4  ;;  %v2427_v46 = vor.u32 %v2864_v32, %v2426_v31  ;;  %v550_v63 = vshll.u32 %v2325_v58, 16  ;;  %v557_v60 = vrot.slane %v555_v53, 4  ;;  %v2356_v3 = vld [vmem:[%s3100_s12 + $0x28] sm:$0xf] }
  0x6f   : > { %v717_v57 = vsel %vm3138_vm2, %v712_v50, %v716_v40  ;;  %v560_v0 = vrot.slane %v558_v55, 5  ;;  %v564_v1 = vshll.u32 %v2327_v59, 16  ;;  %v547_v2 = vor.u32 %v546_v62, %v543_v61  ;;  %v2358_v4 = vld [vmem:[%s3100_s12 + $0x30] sm:$0xf]  ;;  %v2850_v13 = vld [vmem:[#allocation2 + $0x14] sm:$0xf] }
  0x70   : > { %v539_v35 = vsel %vm3138_vm2, %v534_v27, %v538_v18  ;;  %785 = vst [vmem:[#allocation2 + $0x8c] sm:$0xf] %v717_v57  ;;  %v552_v5 = vrot.slane %v550_v63, 5  ;;  %v719_v9 = vshrl.u32 %v2356_v3, 16  ;;  %v722_v10 = vshll.u32 %v2356_v3, 16 }
  0x71   : > { %607 = vst [vmem:[#allocation2 + $0x80] sm:$0xf] %v539_v35  ;;  %v561_v6 = vor.u32 %v560_v0, %v557_v60  ;;  %v566_v7 = vrot.slane %v564_v1, 5  ;;  %v548_v8 = vrot.slane %v547_v2, 4  ;;  %v733_v11 = vshrl.u32 %v2358_v4, 16 }
  0x72   : > { %v2384_v14 = vld [vmem:[#allocation2 + $0x34] sm:$0xf0]  ;;  %v2357_v16 = vld [vmem:[%s3100_s12 + $0x2c] sm:$0x1]  ;;  %v736_v17 = vshll.u32 %v2358_v4, 16  ;;  %v721_v22 = vrot.slane %v719_v9, 4 }
  0x73   : > { %v562_v15 = vrot.slane %v561_v6, 4  ;;  %v2462_v18 = vld [vmem:[#allocation2 + $0xa8] sm:$0xf]  ;;  %v2873_v19 = vld [vmem:[#allocation2 + $0xc8] sm:$0xf0]  ;;  %v553_v20 = vsel %vm3138_vm2, %v548_v8, %v552_v5  ;;  %v724_v12 = vrot.slane %v722_v10, 5  ;;  %v2387_v39 = vor.u32 %v2850_v13, %v2384_v14 }
  0x74   : > { %v2359_v21 = vld [vmem:[%s3100_s12 + $0x34] sm:$0x1]  ;;  %v2360_v23 = vld [vmem:[%s3100_s12 + $0x38] sm:$0xf]  ;;  %v2398_v24 = vld [vmem:[#allocation2 + $0x20] sm:$0xf] }
  0x75   : > { %v567_v25 = vsel %vm3138_vm2, %v562_v15, %v566_v7  ;;  %608 = vst [vmem:[#allocation2 + $0xa4] sm:$0xf] %v553_v20  ;;  %v728_v26 = vshll.u32 %v2357_v16, 16  ;;  %v735_v27 = vrot.slane %v733_v11, 4  ;;  %v2856_v28 = vld [vmem:[#allocation2 + $0x40] sm:$0xf0]  ;;  %v725_v30 = vor.u32 %v724_v12, %v721_v22 }
  0x76   : > { %609 = vst [vmem:[#allocation2 + $0xc8] sm:$0xf] %v567_v25  ;;  %v738_v31 = vrot.slane %v736_v17, 5  ;;  %v742_v32 = vshll.u32 %v2359_v21, 16  ;;  %v2869_v29 = vld [vmem:[#allocation2 + $0xac] sm:$0xf]  ;;  %v2399_v45 = vor.u32 %v2856_v28, %v2398_v24 }
  0x77   : > { %v2464_v33 = vld [vmem:[#allocation2 + $0xcc] sm:$0xf0]  ;;  %v730_v34 = vrot.slane %v728_v26, 5  ;;  %v2361_v35 = vld [vmem:[%s3100_s12 + $0x3c] sm:$0x1]  ;;  %v747_v38 = vshrl.u32 %v2360_v23, 16 }
  0x78   : > { %v2362_v36 = vld [vmem:[%s3100_s12 + $0x40] sm:$0xf]  ;;  %v739_v43 = vor.u32 %v738_v31, %v735_v27  ;;  %v744_v44 = vrot.slane %v742_v32, 5  ;;  %v2363_v47 = vld [vmem:[%s3100_s12 + $0x44] sm:$0x1]  ;;  %v750_v49 = vshll.u32 %v2360_v23, 16  ;;  %v2467_v57 = vor.u32 %v2869_v29, %v2464_v33 }
  0x79   : > { %v2346_v40 = vld [vmem:[%s3100_s12 + $0x80] sm:$0xf]  ;;  %v749_v48 = vrot.slane %v747_v38, 4  ;;  %v756_v52 = vshll.u32 %v2361_v35, 16  ;;  %v761_v53 = vshrl.u32 %v2362_v36, 16  ;;  %v764_v55 = vshll.u32 %v2362_v36, 16 }
  0x7a   : > { %644 = vst [vmem:[#allocation2 + $0xf4] sm:$0xf] %v2346_v40  ;;  %v740_v51 = vrot.slane %v739_v43, 4  ;;  %v752_v54 = vrot.slane %v750_v49, 5  ;;  %v2328_v61 = vld [vmem:[%s3100_s12 + $0xc0] sm:$0xf] }
  0x7b   : > { %1642 = vmatmul.bf16.gmra.mxu1 %v2479_v41  ;;  %1729 = vmatmul.bf16.gmra.mxu0 %v2491_v42  ;;  %v2347_v41 = vld [vmem:[%s3100_s12 + $0x88] sm:$0xf]  ;;  %v726_v42 = vrot.slane %v725_v30, 4  ;;  %v763_v59 = vrot.slane %v761_v53, 4  ;;  %v758_v63 = vrot.slane %v756_v52, 5  ;;  %v766_v60 = vrot.slane %v764_v55, 5 }
  0x7c   : > { %645 = vst [vmem:[#allocation2 + $0x118] sm:$0xf] %v2347_v41  ;;  %v745_v58 = vsel %vm3138_vm2, %v740_v51, %v744_v44  ;;  %v753_v62 = vor.u32 %v752_v54, %v749_v48  ;;  %v2329_v1 = vld [vmem:[%s3100_s12 + $0xc4] sm:$0x1]  ;;  %v2330_v2 = vld [vmem:[%s3100_s12 + $0xc8] sm:$0xf] }
  0x7d   : > { %1806 = vmatmul.bf16.gmra.mxu3 %v2431_v56  ;;  %v731_v50 = vsel %vm3138_vm2, %v726_v42, %v730_v34  ;;  %v770_v56 = vshll.u32 %v2363_v47, 16  ;;  %787 = vst [vmem:[#allocation2 + $0xd4] sm:$0xf] %v745_v58  ;;  %v2331_v3 = vld [vmem:[%s3100_s12 + $0xcc] sm:$0x1]  ;;  %v767_v5 = vor.u32 %v766_v60, %v763_v59  ;;  %v569_v6 = vshrl.u32 %v2328_v61, 16 }
  0x7e   : > { %1777 = vmatmul.bf16.gmra.mxu2 %v2427_v46  ;;  %v2463_v46 = vor.u32 %v2873_v19, %v2462_v18  ;;  %786 = vst [vmem:[#allocation2 + $0xb0] sm:$0xf] %v731_v50  ;;  %v754_v4 = vrot.slane %v753_v62, 4  ;;  %v572_v7 = vshll.u32 %v2328_v61, 16  ;;  %v578_v8 = vshll.u32 %v2329_v1, 16 }
  0x7f   : > { %v772_v0 = vrot.slane %v770_v56, 5  ;;  %v583_v9 = vshrl.u32 %v2330_v2, 16  ;;  %v586_v10 = vshll.u32 %v2330_v2, 16  ;;  %v592_v11 = vshll.u32 %v2331_v3, 16  ;;  %v2859_v22 = vld [vmem:[#allocation2 + $0x5c] sm:$0xf] }
  0x80   : > { %v759_v13 = vsel %vm3138_vm2, %v754_v4, %v758_v63  ;;  %v768_v14 = vrot.slane %v767_v5, 4  ;;  %v571_v15 = vrot.slane %v569_v6, 4  ;;  %v574_v16 = vrot.slane %v572_v7, 5  ;;  %v2420_v25 = vld [vmem:[#allocation2 + $0x7c] sm:$0xf0] }
  0x81   : > { %788 = vst [vmem:[#allocation2 + $0xf8] sm:$0xf] %v759_v13  ;;  %v585_v17 = vrot.slane %v583_v9, 4  ;;  %v580_v20 = vrot.slane %v578_v8, 5  ;;  %v588_v21 = vrot.slane %v586_v10, 5  ;;  %v594_v24 = vrot.slane %v592_v11, 5 }
  0x82   : > { %v773_v18 = vsel %vm3138_vm2, %v768_v14, %v772_v0  ;;  %v575_v19 = vor.u32 %v574_v16, %v571_v15  ;;  %v2434_v26 = vld [vmem:[#allocation2 + $0x68] sm:$0xf]  ;;  %v2865_v27 = vld [vmem:[#allocation2 + $0x88] sm:$0xf0]  ;;  %v2498_v28 = vld [vmem:[#allocation2 + $0xf0] sm:$0xf]  ;;  %v2423_v29 = vor.u32 %v2859_v22, %v2420_v25 }
  0x83   : > { %789 = vst [vmem:[#allocation2 + $0x11c] sm:$0xf] %v773_v18  ;;  %v589_v23 = vor.u32 %v588_v21, %v585_v17  ;;  %v2882_v30 = vld [vmem:[#allocation2 + $0x110] sm:$0xf0]  ;;  %v2435_v33 = vor.u32 %v2865_v27, %v2434_v26  ;;  %v2500_v38 = vld [vmem:[#allocation2 + $0x114] sm:$0xf0] }
  0x84   : > { %v576_v12 = vrot.slane %v575_v19, 4  ;;  %v2499_v35 = vor.u32 %v2882_v30, %v2498_v28  ;;  %v2878_v36 = vld [vmem:[#allocation2 + $0xf4] sm:$0xf]  ;;  %v2868_v40 = vld [vmem:[#allocation2 + $0xa4] sm:$0xf] }
  0x85   : > { %v590_v32 = vrot.slane %v589_v23, 4  ;;  %v2456_v41 = vld [vmem:[#allocation2 + $0xc4] sm:$0xf0]  ;;  %v2470_v42 = vld [vmem:[#allocation2 + $0xb0] sm:$0xf] }
  0x86   : > { %v581_v31 = vsel %vm3138_vm2, %v576_v12, %v580_v20  ;;  %v2874_v43 = vld [vmem:[#allocation2 + $0xd0] sm:$0xf0] }
  0x87   : > { %610 = vst [vmem:[#allocation2 + $0xec] sm:$0xf] %v581_v31  ;;  %v595_v34 = vsel %vm3138_vm2, %v590_v32, %v594_v24  ;;  %v2471_v47 = vor.u32 %v2874_v43, %v2470_v42 }
  0x88   : > { %611 = vst [vmem:[#allocation2 + $0x110] sm:$0xf] %v595_v34  ;;  %v2506_v44 = vld [vmem:[#allocation2 + $0xf8] sm:$0xf] }
  0x8b   : > { %1743 = vmatmul.bf16.vlgmr.msra.gmra.mxu1 %v2387_v39  ;;  %1830 = vmatmul.bf16.vlgmr.msra.gmra.mxu0 %v2399_v45  ;;  %v2503_v39 = vor.u32 %v2878_v36, %v2500_v38  ;;  %v2883_v45 = vld [vmem:[#allocation2 + $0x118] sm:$0xf0] }
  0x8c   : > { %v2507_v49 = vor.u32 %v2883_v45, %v2506_v44 }
  0x8d   : > { %1811 = vmatmul.bf16.gmra.mxu3 %v2467_v57 }
  0x8e   : > { %1782 = vmatmul.bf16.gmra.mxu2 %v2463_v46  ;;  %v2459_v46 = vor.u32 %v2868_v40, %v2456_v41  ;;  %v2877_v54 = vld [vmem:[#allocation2 + $0xec] sm:$0xf] }
  0x8f   : > { %v2492_v55 = vld [vmem:[#allocation2 + $0x10c] sm:$0xf0] }
  0x90   : > { %v2495_v56 = vor.u32 %v2877_v54, %v2492_v55  ;;  %v3511_v54 = vld [vmem:[%s3100_s12 + $0x100] sm:$0xf] }
  0x9b   : > { %1748 = vmatmul.bf16.gmra.mxu1 %v2423_v29  ;;  %1835 = vmatmul.bf16.gmra.mxu0 %v2435_v33 }
  0x9d   : > { %1816 = vmatmul.bf16.gmra.mxu3 %v2503_v39 }
  0x9e   : > { %1787 = vmatmul.bf16.gmra.mxu2 %v2499_v35 }
  0xa8   : > { %v1609_v48 = vpop.f32.mrf.mxu1  ;;  %v1599_v37 = vpop.f32.mrf.mxu0 }
  0xab   : > { %1753 = vmatmul.bf16.gmra.mxu1 %v2459_v46  ;;  %1840 = vmatmul.bf16.gmra.mxu0 %v2471_v47 }
  0xae   : > { %1845 = vmatmul.bf16.vlgmr.msra.gmra.mxu2 %v2507_v49  ;;  %v3496_v49 = vld [vmem:[%s3100_s12 + $0xd8] sm:$0xf] }
  0xb0   : > { %v1611_v51 = vpop.f32.mrf.mxu1  ;;  %v1601_v52 = vpop.f32.mrf.mxu0 }
  0xb1   : > { %v1657_v50 = vpop.f32.mrf.mxu2  ;;  %v1686_v53 = vpop.f32.mrf.mxu3 }
  0xb8   : > { %v1614_v58 = vpop.f32.mrf.mxu1  ;;  %v1604_v59 = vpop.f32.mrf.mxu0 }
  0xb9   : > { %v1659_v57 = vpop.f32.mrf.mxu2  ;;  %v1688_v61 = vpop.f32.mrf.mxu3 }
  0xbb   : > { %1758 = vmatmul.bf16.gmra.mxu1 %v2495_v56 }
  0xc0   : > { %v3467_v63 = vpop.f32.mrf.mxu1  ;;  %v1606_v60 = vpop.f32.mrf.mxu0 }
  0xc1   : > { %v1662_v62 = vpop.f32.mrf.mxu2  ;;  %v1691_v0 = vpop.f32.mrf.mxu3 }
  0xc8   : > { %v1628_v2 = vpop.f32.mrf.mxu1  ;;  %v1715_v3 = vpop.f32.mrf.mxu0 }
  0xc9   : > { %v1664_v1 = vpop.f32.mrf.mxu2  ;;  %v1629_v4 = vadd.f32 %v1628_v2, %v1599_v37  ;;  %v1693_v6 = vpop.f32.mrf.mxu3  ;;  %v2805_v2 = vld [vmem:[%s3100_s12 + $0x94] sm:$0x1] }
  0xcb   : > { %v1658_v5 = vadd.f32 %v1657_v50, %v1629_v4  ;;  %v3499_v50 = vld [vmem:[%s3100_s12 + $0xe0] sm:$0xf]  ;;  %v2807_v4 = vld [vmem:[%s3100_s12 + $0x9c] sm:$0x1] }
  0xcd   : > { %v1687_v7 = vadd.f32 %v1686_v53, %v1658_v5  ;;  %v3508_v53 = vld [vmem:[%s3100_s12 + $0xf8] sm:$0xf] }
  0xcf   : > { %v3469_v8 = vadd.f32 %v1715_v3, %v1687_v7  ;;  %v2806_v3 = vld [vmem:[%s3100_s12 + $0x98] sm:$0xf] }
  0xd0   : > { %v1630_v10 = vpop.f32.mrf.mxu1  ;;  %v1717_v11 = vpop.f32.mrf.mxu0 }
  0xd1   : > { %v1667_v9 = vpop.f32.mrf.mxu2  ;;  %v1631_v13 = vadd.f32 %v1630_v10, %v1601_v52  ;;  %v1696_v15 = vpop.f32.mrf.mxu3  ;;  %v3505_v52 = vld [vmem:[%s3100_s12 + $0xf0] sm:$0xf] }
  0xd3   : > { %v1660_v14 = vadd.f32 %v1659_v57, %v1631_v13  ;;  %v2809_v13 = vld [vmem:[%s3100_s12 + $0xa4] sm:$0x1] }
  0xd5   : > { %v1689_v46 = vadd.f32 %v1688_v61, %v1660_v14  ;;  %v2804_v61 = vld [vmem:[%s3100_s12 + $0x90] sm:$0xf]  ;;  %v2810_v14 = vld [vmem:[%s3100_s12 + $0xa8] sm:$0xf] }
  0xd7   : > { %v3513_v55 = vadd.f32 %v1717_v11, %v1689_v46  ;;  %v2808_v11 = vld [vmem:[%s3100_s12 + $0xa0] sm:$0xf] }
  0xd8   : > { %v1633_v17 = vpop.f32.mrf.mxu1  ;;  %v1720_v18 = vpop.f32.mrf.mxu0 }
  0xd9   : > { %v1669_v16 = vpop.f32.mrf.mxu2  ;;  %v1634_v19 = vadd.f32 %v1633_v17, %v1604_v59  ;;  %v3473_v23 = vpop.f32.mrf.mxu3  ;;  %v3523_v59 = vld [vmem:[%s3100_s12 + $0x110] sm:$0xf]  ;;  %v2811_v17 = vld [vmem:[%s3100_s12 + $0xac] sm:$0x1] }
  0xdb   : > { %v1663_v20 = vadd.f32 %v1662_v62, %v1634_v19  ;;  %v1911_v62 = vunpack.c.l.bf16 %v3496_v49  ;;  %v2813_v19 = vld [vmem:[%s3100_s12 + $0xb4] sm:$0x1]  ;;  %v2824_v49 = vld [vmem:[%s3100_s12 + $0x70] sm:$0xf] }
  0xdc   : > { %v1944_v46 = vunpack.c.l.bf16 %v2813_v19 }
  0xdd   : > { %v1692_v21 = vadd.f32 %v1691_v0, %v1663_v20  ;;  %v1935_v20 = vunpack.c.l.bf16 %v2804_v61  ;;  %v2819_v61 = vld [vmem:[%s3100_s12 + $0xcc] sm:$0x1] }
  0xde   : > { %v1950_v7 = vunpack.c.l.bf16 %v2819_v61  ;;  %v2821_v61 = vld [vmem:[%s3100_s12 + $0x58] sm:$0xf] }
  0xdf   : > { %v3471_v22 = vadd.f32 %v1720_v18, %v1692_v21  ;;  %v2812_v18 = vld [vmem:[%s3100_s12 + $0xb0] sm:$0xf]  ;;  %v1936_v21 = vunpack.c.l.bf16 %v2805_v2 }
  0xe0   : > { %v1635_v24 = vpop.f32.mrf.mxu1  ;;  %v1722_v25 = vpop.f32.mrf.mxu0 }
  0xe1   : > { %v1672_v12 = vpop.f32.mrf.mxu2  ;;  %v1636_v26 = vadd.f32 %v1635_v24, %v1606_v60  ;;  %v3477_v29 = vpop.f32.mrf.mxu3  ;;  %v1912_v60 = vunpack.c.l.bf16 %v3499_v50  ;;  %v1938_v24 = vunpack.c.l.bf16 %v2807_v4 }
  0xe3   : > { %v1665_v27 = vadd.f32 %v1664_v1, %v1636_v26  ;;  %v1914_v1 = vunpack.c.l.bf16 %v3505_v52  ;;  %v2814_v26 = vld [vmem:[%s3100_s12 + $0xb8] sm:$0xf]  ;;  %v2827_v52 = vld [vmem:[%s3100_s12 + $0x88] sm:$0xf] }
  0xe5   : > { %v1694_v47 = vadd.f32 %v1693_v6, %v1665_v27  ;;  %v1915_v6 = vunpack.c.l.bf16 %v3508_v53  ;;  %v2815_v27 = vld [vmem:[%s3100_s12 + $0xbc] sm:$0x1] }
  0xe6   : > { %v1946_v2 = vunpack.c.l.bf16 %v2815_v27 }
  0xe7   : > { %v3515_v56 = vadd.f32 %v1722_v25, %v1694_v47  ;;  %v1945_v47 = vunpack.c.l.bf16 %v2814_v26 }
  0xe8   : > { %v1638_v30 = vpop.f32.mrf.mxu1  ;;  %v1725_v31 = vpop.f32.mrf.mxu0 }
  0xe9   : > { %v3475_v28 = vpop.f32.mrf.mxu2  ;;  %v1639_v32 = vadd.f32 %v1638_v30, %v1609_v48  ;;  %v3487_v42 = vpop.f32.mrf.mxu3  ;;  %v2816_v30 = vld [vmem:[%s3100_s12 + $0xc0] sm:$0xf] }
  0xeb   : > { %v1668_v33 = vadd.f32 %v1667_v9, %v1639_v32  ;;  %v1940_v32 = vunpack.c.l.bf16 %v2809_v13  ;;  %v1972_v13 = vrot.slane %v1938_v24, 1 }
  0xed   : > { %v1697_v34 = vadd.f32 %v1696_v15, %v1668_v33  ;;  %v1941_v33 = vunpack.c.l.bf16 %v2810_v14  ;;  %v1975_v9 = vrot.slane %v1940_v32, 1 }
  0xef   : > { %v3479_v35 = vadd.f32 %v1725_v31, %v1697_v34  ;;  %v1939_v31 = vunpack.c.l.bf16 %v2808_v11  ;;  %v2817_v34 = vld [vmem:[%s3100_s12 + $0xc4] sm:$0x1] }
  0xf0   : > { %v1640_v38 = vpop.f32.mrf.mxu1  ;;  %v3483_v39 = vpop.f32.mrf.mxu0  ;;  %v1948_v4 = vunpack.c.l.bf16 %v2817_v34 }
  0xf1   : > { %v3481_v36 = vpop.f32.mrf.mxu2  ;;  %v1641_v40 = vadd.f32 %v1640_v38, %v1611_v51  ;;  %v3502_v51 = vld [vmem:[%s3100_s12 + $0xe8] sm:$0xf]  ;;  %v3517_v57 = vpop.f32.mrf.mxu3  ;;  %v1974_v14 = vrot.slane %v1939_v31, 1  ;;  %v1984_v31 = vrot.slane %v1946_v2, 1  ;;  %v2822_v2 = vld [vmem:[%s3100_s12 + $0x60] sm:$0xf] }
  0xf2   : > { %v1913_v0 = vunpack.c.l.bf16 %v3502_v51  ;;  %v2818_v38 = vld [vmem:[%s3100_s12 + $0xc8] sm:$0xf]  ;;  %v2826_v51 = vld [vmem:[%s3100_s12 + $0x80] sm:$0xf]  ;;  %v2018_v53 = vunpack.c.l.bf16 %v2822_v2 }
  0xf3   : > { %v3485_v41 = vadd.f32 %v1669_v16, %v1641_v40  ;;  %v1942_v40 = vunpack.c.l.bf16 %v2811_v17  ;;  %v1949_v11 = vunpack.c.l.bf16 %v2818_v38  ;;  %v1977_v17 = vrot.slane %v1941_v33, 1  ;;  %v2836_v2 = vld [vmem:[%s3100_s12 + $0x28] sm:$0xf] }
  0xf4   : > { %v1976_v27 = vsel %vm1967_vm3, %v1974_v14, %v1975_v9  ;;  %v1987_v38 = vrot.slane %v1948_v4, 1  ;;  %v2820_v9 = vld [vmem:[%s3100_s12 + $0x50] sm:$0xf] }
  0xf8   : > { %v1643_v44 = vpop.f32.mrf.mxu1  ;;  %v3491_v45 = vpop.f32.mrf.mxu0 }
  0xf9   : > { %v3489_v43 = vpop.f32.mrf.mxu2  ;;  %v1644_v48 = vadd.f32 %v1643_v44, %v1614_v58  ;;  %v3520_v58 = vld [vmem:[%s3100_s12 + $0x108] sm:$0xf]  ;;  %v1943_v44 = vunpack.c.l.bf16 %v2812_v18  ;;  %v1978_v18 = vrot.slane %v1942_v40, 1  ;;  %v3557_v26 = vpop.f32.mrf.mxu3 }
  0xfb   : > { %v3493_v37 = vadd.f32 %v1672_v12, %v1644_v48  ;;  %v1937_v12 = vunpack.c.l.bf16 %v2806_v3  ;;  %v1947_v3 = vunpack.c.l.bf16 %v2816_v30  ;;  %v1980_v19 = vrot.slane %v1943_v44, 1 }
  0xfc   : > { %v1979_v24 = vsel %vm1967_vm3, %v1977_v17, %v1978_v18  ;;  %v1983_v30 = vrot.slane %v1945_v47, 1  ;;  %v2016_v18 = vunpack.c.l.bf16 %v2820_v9  ;;  %v2834_v9 = vld [vmem:[%s3100_s12 + $0x20] sm:$0xf] }
  0xfd   : > { %v1971_v10 = vrot.slane %v1937_v12, 1  ;;  %v1986_v32 = vrot.slane %v1947_v3, 1 }
  0xfe   : > { %v1985_v44 = vsel %vm1967_vm3, %v1983_v30, %v1984_v31 }
  0xff   : > { %v1988_v4 = vsel %vm1967_vm3, %v1986_v32, %v1987_v38  ;;  %v2832_v38 = vld [vmem:[%s3100_s12 + $0x18] sm:$0xf] }
 0x100   : > { %v1645_v15 = vpop.f32.mrf.mxu1  ;;  %v3542_v16 = vpop.f32.mrf.mxu0 }
 0x101   : > { %v3533_v5 = vpop.f32.mrf.mxu2  ;;  %v1646_v25 = vadd.f32 %v1645_v15, %v3467_v63  ;;  %v1968_v63 = vrot.slane %v1935_v20, 1  ;;  %v1969_v15 = vrot.slane %v1936_v21, 1  ;;  %v1981_v20 = vrot.slane %v1944_v46, 1 }
 0x102   : > { %v1990_v46 = vrot.slane %v1950_v7, 1  ;;  %v2003_v7 = vadd.f32 %v1979_v24, %v1914_v1  ;;  %v3711_v1 = vunpack.c.l.bf16 %v3523_v59  ;;  %v2830_v59 = vld [vmem:[%s3100_s12 + $0x10] sm:$0xf]  ;;  %v2831_v24 = vld [vmem:[%s3100_s12 + $0x14] sm:$0x1] }
 0x103   : > { %v3554_v48 = vadd.f32 %v3475_v28, %v1646_v25  ;;  %v1970_v28 = vsel %vm1967_vm3, %v1968_v63, %v1969_v15  ;;  %v1973_v25 = vsel %vm1967_vm3, %v1971_v10, %v1972_v13  ;;  %v1982_v34 = vsel %vm1967_vm3, %v1980_v19, %v1981_v20  ;;  %v2823_v15 = vld [vmem:[%s3100_s12 + $0x68] sm:$0xf] }
 0x104   : > { %v1989_v10 = vrot.slane %v1949_v11, 1  ;;  %v2000_v47 = vadd.f32 %v1970_v28, %v1911_v62  ;;  %v2002_v63 = vadd.f32 %v1976_v27, %v1913_v0  ;;  %v2825_v62 = vld [vmem:[%s3100_s12 + $0x78] sm:$0xf]  ;;  %v3709_v11 = vunpack.c.l.bf16 %v3511_v54 }
 0x105   : > { %v3710_v13 = vunpack.c.l.bf16 %v3520_v58  ;;  %v2017_v19 = vunpack.c.l.bf16 %v2821_v61  ;;  %v2020_v28 = vunpack.c.l.bf16 %v2824_v49  ;;  %v2021_v54 = vunpack.c.l.bf16 %v2825_v62  ;;  %v2828_v58 = vld [vmem:[%s3100_s12 + $0x8] sm:$0xf]  ;;  %v2835_v61 = vld [vmem:[%s3100_s12 + $0x24] sm:$0x1]  ;;  %v2840_v49 = vld [vmem:[%s3100_s12 + $0x38] sm:$0xf] }
 0x106   : > { %v1991_v50 = vsel %vm1967_vm3, %v1989_v10, %v1990_v46  ;;  %v2022_v27 = vunpack.c.l.bf16 %v2826_v51  ;;  %v2023_v20 = vunpack.c.l.bf16 %v2827_v52  ;;  %v2833_v10 = vld [vmem:[%s3100_s12 + $0x1c] sm:$0x1]  ;;  %v2048_v62 = vunpack.c.l.bf16 %v2828_v58 }
 0x107   : > { %v2006_v14 = vadd.f32 %v1988_v4, %v3710_v13  ;;  %v2007_v17 = vadd.f32 %v1991_v50, %v3711_v1  ;;  %v3625_v4 = vpop.f32.mrf.mxu3  ;;  %v2843_v13 = vld [vmem:[%s3100_s12 + $0x44] sm:$0x1]  ;;  %v2052_v51 = vunpack.c.l.bf16 %v2832_v38  ;;  %v2053_v52 = vunpack.c.l.bf16 %v2833_v10 }
 0x108   : > { %v1744_v21 = vpop.f32.mrf.mxu1  ;;  %v1831_v12 = vpop.f32.mrf.mxu0  ;;  %v2054_v1 = vunpack.c.l.bf16 %v2834_v9 }
 0x109   : > { %v1745_v33 = vadd.f32 %v1744_v21, %v3469_v8  ;;  %v3566_v40 = vpop.f32.mrf.mxu2  ;;  %v2001_v8 = vadd.f32 %v1973_v25, %v1912_v60  ;;  %v2004_v60 = vadd.f32 %v1982_v34, %v1915_v6  ;;  %v2019_v6 = vunpack.c.l.bf16 %v2823_v15  ;;  %v2839_v15 = vld [vmem:[%s3100_s12 + $0x34] sm:$0x1] }
 0x10a   : > { %v3599_v21 = vadd.f32 %v2016_v18, %v2000_v47  ;;  %v2056_v18 = vunpack.c.l.bf16 %v2836_v2  ;;  %v2086_v38 = vrot.slane %v2052_v51, 1  ;;  %v2089_v10 = vrot.slane %v2054_v1, 1 }
 0x10b   : > { %v1774_v3 = vadd.f32 %v3481_v36, %v1745_v33  ;;  %v2005_v36 = vadd.f32 %v1985_v44, %v3709_v11  ;;  %v3604_v32 = vadd.f32 %v2017_v19, %v2001_v8  ;;  %v3606_v33 = vadd.f32 %v2018_v53, %v2002_v63  ;;  %v2841_v11 = vld [vmem:[%s3100_s12 + $0x3c] sm:$0x1] }
 0x10c   : > { %v3610_v34 = vadd.f32 %v2020_v28, %v2004_v60  ;;  %v3620_v8 = vadd.f32 %v2022_v27, %v2006_v14  ;;  %v3627_v63 = vadd.f32 %v2023_v20, %v2007_v17  ;;  %v2051_v14 = vunpack.c.l.bf16 %v2831_v24 }
 0x10d   : > { %v1803_v0 = vadd.f32 %v3517_v57, %v1774_v3  ;;  %v2829_v57 = vld [vmem:[%s3100_s12 + $0xc] sm:$0x1]  ;;  %v3618_v47 = vadd.f32 %v2021_v54, %v2005_v36  ;;  %v2842_v36 = vld [vmem:[%s3100_s12 + $0x40] sm:$0xf]  ;;  %v2055_v17 = vunpack.c.l.bf16 %v2835_v61  ;;  %v2059_v28 = vunpack.c.l.bf16 %v2839_v15 }
 0x10e   : > { %v2837_v3 = vld [vmem:[%s3100_s12 + $0x2c] sm:$0x1]  ;;  %v2049_v50 = vunpack.c.l.bf16 %v2829_v57  ;;  %v2060_v54 = vunpack.c.l.bf16 %v2840_v49  ;;  %v2062_v58 = vunpack.c.l.bf16 %v2842_v36  ;;  %v2063_v27 = vunpack.c.l.bf16 %v2843_v13 }
 0x10f   : > { %v3597_v25 = vadd.f32 %v1831_v12, %v1803_v0  ;;  %v3608_v12 = vadd.f32 %v2019_v6, %v2003_v7  ;;  %v2838_v7 = vld [vmem:[%s3100_s12 + $0x30] sm:$0xf]  ;;  %v2057_v19 = vunpack.c.l.bf16 %v2837_v3  ;;  %v2080_v20 = vrot.slane %v2048_v62, 1 }
 0x110   : > { %v1746_v30 = vpop.f32.mrf.mxu1  ;;  %v1833_v31 = vpop.f32.mrf.mxu0  ;;  %v2058_v6 = vunpack.c.l.bf16 %v2838_v7  ;;  %v2090_v9 = vrot.slane %v2055_v17, 1  ;;  %v2096_v36 = vrot.slane %v2059_v28, 1  ;;  %v2098_v13 = vrot.slane %v2060_v54, 1 }
 0x111   : > { %v1881_v44 = vmul.f32 %v3597_v25, %v3597_v25  ;;  %v1747_v46 = vadd.f32 %v1746_v30, %v3513_v55  ;;  %v2050_v55 = vunpack.c.l.bf16 %v2830_v59  ;;  %v3636_v0 = vpop.f32.mrf.mxu2  ;;  %v2081_v59 = vrot.slane %v2049_v50, 1 }
 0x112   : > { %v2084_v30 = vrot.slane %v2051_v14, 1  ;;  %v2091_v62 = vsel %vm1967_vm3, %v2089_v10, %v2090_v9  ;;  %v2092_v50 = vrot.slane %v2056_v18, 1  ;;  %v2101_v51 = vrot.slane %v2062_v58, 1 }
 0x113   : > { %v1776_v60 = vadd.f32 %v3489_v43, %v1747_v46  ;;  %v2061_v43 = vunpack.c.l.bf16 %v2841_v11  ;;  %v2083_v24 = vrot.slane %v2050_v55, 1  ;;  %v2082_v7 = vsel %vm1967_vm3, %v2080_v20, %v2081_v59 }
 0x114   : > { %v2095_v11 = vrot.slane %v2058_v6, 1  ;;  %v2115_v6 = vadd.f32 %v2091_v62, %v3608_v12 }
 0x115   : > { %v1805_v53 = vadd.f32 %v3557_v26, %v1776_v60  ;;  %v2087_v26 = vrot.slane %v2053_v52, 1  ;;  %v2085_v15 = vsel %vm1967_vm3, %v2083_v24, %v2084_v30  ;;  %v2093_v60 = vrot.slane %v2057_v19, 1 }
 0x116   : > { %v2099_v14 = vrot.slane %v2061_v43, 1  ;;  %v2102_v52 = vrot.slane %v2063_v27, 1  ;;  %v2097_v17 = vsel %vm1967_vm3, %v2095_v11, %v2096_v36  ;;  %v2113_v20 = vadd.f32 %v2085_v15, %v3604_v32 }
 0x117   : > { %v1834_v57 = vadd.f32 %v1833_v31, %v1805_v53  ;;  %v2088_v49 = vsel %vm1967_vm3, %v2086_v38, %v2087_v26  ;;  %v2094_v1 = vsel %vm1967_vm3, %v2092_v50, %v2093_v60  ;;  %v2112_v53 = vadd.f32 %v2082_v7, %v3599_v21 }
 0x118   : > { %v1749_v46 = vpop.f32.mrf.mxu1  ;;  %v1836_v61 = vpop.f32.mrf.mxu0  ;;  %v2100_v18 = vsel %vm1967_vm3, %v2098_v13, %v2099_v14  ;;  %v2114_v19 = vadd.f32 %v2088_v49, %v3606_v33  ;;  %v2116_v54 = vadd.f32 %v2094_v1, %v3610_v34  ;;  %v2117_v43 = vadd.f32 %v2097_v17, %v3618_v47 }
 0x119   : > { %v2959_v2 = vpack.c.bf16 %v1834_v57, %v3597_v25  ;;  %v1867_v31 = vadd.f32 %v1834_v57, %v3597_v25  ;;  %v1882_v3 = vmul.f32 %v1834_v57, %v1834_v57  ;;  %v1809_v25 = vpop.f32.mrf.mxu3  ;;  %v1785_v28 = vpop.f32.mrf.mxu2  ;;  %v2118_v58 = vadd.f32 %v2100_v18, %v3620_v8 }
 0x11a   : > { %v2120_v27 = vmul.f32 0.25, %v2112_v53  ;;  %v2121_v32 = vmul.f32 0.25, %v2113_v20  ;;  %v2122_v57 = vmul.f32 0.25, %v2114_v19  ;;  %v2123_v59 = vmul.f32 0.25, %v2115_v6 }
 0x11b   : > { %2960 = vst [vmem:[%s3645_s13] sm:$0xff] %v2959_v2   ;;  %v1889_v55 = vadd.f32 %v1882_v3, %v1881_v44  ;;  %v2103_v44 = vsel %vm1967_vm3, %v2101_v51, %v2102_v52  ;;  %v2124_v33 = vmul.f32 0.25, %v2116_v54  ;;  %v2125_v12 = vmul.f32 0.25, %v2117_v43 }
 0x11c   : > { %v2119_v21 = vadd.f32 %v2103_v44, %v3627_v63  ;;  %v2126_v34 = vmul.f32 0.25, %v2118_v58  ;;  %v2979_v47 = vpack.c.bf16 %v2121_v32, %v2120_v27  ;;  %v2984_v26 = vpack.c.bf16 %v2123_v59, %v2122_v57 }
 0x11d   : > { %v1750_v8 = vadd.f32 %v1749_v46, %v3471_v22  ;;  %v2989_v10 = vpack.c.bf16 %v2125_v12, %v2124_v33  ;;  %v1704_v32 = vadd.f32 %v3487_v42, %v3554_v48 }
 0x11e   : > { %v2127_v38 = vmul.f32 0.25, %v2119_v21  ;;  %2980 = vst [vmem:[%s253_s16] sm:$0xff] %v2979_v47  }
 0x11f   : > { %v1779_v2 = vadd.f32 %v3533_v5, %v1750_v8  ;;  %2999 = vst [vmem:[%s253_s16 + $0x8] sm:$0xff] %v2984_v26  }
 0x120   : > { %v1751_v24 = vpop.f32.mrf.mxu1  ;;  %v1838_v30 = vpop.f32.mrf.mxu0  ;;  %v2994_v9 = vpack.c.bf16 %v2127_v38, %v2126_v34  ;;  %3000 = vst [vmem:[%s253_s16 + $0x10] sm:$0xff] %v2989_v10  }
 0x121   : > { %v1752_v63 = vadd.f32 %v1751_v24, %v3515_v56  ;;  %v1808_v7 = vadd.f32 %v3625_v4, %v1779_v2  ;;  %v1812_v15 = vpop.f32.mrf.mxu3  ;;  %v1788_v50 = vpop.f32.mrf.mxu2 }
 0x122   : > { %3001 = vst [vmem:[%s253_s16 + $0x18] sm:$0xff] %v2994_v9  }
 0x123   : > { %v1781_v3 = vadd.f32 %v3566_v40, %v1752_v63  ;;  %v1837_v62 = vadd.f32 %v1836_v61, %v1808_v7  ;;  %v1699_v40 = vadd.f32 %v3473_v23, %v3485_v41  ;;  %v1702_v23 = vadd.f32 %v3477_v29, %v3493_v37 }
 0x125   : > { %v1810_v49 = vadd.f32 %v1809_v25, %v1781_v3  ;;  %v1868_v60 = vadd.f32 %v1867_v31, %v1837_v62  ;;  %v1883_v11 = vmul.f32 %v1837_v62, %v1837_v62  ;;  %v1728_v25 = vadd.f32 %v3483_v39, %v1699_v40 }
 0x126   : > { %v1731_v19 = vadd.f32 %v3491_v45, %v1702_v23 }
 0x127   : > { %v1839_v22 = vadd.f32 %v1838_v30, %v1810_v49  ;;  %v1890_v14 = vadd.f32 %v1889_v55, %v1883_v11 }
 0x128   : > { %v1754_v46 = vpop.f32.mrf.mxu1  ;;  %v1841_v13 = vpop.f32.mrf.mxu0 }
 0x129   : > { %v1755_v56 = vadd.f32 %v1754_v46, %v3479_v35  ;;  %v2964_v36 = vpack.c.bf16 %v1839_v22, %v1837_v62  ;;  %v1884_v5 = vmul.f32 %v1839_v22, %v1839_v22  ;;  %v1869_v51 = vadd.f32 %v1868_v60, %v1839_v22  ;;  %v1814_v17 = vpop.f32.mrf.mxu3  ;;  %v1790_v18 = vpop.f32.mrf.mxu2 }
 0x12b   : > { %v1784_v4 = vadd.f32 %v3636_v0, %v1755_v56  ;;  %2996 = vst [vmem:[%s3645_s13 + $0x8] sm:$0xff] %v2964_v36   ;;  %v1891_v61 = vadd.f32 %v1890_v14, %v1884_v5 }
 0x12d   : > { %v1813_v52 = vadd.f32 %v1812_v15, %v1784_v4 }
 0x12f   : > { %v1842_v1 = vadd.f32 %v1841_v13, %v1813_v52 }
 0x130   : > { %v1756_v35 = vpop.f32.mrf.mxu1  ;;  %v1843_v55 = vpop.f32.mrf.mxu0 }
 0x131   : > { %v1870_v31 = vadd.f32 %v1869_v51, %v1842_v1  ;;  %v1885_v53 = vmul.f32 %v1842_v1, %v1842_v1  ;;  %v1757_v20 = vadd.f32 %v1756_v35, %v1728_v25  ;;  %v1817_v27 = vpop.f32.mrf.mxu3  ;;  %v1846_v29 = vpop.f32.mrf.mxu2 }
 0x133   : > { %v1892_v41 = vadd.f32 %v1891_v61, %v1885_v53  ;;  %v1786_v0 = vadd.f32 %v1785_v28, %v1757_v20  ;;  %v1733_v28 = vadd.f32 %v3542_v16, %v1704_v32 }
 0x135   : > { %v1815_v44 = vadd.f32 %v1814_v17, %v1786_v0 }
 0x137   : > { %v1844_v6 = vadd.f32 %v1843_v55, %v1815_v44 }
 0x138   : > { %v1759_v54 = vpop.f32.mrf.mxu1 }
 0x139   : > { %v2969_v39 = vpack.c.bf16 %v1844_v6, %v1842_v1  ;;  %v1871_v43 = vadd.f32 %v1870_v31, %v1844_v6  ;;  %v1886_v58 = vmul.f32 %v1844_v6, %v1844_v6  ;;  %v1760_v21 = vadd.f32 %v1759_v54, %v1731_v19  ;;  %v1819_v47 = vpop.f32.mrf.mxu3  ;;  %v1848_v8 = vpop.f32.mrf.mxu2 }
 0x13b   : > { %2997 = vst [vmem:[%s3645_s13 + $0x10] sm:$0xff] %v2969_v39   ;;  %v1893_v57 = vadd.f32 %v1892_v41, %v1886_v58  ;;  %v1789_v59 = vadd.f32 %v1788_v50, %v1760_v21 }
 0x13d   : > { %v1818_v37 = vadd.f32 %v1817_v27, %v1789_v59 }
 0x13f   : > { %v1847_v24 = vadd.f32 %v1846_v29, %v1818_v37 }
 0x140   : > { %v1761_v45 = vpop.f32.mrf.mxu1 }
 0x141   : > { %v1872_v30 = vadd.f32 %v1871_v43, %v1847_v24  ;;  %v1887_v33 = vmul.f32 %v1847_v24, %v1847_v24  ;;  %v1762_v12 = vadd.f32 %v1761_v45, %v1733_v28 }
 0x143   : > { %v1894_v34 = vadd.f32 %v1893_v57, %v1887_v33  ;;  %v1791_v38 = vadd.f32 %v1790_v18, %v1762_v12 }
 0x145   : > { %v1820_v26 = vadd.f32 %v1819_v47, %v1791_v38 }
 0x147   : > { %v1849_v42 = vadd.f32 %v1848_v8, %v1820_v26 }
 0x149   : > { %v2974_v48 = vpack.c.bf16 %v1849_v42, %v1847_v24  ;;  %v1873_v63 = vadd.f32 %v1872_v30, %v1849_v42  ;;  %v1888_v10 = vmul.f32 %v1849_v42, %v1849_v42 }
 0x14b   : > { %2998 = vst [vmem:[%s3645_s13 + $0x18] sm:$0xff] %v2974_v48   ;;  %v1874_v9 = vrot.slane %v1873_v63, 4  ;;  %v1895_v2 = vadd.f32 %v1894_v34, %v1888_v10 }
 0x14d   : > { %v1875_v16 = vadd.f32 %v1874_v9, %v1873_v63  ;;  %v1896_v3 = vrot.slane %v1895_v2, 4 }
 0x14f   : > { %v1876_v7 = vrot.slane %v1875_v16, 2  ;;  %v1897_v15 = vadd.f32 %v1896_v3, %v1895_v2 }
 0x151   : > { %v1877_v49 = vadd.f32 %v1876_v7, %v1875_v16  ;;  %v1898_v62 = vrot.slane %v1897_v15, 2 }
 0x153   : > { %v1878_v50 = vrot.slane %v1877_v49, 1  ;;  %v1899_v22 = vadd.f32 %v1898_v62, %v1897_v15 }
 0x155   : > { %v1879_v46 = vadd.f32 %v1878_v50, %v1877_v49  ;;  %v1900_v56 = vrot.slane %v1899_v22, 1 }
 0x157   : > { %1880 = vst [vmem:[%s245_s21] sm:$0x1] %v1879_v46  ;;  %v1901_v60 = vadd.f32 %v1900_v56, %v1899_v22 }
 0x159   : > { %1902 = vst [vmem:[%s248_s24] sm:$0x1] %v1901_v60 }
 0x15a PF: > { %s16_s18 = sadd.s32 1, %s3033_s18  }
 0x15b   : > { %p13_p4 = scmp.ge.s32.totalorder %s16_s18, 4  }
 0x15d   :  { %15 = sbr.rel (!%p13_p4) target bundleno = 1 (0x1), region = 99 }

// kernel: meta_basic_block_forward.4
= control target key start
LH: loop header
LB: loop body
LE: loop exit
PB: predicated region body
PF: predicated region fallthrough
CT: control target
= control target key end

     0   :  { %s3126_s18 = smov 0   ;;  %s3715_s0 = inlined_call_operand.vmem [shape: bf16[2,64,128], index: 0, kind: input, shape index: {}]   ;;  %s3716_s1 = inlined_call_operand.vmem [shape: f32[2,128], index: 1, kind: input, shape index: {}]   ;;  %s3717_s2 = inlined_call_operand.vmem [shape: bf16[1152,128], index: 2, kind: input, shape index: {}]   ;;  %s3718_s3 = inlined_call_operand.vmem [shape: bf16[2,64,128], index: 3, kind: output, shape index: {0}]   ;;  %s3719_s4 = inlined_call_operand.vmem [shape: f32[2,1,128], index: 4, kind: output, shape index: {1}]   ;;  %s3720_s5 = inlined_call_operand.vmem [shape: f32[2,1,128], index: 5, kind: output, shape index: {2}]  }
   0x1 LB: > { %s2441_s19 = sadd.s32 4294967295, %s3093_s18   ;;  %p2445_p0 = scmp.ge.s32.totalorder %s3093_s18, 1  ;;  %s3093_s18 = sphi %s3126_s18, %s16_s18  }
   0x2   : > { %p192_p1 = scmp.lt.s32.totalorder %s3093_s18, 3 }
   0x4   : > { %p193_p2 = pnand %p2445_p0, %p192_p1 }
   0x5   : > { %p226_p3 = scmp.lt.s32.totalorder (!%p193_p2), %s2441_s19, 1 }
   0x6   : > { %196 = sbr.rel (%p193_p2) target bundleno = 362 (0x16a), region = 32 }
   0xb   : > { %v2953_v0 = vld [vmem:[%s3717_s2 + $0x38] sm:$0xff]  ;;  %v2952_v2 = vld [vmem:[%s3717_s2 + $0x30] sm:$0xff]  ;;  %s3732_s19 = smov (!%p226_p3, %s2441_s19), 1  ;;  %vm248_vm0 = vcmask 1040384   ;;  %vm249_vm1 = vsmask.f32 256 }
   0xc   : > { %v2969_v1 = vld [vmem:[%s3717_s2 + $0xb8] sm:$0xff]  ;;  %3060 = vmatpush.bf16.msra.mxu1 %v2953_v0  ;;  %2023 = vmatpush.bf16.msra.mxu0 %v2953_v0  ;;  %v2968_v3 = vld [vmem:[%s3717_s2 + $0xb0] sm:$0xff]  ;;  %v3095_v5 = vmov 0   ;;  %v2951_v6 = vld [vmem:[%s3717_s2 + $0x28] sm:$0xff]  ;;  %s2908_s7 = sshll.u32 %s3732_s19, 5  ;;  %vm446_vm5 = vcmask 1043456   ;;  %s238_s21 = scalar_lea.vmem %s3719_s4, %s3732_s19 }
   0xd   : > { %2081 = vmatpush.bf16.msra.mxu2 %v2969_v1  ;;  %v2977_v4 = vld [vmem:[%s3717_s2 + $0xf8] sm:$0xff]  ;;  %243 = vst [vmem:[#allocation2] sm:$0xf] %v3095_v5  ;;  %v2967_v7 = vld [vmem:[%s3717_s2 + $0xa8] sm:$0xff]  ;;  %v2976_v8 = vld [vmem:[%s3717_s2 + $0xf0] sm:$0xff]  ;;  %s3166_s14 = scalar_lea.vmem %s3715_s0, %s2908_s7  ;;  %vm691_vm6 = vcmask 1042432   ;;  %s3694_s17 = scalar_lea.vmem %s3718_s3, %s2908_s7 }
   0xe   : > { %244 = vst [vmem:[#allocation2 + $0x4] sm:$0x1] %v3095_v5  ;;  %2110 = vmatpush.bf16.msra.mxu3 %v2977_v4  ;;  %vm3169_vm2 = vmand %vm248_vm0, %vm249_vm1  ;;  %vm281_vm3 = vsmask.f32 7938  ;;  %v263_v10 = vld [vmem:[#allocation2 + $0x20] sm:$0x1]  ;;  %s241_s24 = scalar_lea.vmem %s3720_s5, %s3732_s19 }
   0xf   : > { %246 = vst [vmem:[#allocation2 + $0x48] sm:$0xf] %v3095_v5  ;;  %v266_v11 = vld [vmem:[#allocation2 + $0x28] sm:$0x1]  ;;  %v264_v13 = vsel %vm3169_vm2, 0, %v263_v10  ;;  %v2950_v15 = vld [vmem:[%s3717_s2 + $0x20] sm:$0xff]  ;;  %vm3197_vm4 = vmand %vm248_vm0, %vm281_vm3 }
  0x10   : > { %3061 = vmatpush.bf16.msra.mxu1 %v2952_v2  ;;  %2024 = vmatpush.bf16.msra.mxu0 %v2952_v2  ;;  %247 = vst [vmem:[#allocation2 + $0x4c] sm:$0x1] %v3095_v5  ;;  %v2975_v12 = vld [vmem:[%s3717_s2 + $0xe8] sm:$0xff]  ;;  %v267_v14 = vsel %vm3169_vm2, 0, %v266_v11  ;;  %v3055_v17 = vld [vmem:[%s3166_s14 + $0x10] sm:$0xff]   ;;  %v2966_v19 = vld [vmem:[%s3717_s2 + $0xa0] sm:$0xff] }
  0x11   : > { %2082 = vmatpush.bf16.msra.mxu2 %v2968_v3  ;;  %265 = vst [vmem:[#allocation2 + $0x20] sm:$0x1] %v264_v13  ;;  %v3184_v16 = vld [vmem:[%s3166_s14 + $0x8] sm:$0xff]   ;;  %v3190_v18 = vld [vmem:[%s3716_s1] ss:$0 sm:$0xff]  ;;  %v3028_v22 = vunpack.c.l.bf16 %v3055_v17  ;;  %v3029_v25 = vunpack.c.h.bf16 %v3055_v17  ;;  %v3218_v35 = vld [vmem:[%s3166_s14 + $0x18] sm:$0xff]  }
  0x12   : > { %2111 = vmatpush.bf16.msra.mxu3 %v2976_v8  ;;  %268 = vst [vmem:[#allocation2 + $0x28] sm:$0x1] %v267_v14  ;;  %v3025_v21 = vunpack.c.h.bf16 %v3184_v16  ;;  %v3205_v23 = vld [vmem:[%s3716_s1 + $0x1] ss:$0 sm:$0xff]  ;;  %v254_v24 = vld [vmem:[#allocation2 + $0x8] sm:$0x1]  ;;  %v3032_v38 = vunpack.c.l.bf16 %v3218_v35  ;;  %v3024_v60 = vunpack.c.l.bf16 %v3184_v16  ;;  %vm3278_vm9 = vmand %vm446_vm5, %vm281_vm3 }
  0x13   : > { %v255_v27 = vsel %vm3169_vm2, 0, %v254_v24  ;;  %v3210_v28 = vld [vmem:[%s3166_s14] sm:$0xff]   ;;  %v286_v29 = vld [vmem:[#allocation2 + $0xc] sm:$0x1]  ;;  %v336_v31 = vmul.f32 %v3190_v18, %v3028_v22  ;;  %v337_v39 = vmul.f32 %v3190_v18, %v3029_v25  ;;  %v2949_v44 = vld [vmem:[%s3717_s2 + $0x18] sm:$0xff]  ;;  %vm692_vm7 = vcmask 1046532  }
  0x14   : > { %3062 = vmatpush.bf16.msra.mxu1 %v2951_v6  ;;  %2025 = vmatpush.bf16.msra.mxu0 %v2951_v6  ;;  %v251_v26 = vld [vmem:[#allocation2] sm:$0x1]  ;;  %v335_v30 = vmul.f32 %v3190_v18, %v3025_v21  ;;  %256 = vst [vmem:[#allocation2 + $0x8] sm:$0x1] %v255_v27  ;;  %v3020_v33 = vunpack.c.l.bf16 %v3210_v28  ;;  %v287_v37 = vsel %vm3197_vm4, 0, %v286_v29  ;;  %v338_v45 = vmul.f32 %v3190_v18, %v3032_v38  ;;  %v2965_v47 = vld [vmem:[%s3717_s2 + $0x98] sm:$0xff]  ;;  %vm3269_vm8 = vmor %vm691_vm6, %vm692_vm7 }
  0x15   : > { %2083 = vmatpush.bf16.msra.mxu2 %v2967_v7  ;;  %v252_v32 = vsel %vm3169_vm2, 0, %v251_v26  ;;  %v283_v34 = vld [vmem:[#allocation2 + $0x4] sm:$0x1]  ;;  %v345_v41 = vadd.f32 %v3205_v23, %v336_v31  ;;  %288 = vst [vmem:[#allocation2 + $0xc] sm:$0x1] %v287_v37  ;;  %v346_v46 = vadd.f32 %v3205_v23, %v337_v39  ;;  %v2973_v57 = vld [vmem:[%s3717_s2 + $0xd8] sm:$0xff]  ;;  %v3021_v1 = vunpack.c.h.bf16 %v3210_v28 }
  0x16   : > { %253 = vst [vmem:[#allocation2] sm:$0x1] %v252_v32  ;;  %v284_v36 = vsel %vm3197_vm4, 0, %v283_v34  ;;  %2112 = vmatpush.bf16.msra.mxu3 %v2975_v12  ;;  %v344_v40 = vadd.f32 %v3205_v23, %v335_v30  ;;  %v2974_v42 = vld [vmem:[%s3717_s2 + $0xe0] sm:$0xff]  ;;  %v332_v43 = vmul.f32 %v3190_v18, %v3020_v33  ;;  %v347_v52 = vadd.f32 %v3205_v23, %v338_v45  ;;  %v269_v58 = vld [vmem:[#allocation2 + $0x30] sm:$0x1] }
  0x17   : > { %285 = vst [vmem:[#allocation2 + $0x4] sm:$0x1] %v284_v36  ;;  %v353_v49 = vmax.f32 %v345_v41, 0.0  ;;  %v659_v51 = vld [vmem:[#allocation2] sm:$0xe]  ;;  %v354_v53 = vmax.f32 %v346_v46, 0.0  ;;  %v334_v29 = vmul.f32 %v3190_v18, %v3024_v60  ;;  %v333_v34 = vmul.f32 %v3190_v18, %v3021_v1 }
  0x18   : > { %3063 = vmatpush.bf16.msra.mxu1 %v2950_v15  ;;  %2026 = vmatpush.bf16.msra.mxu0 %v2950_v15  ;;  %v352_v48 = vmax.f32 %v344_v40, 0.0  ;;  %v341_v50 = vadd.f32 %v3205_v23, %v332_v43  ;;  %v272_v59 = vld [vmem:[#allocation2 + $0x38] sm:$0x1]  ;;  %v2948_v61 = vld [vmem:[%s3717_s2 + $0x10] sm:$0xff]  ;;  %v270_v63 = vsel %vm3169_vm2, 0, %v269_v58  ;;  %v355_v0 = vmax.f32 %v347_v52, 0.0 }
  0x19   : > { %2084 = vmatpush.bf16.msra.mxu2 %v2966_v19  ;;  %v361_v55 = vpack.c.bf16 %v353_v49, %v353_v49  ;;  %v2964_v62 = vld [vmem:[%s3717_s2 + $0x90] sm:$0xff]  ;;  %v2947_v7 = vld [vmem:[%s3717_s2 + $0x8] sm:$0xff]  ;;  %v2450_v11 = vrot.slane %v659_v51, 9  ;;  %v273_v12 = vsel %vm3169_vm2, 0, %v272_v59  ;;  %v362_v13 = vpack.c.bf16 %v354_v53, %v354_v53  ;;  %v466_v16 = vld [vmem:[#allocation2 + $0x20] sm:$0xf] }
  0x1a   : > { %v360_v54 = vpack.c.bf16 %v352_v48, %v352_v48  ;;  %2113 = vmatpush.bf16.msra.mxu3 %v2974_v42  ;;  %v349_v56 = vmax.f32 %v341_v50, 0.0  ;;  %v2963_v17 = vld [vmem:[%s3717_s2 + $0x88] sm:$0xff]  ;;  %v2972_v22 = vld [vmem:[%s3717_s2 + $0xd0] sm:$0xff]  ;;  %v363_v24 = vpack.c.bf16 %v355_v0, %v355_v0  ;;  %271 = vst [vmem:[#allocation2 + $0x30] sm:$0x1] %v270_v63  ;;  %v2946_v41 = vld [vmem:[%s3717_s2] sm:$0xff] }
  0x1b   : > { %v398_v4 = vshrl.u32 %v361_v55, 16  ;;  %v401_v5 = vshll.u32 %v361_v55, 16  ;;  %v472_v26 = vld [vmem:[#allocation2 + $0x28] sm:$0xf]  ;;  %274 = vst [vmem:[#allocation2 + $0x38] sm:$0x1] %v273_v12  ;;  %v342_v55 = vadd.f32 %v3205_v23, %v333_v34 }
  0x1c   : > { %3064 = vmatpush.bf16.msra.mxu1 %v2949_v44  ;;  %2027 = vmatpush.bf16.msra.mxu0 %v2949_v44  ;;  %v390_v2 = vshrl.u32 %v360_v54, 16  ;;  %v393_v3 = vshll.u32 %v360_v54, 16  ;;  %v357_v8 = vpack.c.bf16 %v349_v56, %v349_v56  ;;  %v448_v32 = vld [vmem:[#allocation2 + $0x8] sm:$0xf]  ;;  %v257_v33 = vld [vmem:[#allocation2 + $0x10] sm:$0x1]  ;;  %v343_v56 = vadd.f32 %v3205_v23, %v334_v29 }
  0x1d   : > { %2085 = vmatpush.bf16.msra.mxu2 %v2965_v47  ;;  %v496_v6 = vld [vmem:[#allocation2] sm:$0xf]  ;;  %v3262_v15 = vrot.slane %v398_v4, 7  ;;  %v451_v37 = vld [vmem:[#allocation2 + $0xc] sm:$0x1]  ;;  %v406_v39 = vshrl.u32 %v362_v13, 16 }
  0x1e   : > { %504 = vst [vmem:[#allocation3] sm:$0xf] %v496_v6  ;;  %v660_v10 = vld [vmem:[#allocation2 + $0x4] sm:$0x1]  ;;  %v3260_v14 = vrot.slane %v390_v2, 7  ;;  %2114 = vmatpush.bf16.msra.mxu3 %v2973_v57  ;;  %v366_v27 = vshrl.u32 %v357_v8, 16 }
  0x1f   : > { %v696_v21 = vrot.slane %v660_v10, 5  ;;  %v369_v28 = vshll.u32 %v357_v8, 16  ;;  %v403_v31 = vor.u32 %v401_v5, %v3262_v15  ;;  %v409_v40 = vshll.u32 %v362_v13, 16  ;;  %v2971_v44 = vld [vmem:[%s3717_s2 + $0xc8] sm:$0xff]  ;;  %v2961_v47 = vld [vmem:[%s3717_s2 + $0x78] sm:$0xff]  ;;  %v2962_v52 = vld [vmem:[%s3717_s2 + $0x80] sm:$0xff] }
  0x20   : > { %3065 = vmatpush.bf16.msra.mxu1 %v2948_v61  ;;  %2028 = vmatpush.bf16.msra.mxu0 %v2948_v61  ;;  %v395_v30 = vor.u32 %v393_v3, %v3260_v14  ;;  %v368_v36 = vrot.slane %v366_v27, 7  ;;  %v414_v45 = vshrl.u32 %v363_v24, 16  ;;  %v417_v46 = vshll.u32 %v363_v24, 16  ;;  %v260_v54 = vld [vmem:[#allocation2 + $0x18] sm:$0x1]  ;;  %v2970_v2 = vld [vmem:[%s3717_s2 + $0xc0] sm:$0xff] }
  0x21   : > { %2086 = vmatpush.bf16.msra.mxu2 %v2964_v62  ;;  %v697_v38 = vsel %vm3269_vm8, %v2450_v11, %v696_v21  ;;  %v473_v43 = vsel %vm3278_vm9, %v403_v31, %v472_v26  ;;  %v3301_v50 = vrot.slane %v406_v39, 7  ;;  %v258_v51 = vsel %vm3169_vm2, 0, %v257_v33  ;;  %v2985_v58 = vld [vmem:[%s3717_s2 + $0x138] sm:$0xff]  ;;  %v478_v62 = vld [vmem:[#allocation2 + $0x30] sm:$0xf]  ;;  %v2983_v27 = vld [vmem:[%s3717_s2 + $0x128] sm:$0xff] }
  0x22   : > { %v467_v42 = vsel %vm3278_vm9, %v395_v30, %v466_v16  ;;  %734 = vst [vmem:[#allocation3 + $0x8] sm:$0xf] %v697_v38  ;;  %2115 = vmatpush.bf16.msra.mxu3 %v2972_v22  ;;  %v371_v48 = vor.u32 %v369_v28, %v368_v36  ;;  %v372_v49 = vrot.slane %v368_v36, 4  ;;  %v3308_v53 = vrot.slane %v414_v45, 7  ;;  %v3001_v63 = vld [vmem:[%s3717_s2 + $0x1b8] sm:$0xff]  ;;  %v2960_v4 = vld [vmem:[%s3717_s2 + $0x70] sm:$0xff] }
  0x23   : > { %468 = vst [vmem:[#allocation2 + $0x20] sm:$0xf] %v467_v42  ;;  %v411_v60 = vor.u32 %v409_v40, %v3301_v50  ;;  %v484_v1 = vld [vmem:[#allocation2 + $0x38] sm:$0xf]  ;;  %v261_v3 = vsel %vm3169_vm2, 0, %v260_v54  ;;  %v350_v6 = vmax.f32 %v342_v55, 0.0 }
  0x24   : > { %3066 = vmatpush.bf16.msra.mxu1 %v2947_v7  ;;  %2029 = vmatpush.bf16.msra.mxu0 %v2947_v7  ;;  %474 = vst [vmem:[#allocation2 + $0x28] sm:$0xf] %v473_v43  ;;  %v449_v57 = vsel %vm3278_vm9, %v371_v48, %v448_v32  ;;  %v452_v59 = vsel %vm3169_vm2, %v372_v49, %v451_v37  ;;  %v351_v7 = vmax.f32 %v343_v56, 0.0  ;;  %v2984_v8 = vld [vmem:[%s3717_s2 + $0x130] sm:$0xff]  ;;  %v2959_v16 = vld [vmem:[%s3717_s2 + $0x68] sm:$0xff]  ;;  %v2958_v40 = vld [vmem:[%s3717_s2 + $0x60] sm:$0xff] }
  0x25   : > { %2087 = vmatpush.bf16.msra.mxu2 %v2963_v17  ;;  %259 = vst [vmem:[#allocation2 + $0x10] sm:$0x1] %v258_v51  ;;  %v419_v61 = vor.u32 %v417_v46, %v3308_v53  ;;  %v479_v0 = vsel %vm3278_vm9, %v411_v60, %v478_v62  ;;  %v358_v11 = vpack.c.bf16 %v350_v6, %v350_v6  ;;  %v289_v29 = vld [vmem:[#allocation2 + $0x14] sm:$0x1]  ;;  %v512_v30 = vld [vmem:[#allocation2] sm:$0xf] }
  0x26   : > { %450 = vst [vmem:[#allocation2 + $0x8] sm:$0xf] %v449_v57  ;;  %2116 = vmatpush.bf16.msra.mxu3 %v2971_v44  ;;  %v359_v12 = vpack.c.bf16 %v351_v7, %v351_v7  ;;  %v292_v34 = vld [vmem:[#allocation2 + $0x1c] sm:$0x1]  ;;  %v2982_v42 = vld [vmem:[%s3717_s2 + $0x120] sm:$0xff]  ;;  %v290_v54 = vsel %vm3197_vm4, 0, %v289_v29 }
  0x27   : > { %453 = vst [vmem:[#allocation2 + $0xc] sm:$0x1] %v452_v59  ;;  %v485_v5 = vsel %vm3278_vm9, %v419_v61, %v484_v1  ;;  %v374_v17 = vshrl.u32 %v358_v11, 16  ;;  %v377_v21 = vshll.u32 %v358_v11, 16  ;;  %v2476_v44 = vld [vmem:[#allocation3] sm:$0xf] }
  0x28   : > { %3067 = vmatpush.bf16.msra.mxu1 %v2946_v41  ;;  %2030 = vmatpush.bf16.msra.mxu0 %v2946_v41  ;;  %480 = vst [vmem:[#allocation2 + $0x30] sm:$0xf] %v479_v0  ;;  %v382_v22 = vshrl.u32 %v359_v12, 16  ;;  %v385_v28 = vshll.u32 %v359_v12, 16  ;;  %v2957_v51 = vld [vmem:[%s3717_s2 + $0x58] sm:$0xff]  ;;  %v532_v55 = vshrl.u32 %v512_v30, 16 }
  0x29   : > { %2088 = vmatpush.bf16.msra.mxu2 %v2962_v52  ;;  %486 = vst [vmem:[#allocation2 + $0x38] sm:$0xf] %v485_v5  ;;  %v3345_v33 = vrot.slane %v374_v17, 7  ;;  %v535_v59 = vshll.u32 %v512_v30, 16  ;;  %v513_v61 = vld [vmem:[#allocation2 + $0x4] sm:$0x1] }
  0x2a   : > { %v500_v10 = vld [vmem:[#allocation2 + $0x20] sm:$0xf]  ;;  %2117 = vmatpush.bf16.msra.mxu3 %v2970_v2  ;;  %262 = vst [vmem:[#allocation2 + $0x18] sm:$0x1] %v261_v3  ;;  %v3347_v38 = vrot.slane %v382_v22, 7  ;;  %v2981_v0 = vld [vmem:[%s3717_s2 + $0x118] sm:$0xff] }
  0x2b   : > { %v501_v13 = vld [vmem:[#allocation2 + $0x28] sm:$0xf]  ;;  %508 = vst [vmem:[#allocation3 + $0x90] sm:$0xf] %v500_v10  ;;  %v379_v43 = vor.u32 %v377_v21, %v3345_v33  ;;  %v3000_v1 = vld [vmem:[%s3717_s2 + $0x1b0] sm:$0xff]  ;;  %v534_v6 = vrot.slane %v532_v55, 4 }
  0x2c   : > { %2052 = vmatpush.bf16.msrb.mxu1 %v2961_v47  ;;  %2139 = vmatpush.bf16.msrb.mxu0 %v2985_v58  ;;  %509 = vst [vmem:[#allocation3 + $0xb4] sm:$0xf] %v501_v13  ;;  %v454_v39 = vld [vmem:[#allocation2 + $0x10] sm:$0xf]  ;;  %v387_v46 = vor.u32 %v385_v28, %v3347_v38  ;;  %v293_v58 = vsel %vm3197_vm4, 0, %v292_v34  ;;  %v537_v11 = vrot.slane %v535_v59, 5 }
  0x2d   : > { %2197 = vmatpush.bf16.msrb.mxu2 %v3001_v63  ;;  %v497_v24 = vld [vmem:[#allocation2 + $0x8] sm:$0xf]  ;;  %v455_v52 = vsel %vm3278_vm9, %v379_v43, %v454_v39  ;;  %v2956_v3 = vld [vmem:[%s3717_s2 + $0x50] sm:$0xff]  ;;  %291 = vst [vmem:[#allocation2 + $0x14] sm:$0x1] %v290_v54  ;;  %v541_v12 = vshll.u32 %v513_v61, 16 }
  0x2e   : > { %v661_v26 = vld [vmem:[#allocation2 + $0x8] sm:$0xe]  ;;  %505 = vst [vmem:[#allocation3 + $0x24] sm:$0xf] %v497_v24  ;;  %v662_v31 = vld [vmem:[#allocation2 + $0xc] sm:$0x1]  ;;  %v538_v29 = vor.u32 %v537_v11, %v534_v6 }
  0x2f   : > { %v2451_v32 = vrot.slane %v661_v26, 9  ;;  %v700_v36 = vrot.slane %v662_v31, 5  ;;  %v502_v37 = vld [vmem:[#allocation2 + $0x30] sm:$0xf]  ;;  %v742_v48 = vld [vmem:[#allocation2 + $0x8] sm:$0xf] }
  0x30   : > { %2053 = vmatpush.bf16.msrb.mxu1 %v2960_v4  ;;  %2140 = vmatpush.bf16.msrb.mxu0 %v2984_v8  ;;  %v503_v41 = vld [vmem:[#allocation2 + $0x38] sm:$0xf]  ;;  %510 = vst [vmem:[#allocation3 + $0xd8] sm:$0xf] %v502_v37  ;;  %v514_v62 = vld [vmem:[#allocation2 + $0x8] sm:$0xf] }
  0x31   : > { %v701_v45 = vsel %vm3269_vm8, %v2451_v32, %v700_v36  ;;  %511 = vst [vmem:[#allocation3 + $0xfc] sm:$0xf] %v503_v41  ;;  %v460_v47 = vld [vmem:[#allocation2 + $0x18] sm:$0xf]  ;;  %v515_v5 = vld [vmem:[#allocation2 + $0xc] sm:$0x1]  ;;  %2198 = vmatpush.bf16.msrb.mxu2 %v3000_v1 }
  0x32   : > { %v2548_v49 = vld [vmem:[#allocation3 + $0x90] sm:$0xf]  ;;  %735 = vst [vmem:[#allocation3 + $0x2c] sm:$0xf] %v701_v45  ;;  %v461_v57 = vsel %vm3278_vm9, %v387_v46, %v460_v47  ;;  %v3009_v4 = vld [vmem:[%s3717_s2 + $0x1f8] sm:$0xff]  ;;  %v380_v8 = vrot.slane %v3345_v33, 4 }
  0x33   : > { %v2932_v56 = vld [vmem:[#allocation3 + $0xb0] sm:$0xf0]  ;;  %456 = vst [vmem:[#allocation2 + $0x10] sm:$0xf] %v455_v52  ;;  %v2484_v7 = vld [vmem:[#allocation3 + $0x8] sm:$0xf]  ;;  %2226 = vmatpush.bf16.msrb.mxu3 %v3009_v4 }
  0x34   : > { %2054 = vmatpush.bf16.msrb.mxu1 %v2959_v16  ;;  %2141 = vmatpush.bf16.msrb.mxu0 %v2983_v27  ;;  %v2549_v60 = vor.u32 %v2932_v56, %v2548_v49  ;;  %462 = vst [vmem:[#allocation2 + $0x18] sm:$0xf] %v461_v57  ;;  %vm528_vm10 = vsmask.f32 3328  ;;  %v2980_v10 = vld [vmem:[%s3717_s2 + $0x110] sm:$0xff]  ;;  %v546_v16 = vshrl.u32 %v514_v62, 16 }
  0x35   : > { %v2914_v63 = vld [vmem:[#allocation3 + $0x20] sm:$0xf0]  ;;  %750 = vst [vmem:[#allocation3 + $0xc] sm:$0xf] %v742_v48  ;;  %vm529_vm11 = vsmask.f32 7440 }
  0x36   : > { %2041 = vmatmul.bf16.vlgmr.msra.gmra.mxu1 %v2549_v60  ;;  %v2477_v2 = vor.u32 %v2914_v63, %v2476_v44  ;;  %294 = vst [vmem:[#allocation2 + $0x1c] sm:$0x1] %v293_v58  ;;  %v549_v17 = vshll.u32 %v514_v62, 16  ;;  %v555_v21 = vshll.u32 %v515_v5, 16  ;;  %v2999_v22 = vld [vmem:[%s3717_s2 + $0x1a8] sm:$0xff]  ;;  %v388_v30 = vrot.slane %v3347_v38, 4  ;;  %vm3401_vm12 = vmor %vm528_vm10, %vm529_vm11 }
  0x37   : > { %2199 = vmatpush.bf16.msrb.mxu2 %v2999_v22  ;;  %v2955_v32 = vld [vmem:[%s3717_s2 + $0x48] sm:$0xff]  ;;  %v457_v39 = vld [vmem:[#allocation2 + $0x14] sm:$0x1]  ;;  %v543_v41 = vrot.slane %v541_v12, 5  ;;  %v2954_v44 = vld [vmem:[%s3717_s2 + $0x40] sm:$0xff]  ;;  %v548_v45 = vrot.slane %v546_v16, 4 }
  0x38   : > { %2055 = vmatpush.bf16.msrb.mxu1 %v2958_v40  ;;  %2142 = vmatpush.bf16.msrb.mxu0 %v2982_v42  ;;  %v2979_v34 = vld [vmem:[%s3717_s2 + $0x108] sm:$0xff]  ;;  %v539_v40 = vrot.slane %v538_v29, 4  ;;  %v458_v42 = vsel %vm3169_vm2, %v380_v8, %v457_v39  ;;  %v551_v46 = vrot.slane %v549_v17, 5  ;;  %v557_v47 = vrot.slane %v555_v21, 5  ;;  %v2993_v52 = vld [vmem:[%s3717_s2 + $0x178] sm:$0xff]  ;;  %v2978_v54 = vld [vmem:[%s3717_s2 + $0x100] sm:$0xff] }
  0x39   : > { %2031 = vmatmul.bf16.vlgmr.msra.gmra.mxu0 %v2477_v2  ;;  %v2915_v13 = vld [vmem:[#allocation3 + $0x28] sm:$0xf0]  ;;  %v2584_v37 = vld [vmem:[#allocation3 + $0xd8] sm:$0xf]  ;;  %v2941_v38 = vld [vmem:[#allocation3 + $0xf8] sm:$0xf0] }
  0x3a   : > { %v2485_v24 = vor.u32 %v2915_v13, %v2484_v7  ;;  %v498_v26 = vld [vmem:[#allocation2 + $0x10] sm:$0xf]  ;;  %459 = vst [vmem:[#allocation2 + $0x14] sm:$0x1] %v458_v42  ;;  %v745_v56 = vld [vmem:[#allocation2 + $0x20] sm:$0xf]  ;;  %v552_v58 = vor.u32 %v551_v46, %v548_v45 }
  0x3b   : > { %v743_v27 = vld [vmem:[#allocation2 + $0x10] sm:$0xf]  ;;  %v499_v31 = vld [vmem:[#allocation2 + $0x18] sm:$0xf]  ;;  %506 = vst [vmem:[#allocation3 + $0x48] sm:$0xf] %v498_v26 }
  0x3c   : > { %2056 = vmatpush.bf16.msrb.mxu1 %v2957_v51  ;;  %2143 = vmatpush.bf16.msrb.mxu0 %v2981_v0  ;;  %v3389_v28 = vld [vmem:[#allocation2 + $0x10] sm:$0xe]  ;;  %507 = vst [vmem:[#allocation3 + $0x6c] sm:$0xf] %v499_v31  ;;  %v3412_v49 = vld [vmem:[#allocation2 + $0x18] sm:$0xe]  ;;  %v544_v51 = vsel %vm3401_vm12, %v539_v40, %v543_v41  ;;  %v2585_v0 = vor.u32 %v2941_v38, %v2584_v37  ;;  %v3033_v40 = vunpack.c.h.bf16 %v3218_v35 }
  0x3d   : > { %2089 = vmatmul.bf16.vlgmr.msra.gmra.mxu2 %v2485_v24  ;;  %v2452_v33 = vrot.slane %v3389_v28, 9  ;;  %751 = vst [vmem:[#allocation3 + $0x30] sm:$0xf] %v743_v27  ;;  %v463_v43 = vld [vmem:[#allocation2 + $0x1c] sm:$0x1]  ;;  %v553_v2 = vrot.slane %v552_v58, 4 }
  0x3e   : > { %v464_v48 = vsel %vm3169_vm2, %v388_v30, %v463_v43  ;;  %v744_v55 = vld [vmem:[#allocation2 + $0x18] sm:$0xf]  ;;  %v2911_v57 = vld [vmem:[#allocation3 + $0xc] sm:$0xf]  ;;  %v758_v59 = vld [vmem:[#allocation2 + $0x8] sm:$0xf]  ;;  %v339_v28 = vmul.f32 %v3190_v18, %v3033_v40 }
  0x3f   : > { %465 = vst [vmem:[#allocation2 + $0x1c] sm:$0x1] %v464_v48  ;;  %v759_v60 = vld [vmem:[#allocation2 + $0xc] sm:$0x1]  ;;  %v760_v61 = vld [vmem:[#allocation2 + $0x10] sm:$0xf]  ;;  %v558_v11 = vsel %vm3401_vm12, %v553_v2, %v557_v47 }
  0x40   : > { %2057 = vmatpush.bf16.msrb.mxu1 %v2956_v3  ;;  %2144 = vmatpush.bf16.msrb.mxu0 %v2980_v10  ;;  %651 = vst [vmem:[#allocation3 + $0x4] sm:$0xf] %v544_v51  ;;  %v775_v62 = vshrl.u32 %v758_v59, 16  ;;  %v778_v63 = vshll.u32 %v758_v59, 16  ;;  %v784_v3 = vshll.u32 %v759_v60, 16  ;;  %v2453_v10 = vrot.slane %v3412_v49, 9 }
  0x41   : > { %752 = vst [vmem:[#allocation3 + $0x54] sm:$0xf] %v744_v55  ;;  %v789_v12 = vshrl.u32 %v760_v61, 16  ;;  %v3008_v13 = vld [vmem:[%s3717_s2 + $0x1f0] sm:$0xff]  ;;  %v792_v22 = vshll.u32 %v760_v61, 16  ;;  %v396_v46 = vrot.slane %v3260_v14, 4  ;;  %v3449_v14 = vadd.f32 %v3205_v23, %v339_v28 }
  0x42   : > { %v2512_v1 = vld [vmem:[#allocation3 + $0x48] sm:$0xf]  ;;  %753 = vst [vmem:[#allocation3 + $0x78] sm:$0xf] %v745_v56  ;;  %v777_v5 = vrot.slane %v775_v62, 4  ;;  %v780_v6 = vrot.slane %v778_v63, 5  ;;  %2227 = vmatpush.bf16.msrb.mxu3 %v3008_v13 }
  0x43   : > { %v2923_v4 = vld [vmem:[#allocation3 + $0x68] sm:$0xf0]  ;;  %652 = vst [vmem:[#allocation3 + $0x28] sm:$0xf] %v558_v11  ;;  %v786_v21 = vrot.slane %v784_v3, 5  ;;  %v791_v29 = vrot.slane %v789_v12, 4 }
  0x44   : > { %2058 = vmatpush.bf16.msrb.mxu1 %v2955_v32  ;;  %2145 = vmatpush.bf16.msrb.mxu0 %v2979_v34  ;;  %v2513_v7 = vor.u32 %v2923_v4, %v2512_v1  ;;  %v2486_v8 = vld [vmem:[#allocation3 + $0x2c] sm:$0xf0]  ;;  %v781_v17 = vor.u32 %v780_v6, %v777_v5  ;;  %v295_v24 = vld [vmem:[#allocation2 + $0x24] sm:$0x1]  ;;  %v664_v26 = vld [vmem:[#allocation2 + $0x14] sm:$0x1] }
  0x45   : > { %v2489_v16 = vor.u32 %v2911_v57, %v2486_v8  ;;  %v761_v27 = vld [vmem:[#allocation2 + $0x14] sm:$0x1]  ;;  %v296_v30 = vsel %vm3197_vm4, 0, %v295_v24  ;;  %v704_v32 = vrot.slane %v664_v26, 5  ;;  %v794_v37 = vrot.slane %v792_v22, 5  ;;  %v2998_v56 = vld [vmem:[%s3717_s2 + $0x1a0] sm:$0xff] }
  0x46   : > { %2046 = vmatmul.bf16.gmra.mxu1 %v2585_v0  ;;  %v666_v31 = vld [vmem:[#allocation2 + $0x1c] sm:$0x1]  ;;  %v782_v34 = vrot.slane %v781_v17, 4  ;;  %v798_v38 = vshll.u32 %v761_v27, 16  ;;  %297 = vst [vmem:[#allocation2 + $0x24] sm:$0x1] %v296_v30  ;;  %2200 = vmatpush.bf16.msrb.mxu2 %v2998_v56 }
  0x47   : > { %2118 = vmatmul.bf16.vlgmr.msra.gmra.mxu3 %v2489_v16  ;;  %v708_v39 = vrot.slane %v666_v31, 5  ;;  %v705_v41 = vsel %vm3269_vm8, %v2452_v33, %v704_v32  ;;  %v795_v43 = vor.u32 %v794_v37, %v791_v29  ;;  %v298_v45 = vld [vmem:[#allocation2 + $0x2c] sm:$0x1]  ;;  %v3443_v33 = vld [vmem:[#allocation2 + $0x20] sm:$0xe]  ;;  %v2992_v49 = vld [vmem:[%s3717_s2 + $0x170] sm:$0xff] }
  0x48   : > { %2059 = vmatpush.bf16.msrb.mxu1 %v2954_v44  ;;  %2146 = vmatpush.bf16.msrb.mxu0 %v2978_v54  ;;  %v787_v42 = vsel %vm3401_vm12, %v782_v34, %v786_v21  ;;  %v800_v44 = vrot.slane %v798_v38, 5  ;;  %736 = vst [vmem:[#allocation3 + $0x50] sm:$0xf] %v705_v41  ;;  %v299_v35 = vsel %vm3197_vm4, 0, %v298_v45  ;;  %v2910_v51 = vld [vmem:[#allocation3 + $0x4] sm:$0xf] }
  0x49   : > { %2036 = vmatmul.bf16.gmra.mxu0 %v2513_v7  ;;  %v709_v47 = vsel %vm3269_vm8, %v2453_v10, %v708_v39  ;;  %v796_v48 = vrot.slane %v795_v43, 4  ;;  %894 = vst [vmem:[#allocation3 + $0x10] sm:$0xf] %v787_v42  ;;  %v404_v54 = vrot.slane %v3262_v15, 4  ;;  %v2454_v18 = vrot.slane %v3443_v33, 9  ;;  %v3007_v57 = vld [vmem:[%s3717_s2 + $0x1e8] sm:$0xff] }
  0x4a   : > { %737 = vst [vmem:[#allocation3 + $0x74] sm:$0xf] %v709_v47  ;;  %v2920_v58 = vld [vmem:[#allocation3 + $0x54] sm:$0xf]  ;;  %v2522_v23 = vld [vmem:[#allocation3 + $0x74] sm:$0xf0]  ;;  %2228 = vmatpush.bf16.msrb.mxu3 %v3007_v57 }
  0x4b   : > { %v801_v55 = vsel %vm3401_vm12, %v796_v48, %v800_v44  ;;  %300 = vst [vmem:[#allocation2 + $0x2c] sm:$0x1] %v299_v35  ;;  %v516_v59 = vld [vmem:[#allocation2 + $0x10] sm:$0xf]  ;;  %v517_v15 = vld [vmem:[#allocation2 + $0x14] sm:$0x1]  ;;  %v2525_v22 = vor.u32 %v2920_v58, %v2522_v23 }
  0x4c   : > { %2168 = vmatpush.bf16.msra.mxu1 %v2993_v52  ;;  %v2478_v52 = vld [vmem:[#allocation3 + $0x24] sm:$0xf0]  ;;  %895 = vst [vmem:[#allocation3 + $0x34] sm:$0xf] %v801_v55  ;;  %v519_v62 = vld [vmem:[#allocation2 + $0x1c] sm:$0x1] }
  0x4d   : > { %v469_v60 = vld [vmem:[#allocation2 + $0x24] sm:$0x1]  ;;  %v518_v61 = vld [vmem:[#allocation2 + $0x18] sm:$0xf]  ;;  %v560_v0 = vshrl.u32 %v516_v59, 16  ;;  %v563_v1 = vshll.u32 %v516_v59, 16  ;;  %v2481_v7 = vor.u32 %v2910_v51, %v2478_v52 }
  0x4e   : > { %v470_v63 = vsel %vm3169_vm2, %v396_v46, %v469_v60  ;;  %v569_v2 = vshll.u32 %v517_v15, 16  ;;  %v2991_v3 = vld [vmem:[%s3717_s2 + $0x168] sm:$0xff]  ;;  %v2997_v4 = vld [vmem:[%s3717_s2 + $0x198] sm:$0xff]  ;;  %v574_v8 = vshrl.u32 %v518_v61, 16  ;;  %v577_v10 = vshll.u32 %v518_v61, 16  ;;  %v3006_v37 = vld [vmem:[%s3717_s2 + $0x1e0] sm:$0xff] }
  0x4f   : > { %v3472_v5 = vld [vmem:[%s3717_s2 + $0x238] sm:$0xff]  ;;  %v2520_v6 = vld [vmem:[#allocation3 + $0x50] sm:$0xf]  ;;  %471 = vst [vmem:[#allocation2 + $0x24] sm:$0x1] %v470_v63  ;;  %v562_v12 = vrot.slane %v560_v0, 4  ;;  %2201 = vmatpush.bf16.msrb.mxu2 %v2997_v4  ;;  %2229 = vmatpush.bf16.msrb.mxu3 %v3006_v37 }
  0x50   : > { %2169 = vmatpush.bf16.msra.mxu1 %v2992_v49  ;;  %v565_v13 = vrot.slane %v563_v1, 5  ;;  %v571_v16 = vrot.slane %v569_v2, 5  ;;  %v583_v17 = vshll.u32 %v519_v62, 16  ;;  %2255 = vmatpush.bf16.msra.mxu0 %v3472_v5  ;;  %v2492_v24 = vld [vmem:[#allocation3 + $0x10] sm:$0xf]  ;;  %v576_v26 = vrot.slane %v574_v8, 4 }
  0x51   : > { %v2924_v11 = vld [vmem:[#allocation3 + $0x70] sm:$0xf0]  ;;  %v579_v27 = vrot.slane %v577_v10, 5  ;;  %v746_v29 = vld [vmem:[#allocation2 + $0x28] sm:$0xf]  ;;  %v356_v1 = vmax.f32 %v3449_v14, 0.0 }
  0x52   : > { %v2521_v21 = vor.u32 %v2924_v11, %v2520_v6  ;;  %v475_v30 = vld [vmem:[#allocation2 + $0x2c] sm:$0x1]  ;;  %v566_v31 = vor.u32 %v565_v13, %v562_v12  ;;  %v585_v32 = vrot.slane %v583_v17, 5  ;;  %v747_v34 = vld [vmem:[#allocation2 + $0x30] sm:$0xf] }
  0x53   : > { %v2916_v38 = vld [vmem:[#allocation3 + $0x30] sm:$0xf0]  ;;  %v476_v39 = vsel %vm3169_vm2, %v404_v54, %v475_v30  ;;  %v580_v40 = vor.u32 %v579_v27, %v576_v26  ;;  %754 = vst [vmem:[#allocation3 + $0x9c] sm:$0xf] %v746_v29  ;;  %v762_v41 = vld [vmem:[#allocation2 + $0x18] sm:$0xf] }
  0x54   : > { %2170 = vmatpush.bf16.msra.mxu1 %v2991_v3  ;;  %2094 = vmatmul.bf16.gmra.mxu2 %v2521_v21  ;;  %v2493_v42 = vor.u32 %v2916_v38, %v2492_v24  ;;  %477 = vst [vmem:[#allocation2 + $0x2c] sm:$0x1] %v476_v39  ;;  %v567_v43 = vrot.slane %v566_v31, 4  ;;  %v763_v44 = vld [vmem:[#allocation2 + $0x1c] sm:$0x1]  ;;  %v803_v45 = vshrl.u32 %v762_v41, 16  ;;  %v3503_v21 = vpack.c.bf16 %v356_v1, %v356_v1 }
  0x55   : > { %v669_v46 = vld [vmem:[#allocation2 + $0x28] sm:$0xe]  ;;  %v581_v47 = vrot.slane %v580_v40, 4  ;;  %755 = vst [vmem:[#allocation3 + $0xc0] sm:$0xf] %v747_v34  ;;  %v806_v28 = vshll.u32 %v762_v41, 16 }
  0x56   : > { %2060 = vmatmul.bf16.vlgmr.msrb.gmra.mxu1 %v2481_v7  ;;  %v764_v35 = vld [vmem:[#allocation2 + $0x20] sm:$0xf]  ;;  %v668_v48 = vld [vmem:[#allocation2 + $0x24] sm:$0x1]  ;;  %v572_v49 = vsel %vm3401_vm12, %v567_v43, %v571_v16  ;;  %v805_v52 = vrot.slane %v803_v45, 4  ;;  %v812_v54 = vshll.u32 %v763_v44, 16 }
  0x57   : > { %2123 = vmatmul.bf16.gmra.mxu3 %v2525_v22  ;;  %v765_v51 = vld [vmem:[#allocation2 + $0x24] sm:$0x1]  ;;  %v712_v55 = vrot.slane %v668_v48, 5  ;;  %v586_v56 = vsel %vm3401_vm12, %v581_v47, %v585_v32  ;;  %653 = vst [vmem:[#allocation3 + $0x4c] sm:$0xf] %v572_v49  ;;  %v808_v57 = vrot.slane %v806_v28, 5 }
  0x58   : > { %v817_v58 = vshrl.u32 %v764_v35, 16  ;;  %654 = vst [vmem:[#allocation3 + $0x70] sm:$0xf] %v586_v56  ;;  %v814_v23 = vrot.slane %v812_v54, 5  ;;  %v820_v59 = vshll.u32 %v764_v35, 16  ;;  %v826_v15 = vshll.u32 %v765_v51, 16 }
  0x59   : > { %2147 = vmatmul.bf16.vlgmr.msrb.gmra.mxu0 %v2493_v42  ;;  %v713_v60 = vsel %vm3269_vm8, %v2454_v18, %v712_v55  ;;  %v809_v61 = vor.u32 %v808_v57, %v805_v52  ;;  %v301_v63 = vld [vmem:[#allocation2 + $0x34] sm:$0x1]  ;;  %v304_v0 = vld [vmem:[#allocation2 + $0x3c] sm:$0x1]  ;;  %v2455_v2 = vrot.slane %v669_v46, 9  ;;  %v2990_v18 = vld [vmem:[%s3717_s2 + $0x160] sm:$0xff] }
  0x5a   : > { %v819_v62 = vrot.slane %v817_v58, 4  ;;  %738 = vst [vmem:[#allocation3 + $0x98] sm:$0xf] %v713_v60  ;;  %v822_v3 = vrot.slane %v820_v59, 5  ;;  %v302_v7 = vsel %vm3197_vm4, 0, %v301_v63  ;;  %v305_v33 = vsel %vm3197_vm4, 0, %v304_v0  ;;  %2171 = vmatpush.bf16.msra.mxu1 %v2990_v18 }
  0x5b   : > { %v670_v4 = vld [vmem:[#allocation2 + $0x2c] sm:$0x1]  ;;  %v810_v6 = vrot.slane %v809_v61, 4  ;;  %v828_v12 = vrot.slane %v826_v15, 5  ;;  %303 = vst [vmem:[#allocation2 + $0x34] sm:$0x1] %v302_v7 }
  0x5c   : > { %v716_v8 = vrot.slane %v670_v4, 5  ;;  %v2929_v10 = vld [vmem:[#allocation3 + $0x9c] sm:$0xf]  ;;  %v823_v11 = vor.u32 %v822_v3, %v819_v62  ;;  %v2996_v14 = vld [vmem:[%s3717_s2 + $0x190] sm:$0xff]  ;;  %306 = vst [vmem:[#allocation2 + $0x3c] sm:$0x1] %v305_v33 }
  0x5d   : > { %v2558_v13 = vld [vmem:[#allocation3 + $0xbc] sm:$0xf0]  ;;  %v815_v16 = vsel %vm3401_vm12, %v810_v6, %v814_v23  ;;  %2202 = vmatpush.bf16.msrb.mxu2 %v2996_v14  ;;  %v412_v27 = vrot.slane %v3301_v50, 4  ;;  %v3508_v30 = vld [vmem:[#allocation2 + $0x38] sm:$0xe]  ;;  %v420_v32 = vrot.slane %v3308_v53, 4 }
  0x5e   : > { %v3501_v17 = vld [vmem:[#allocation2 + $0x30] sm:$0xe]  ;;  %v717_v22 = vsel %vm3269_vm8, %v2455_v2, %v716_v8  ;;  %v2919_v24 = vld [vmem:[#allocation3 + $0x4c] sm:$0xf]  ;;  %v824_v26 = vrot.slane %v823_v11, 4  ;;  %v2561_v40 = vor.u32 %v2929_v10, %v2558_v13  ;;  %v422_v43 = vshrl.u32 %v3503_v21, 16 }
  0x5f   : > { %896 = vst [vmem:[#allocation3 + $0x58] sm:$0xf] %v815_v16  ;;  %v2514_v29 = vld [vmem:[#allocation3 + $0x6c] sm:$0xf0]  ;;  %v3513_v31 = vld [vmem:[%s3717_s2 + $0x230] sm:$0xff]  ;;  %v3005_v38 = vld [vmem:[%s3717_s2 + $0x1d8] sm:$0xff] }
  0x60   : > { %739 = vst [vmem:[#allocation3 + $0xbc] sm:$0xf] %v717_v22  ;;  %v2517_v34 = vor.u32 %v2919_v24, %v2514_v29  ;;  %v829_v37 = vsel %vm3401_vm12, %v824_v26, %v828_v12  ;;  %v520_v50 = vld [vmem:[#allocation2 + $0x20] sm:$0xf]  ;;  %v521_v39 = vld [vmem:[#allocation2 + $0x24] sm:$0x1]  ;;  %2256 = vmatpush.bf16.msra.mxu0 %v3513_v31  ;;  %2230 = vmatpush.bf16.msrb.mxu3 %v3005_v38 }
  0x61   : > { %897 = vst [vmem:[#allocation3 + $0x7c] sm:$0xf] %v829_v37  ;;  %v2456_v41 = vrot.slane %v3501_v17, 9  ;;  %v522_v42 = vld [vmem:[#allocation2 + $0x28] sm:$0xf]  ;;  %v588_v45 = vshrl.u32 %v520_v50, 16 }
  0x62   : > { %v2556_v53 = vld [vmem:[#allocation3 + $0x98] sm:$0xf]  ;;  %v523_v44 = vld [vmem:[#allocation2 + $0x2c] sm:$0x1]  ;;  %v591_v46 = vshll.u32 %v520_v50, 16  ;;  %v597_v47 = vshll.u32 %v521_v39, 16 }
  0x63   : > { %v602_v35 = vshrl.u32 %v522_v42, 16  ;;  %v481_v28 = vld [vmem:[#allocation2 + $0x34] sm:$0x1]  ;;  %v605_v48 = vshll.u32 %v522_v42, 16  ;;  %v611_v49 = vshll.u32 %v523_v44, 16  ;;  %v2989_v51 = vld [vmem:[%s3717_s2 + $0x158] sm:$0xff] }
  0x64   : > { %v2995_v52 = vld [vmem:[%s3717_s2 + $0x188] sm:$0xff]  ;;  %v482_v54 = vsel %vm3169_vm2, %v412_v27, %v481_v28  ;;  %v487_v55 = vld [vmem:[#allocation2 + $0x3c] sm:$0x1]  ;;  %v2457_v56 = vrot.slane %v3508_v30, 9  ;;  %v590_v57 = vrot.slane %v588_v45, 4  ;;  %v593_v58 = vrot.slane %v591_v46, 5  ;;  %2172 = vmatpush.bf16.msra.mxu1 %v2989_v51 }
  0x65   : > { %v3536_v23 = vld [vmem:[%s3717_s2 + $0x228] sm:$0xff]  ;;  %483 = vst [vmem:[#allocation2 + $0x34] sm:$0x1] %v482_v54  ;;  %v488_v15 = vsel %vm3169_vm2, %v420_v32, %v487_v55  ;;  %v604_v60 = vrot.slane %v602_v35, 4  ;;  %v607_v61 = vrot.slane %v605_v48, 5  ;;  %v599_v0 = vrot.slane %v597_v47, 5  ;;  %2203 = vmatpush.bf16.msrb.mxu2 %v2995_v52 }
  0x66   : > { %2065 = vmatmul.bf16.gmra.mxu1 %v2517_v34  ;;  %v2528_v59 = vld [vmem:[#allocation3 + $0x58] sm:$0xf]  ;;  %489 = vst [vmem:[#allocation2 + $0x3c] sm:$0x1] %v488_v15  ;;  %v594_v63 = vor.u32 %v593_v58, %v590_v57  ;;  %2257 = vmatpush.bf16.msra.mxu0 %v3536_v23  ;;  %v2994_v1 = vld [vmem:[%s3717_s2 + $0x180] sm:$0xff]  ;;  %v613_v4 = vrot.slane %v611_v49, 5 }
  0x67   : > { %2128 = vmatmul.bf16.gmra.mxu3 %v2561_v40  ;;  %v2933_v62 = vld [vmem:[#allocation3 + $0xb8] sm:$0xf0]  ;;  %v608_v3 = vor.u32 %v607_v61, %v604_v60  ;;  %v275_v6 = vld [vmem:[#allocation2 + $0x40] sm:$0x1]  ;;  %v3544_v7 = vrot.slane %v422_v43, 7  ;;  %v425_v14 = vshll.u32 %v3503_v21, 16 }
  0x68   : > { %v2557_v2 = vor.u32 %v2933_v62, %v2556_v53  ;;  %v748_v33 = vld [vmem:[#allocation2 + $0x38] sm:$0xf]  ;;  %v2925_v18 = vld [vmem:[#allocation3 + $0x78] sm:$0xf0]  ;;  %v595_v8 = vrot.slane %v594_v63, 4  ;;  %v276_v10 = vsel %vm3169_vm2, 0, %v275_v6 }
  0x69   : > { %756 = vst [vmem:[#allocation3 + $0xe4] sm:$0xf] %v748_v33  ;;  %v2529_v11 = vor.u32 %v2925_v18, %v2528_v59  ;;  %v609_v12 = vrot.slane %v608_v3, 4  ;;  %v766_v13 = vld [vmem:[#allocation2 + $0x28] sm:$0xf]  ;;  %2204 = vmatpush.bf16.msrb.mxu2 %v2994_v1  ;;  %v3004_v21 = vld [vmem:[%s3717_s2 + $0x1d0] sm:$0xff]  ;;  %v427_v42 = vor.u32 %v425_v14, %v3544_v7 }
  0x6a   : > { %2099 = vmatmul.bf16.gmra.mxu2 %v2557_v2  ;;  %277 = vst [vmem:[#allocation2 + $0x40] sm:$0x1] %v276_v10  ;;  %v600_v16 = vsel %vm3401_vm12, %v595_v8, %v599_v0  ;;  %v767_v22 = vld [vmem:[#allocation2 + $0x2c] sm:$0x1]  ;;  %v768_v24 = vld [vmem:[#allocation2 + $0x30] sm:$0xf]  ;;  %2231 = vmatpush.bf16.msrb.mxu3 %v3004_v21 }
  0x6b   : > { %v831_v26 = vshrl.u32 %v766_v13, 16  ;;  %v834_v27 = vshll.u32 %v766_v13, 16  ;;  %2152 = vmatmul.bf16.gmra.mxu0 %v2529_v11  ;;  %v614_v29 = vsel %vm3401_vm12, %v609_v12, %v613_v4  ;;  %655 = vst [vmem:[#allocation3 + $0x94] sm:$0xf] %v600_v16  ;;  %v840_v32 = vshll.u32 %v767_v22, 16  ;;  %v2988_v35 = vld [vmem:[%s3717_s2 + $0x150] sm:$0xff] }
  0x6c   : > { %v845_v34 = vshrl.u32 %v768_v24, 16  ;;  %v848_v37 = vshll.u32 %v768_v24, 16  ;;  %v672_v38 = vld [vmem:[#allocation2 + $0x34] sm:$0x1]  ;;  %656 = vst [vmem:[#allocation3 + $0xb8] sm:$0xf] %v614_v29  ;;  %2173 = vmatpush.bf16.msra.mxu1 %v2988_v35 }
  0x6d   : > { %3068 = vmatpush.bf16.msra.mxu2 %v3472_v5  ;;  %v769_v50 = vld [vmem:[#allocation2 + $0x34] sm:$0x1]  ;;  %v674_v39 = vld [vmem:[#allocation2 + $0x3c] sm:$0x1]  ;;  %v720_v40 = vrot.slane %v672_v38, 5  ;;  %v833_v43 = vrot.slane %v831_v26, 4 }
  0x6e   : > { %v836_v53 = vrot.slane %v834_v27, 5  ;;  %v724_v44 = vrot.slane %v674_v39, 5  ;;  %v847_v45 = vrot.slane %v845_v34, 4  ;;  %v850_v46 = vrot.slane %v848_v37, 5  ;;  %v3014_v5 = vld [vmem:[%s3717_s2 + $0x220] sm:$0xff]  ;;  %v3003_v17 = vld [vmem:[%s3717_s2 + $0x1c8] sm:$0xff] }
  0x6f   : > { %v854_v47 = vshll.u32 %v769_v50, 16  ;;  %v721_v28 = vsel %vm3269_vm8, %v2456_v41, %v720_v40  ;;  %v842_v49 = vrot.slane %v840_v32, 5  ;;  %v983_v51 = vld [vmem:[#allocation2 + $0x10] sm:$0xf]  ;;  %2258 = vmatpush.bf16.msra.mxu0 %v3014_v5  ;;  %v984_v58 = vld [vmem:[#allocation2 + $0x18] sm:$0xf]  ;;  %2232 = vmatpush.bf16.msrb.mxu3 %v3003_v17 }
  0x70   : > { %v837_v48 = vor.u32 %v836_v53, %v833_v43  ;;  %v725_v52 = vsel %vm3269_vm8, %v2457_v56, %v724_v44  ;;  %740 = vst [vmem:[#allocation3 + $0xe0] sm:$0xf] %v721_v28  ;;  %v851_v55 = vor.u32 %v850_v46, %v847_v45  ;;  %v524_v30 = vld [vmem:[#allocation2 + $0x30] sm:$0xf]  ;;  %v2987_v56 = vld [vmem:[%s3717_s2 + $0x148] sm:$0xff]  ;;  %v3002_v10 = vld [vmem:[%s3717_s2 + $0x1c0] sm:$0xff] }
  0x71   : > { %3069 = vmatpush.bf16.msra.mxu2 %v3513_v31  ;;  %v490_v54 = vld [vmem:[#allocation2 + $0x40] sm:$0xf]  ;;  %v856_v57 = vrot.slane %v854_v47, 5  ;;  %741 = vst [vmem:[#allocation3 + $0x104] sm:$0xf] %v725_v52  ;;  %v616_v60 = vshrl.u32 %v524_v30, 16  ;;  %2174 = vmatpush.bf16.msra.mxu1 %v2987_v56 }
  0x72   : > { %v491_v41 = vsel %vm3278_vm9, %v427_v42, %v490_v54  ;;  %v838_v31 = vrot.slane %v837_v48, 4  ;;  %v2928_v59 = vld [vmem:[#allocation3 + $0x94] sm:$0xf]  ;;  %v852_v15 = vrot.slane %v851_v55, 4  ;;  %991 = vst [vmem:[#allocation3 + $0x18] sm:$0xf] %v983_v51 }
  0x73   : > { %492 = vst [vmem:[#allocation2 + $0x40] sm:$0xf] %v491_v41  ;;  %v2550_v61 = vld [vmem:[#allocation3 + $0xb4] sm:$0xf0]  ;;  %v525_v63 = vld [vmem:[#allocation2 + $0x34] sm:$0x1]  ;;  %2233 = vmatpush.bf16.msrb.mxu3 %v3002_v10 }
  0x74   : > { %v843_v62 = vsel %vm3401_vm12, %v838_v31, %v842_v49  ;;  %v2553_v25 = vor.u32 %v2928_v59, %v2550_v61  ;;  %v857_v0 = vsel %vm3401_vm12, %v852_v15, %v856_v57  ;;  %v526_v1 = vld [vmem:[#allocation2 + $0x38] sm:$0xf]  ;;  %v527_v2 = vld [vmem:[#allocation2 + $0x3c] sm:$0x1]  ;;  %v618_v3 = vrot.slane %v616_v60, 4  ;;  %v2986_v56 = vld [vmem:[%s3717_s2 + $0x140] sm:$0xff] }
  0x75   : > { %3070 = vmatpush.bf16.msra.mxu2 %v3536_v23  ;;  %898 = vst [vmem:[#allocation3 + $0xa0] sm:$0xf] %v843_v62  ;;  %v619_v4 = vshll.u32 %v524_v30, 16  ;;  %v625_v6 = vshll.u32 %v525_v63, 16  ;;  %v630_v33 = vshrl.u32 %v526_v1, 16  ;;  %v633_v18 = vshll.u32 %v526_v1, 16  ;;  %2175 = vmatpush.bf16.msra.mxu1 %v2986_v56 }
  0x76   : > { %899 = vst [vmem:[#allocation3 + $0xc4] sm:$0xf] %v857_v0  ;;  %2070 = vmatmul.bf16.gmra.mxu1 %v2553_v25  ;;  %v639_v8 = vshll.u32 %v527_v2, 16  ;;  %v3013_v23 = vld [vmem:[%s3717_s2 + $0x218] sm:$0xff]  ;;  %v307_v22 = vld [vmem:[#allocation2 + $0x44] sm:$0x1] }
  0x77   : > { %992 = vst [vmem:[#allocation3 + $0x3c] sm:$0xf] %v984_v58  ;;  %v2592_v11 = vld [vmem:[#allocation3 + $0xe0] sm:$0xf]  ;;  %v621_v12 = vrot.slane %v619_v4, 5  ;;  %v632_v14 = vrot.slane %v630_v33, 4  ;;  %2259 = vmatpush.bf16.msra.mxu0 %v3013_v23 }
  0x78   : > { %v2942_v13 = vld [vmem:[#allocation3 + $0x100] sm:$0xf0]  ;;  %v635_v16 = vrot.slane %v633_v18, 5  ;;  %v627_v29 = vrot.slane %v625_v6, 5  ;;  %v308_v32 = vsel %vm3197_vm4, 0, %v307_v22  ;;  %v428_v37 = vrot.slane %v3544_v7, 4 }
  0x79   : > { %3071 = vmatpush.bf16.msra.mxu2 %v3014_v5  ;;  %v2593_v24 = vor.u32 %v2942_v13, %v2592_v11  ;;  %v622_v27 = vor.u32 %v621_v12, %v618_v3  ;;  %v770_v34 = vld [vmem:[#allocation2 + $0x38] sm:$0xf]  ;;  %v641_v38 = vrot.slane %v639_v8, 5  ;;  %v771_v50 = vld [vmem:[#allocation2 + $0x3c] sm:$0x1]  ;;  %v3012_v6 = vld [vmem:[%s3717_s2 + $0x210] sm:$0xff] }
  0x7a   : > { %v749_v26 = vld [vmem:[#allocation2 + $0x40] sm:$0xf]  ;;  %v636_v21 = vor.u32 %v635_v16, %v632_v14  ;;  %309 = vst [vmem:[#allocation2 + $0x44] sm:$0x1] %v308_v32  ;;  %v859_v42 = vshrl.u32 %v770_v34, 16  ;;  %v862_v45 = vshll.u32 %v770_v34, 16 }
  0x7b   : > { %757 = vst [vmem:[#allocation3 + $0x108] sm:$0xf] %v749_v26  ;;  %2104 = vmatmul.bf16.gmra.mxu2 %v2593_v24  ;;  %v623_v40 = vrot.slane %v622_v27, 4  ;;  %v772_v44 = vld [vmem:[#allocation2 + $0x40] sm:$0xf]  ;;  %v868_v5 = vshll.u32 %v771_v50, 16  ;;  %2260 = vmatpush.bf16.msra.mxu0 %v3012_v6 }
  0x7c   : > { %v2564_v39 = vld [vmem:[#allocation3 + $0xa0] sm:$0xf]  ;;  %v637_v53 = vrot.slane %v636_v21, 4  ;;  %v2938_v46 = vld [vmem:[#allocation3 + $0xe4] sm:$0xf]  ;;  %v861_v7 = vrot.slane %v859_v42, 4 }
  0x7d   : > { %v2934_v43 = vld [vmem:[#allocation3 + $0xc0] sm:$0xf0]  ;;  %3072 = vmatpush.bf16.msra.mxu2 %v3013_v23  ;;  %v628_v35 = vsel %vm3401_vm12, %v623_v40, %v627_v29  ;;  %v999_v28 = vld [vmem:[#allocation2 + $0x10] sm:$0xf]  ;;  %v864_v49 = vrot.slane %v862_v45, 5  ;;  %v873_v51 = vshrl.u32 %v772_v44, 16 }
  0x7e   : > { %v2565_v47 = vor.u32 %v2934_v43, %v2564_v39  ;;  %v642_v48 = vsel %vm3401_vm12, %v637_v53, %v641_v38  ;;  %657 = vst [vmem:[#allocation3 + $0xdc] sm:$0xf] %v628_v35  ;;  %v1000_v52 = vld [vmem:[#allocation2 + $0x14] sm:$0x1]  ;;  %v870_v54 = vrot.slane %v868_v5, 5  ;;  %v876_v55 = vshll.u32 %v772_v44, 16 }
  0x7f   : > { %658 = vst [vmem:[#allocation3 + $0x100] sm:$0xf] %v642_v48  ;;  %v1001_v57 = vld [vmem:[#allocation2 + $0x18] sm:$0xf]  ;;  %v865_v17 = vor.u32 %v864_v49, %v861_v7  ;;  %v875_v41 = vrot.slane %v873_v51, 4  ;;  %v1016_v58 = vshrl.u32 %v999_v28, 16 }
  0x80   : > { %2157 = vmatmul.bf16.gmra.mxu0 %v2565_v47  ;;  %v1002_v31 = vld [vmem:[#allocation2 + $0x1c] sm:$0x1]  ;;  %v1019_v30 = vshll.u32 %v999_v28, 16  ;;  %v878_v15 = vrot.slane %v876_v55, 5  ;;  %v1025_v60 = vshll.u32 %v1000_v52, 16  ;;  %v1030_v61 = vshrl.u32 %v1001_v57, 16 }
  0x81   : > { %v1033_v62 = vshll.u32 %v1001_v57, 16  ;;  %v2500_v25 = vld [vmem:[#allocation3 + $0x18] sm:$0xf]  ;;  %v2917_v0 = vld [vmem:[#allocation3 + $0x38] sm:$0xf0]  ;;  %v866_v2 = vrot.slane %v865_v17, 4  ;;  %3073 = vmatpush.bf16.msra.mxu2 %v3012_v6 }
  0x82   : > { %v2594_v59 = vld [vmem:[#allocation3 + $0x104] sm:$0xf0]  ;;  %v493_v1 = vld [vmem:[#allocation2 + $0x44] sm:$0x1]  ;;  %v1018_v3 = vrot.slane %v1016_v58, 4  ;;  %v1021_v4 = vrot.slane %v1019_v30, 5  ;;  %v879_v26 = vor.u32 %v878_v15, %v875_v41 }
  0x83   : > { %v2597_v63 = vor.u32 %v2938_v46, %v2594_v59  ;;  %v494_v33 = vsel %vm3169_vm2, %v428_v37, %v493_v1  ;;  %v1027_v18 = vrot.slane %v1025_v60, 5  ;;  %v1032_v8 = vrot.slane %v1030_v61, 4  ;;  %v985_v23 = vld [vmem:[#allocation2 + $0x20] sm:$0xf]  ;;  %v986_v10 = vld [vmem:[#allocation2 + $0x28] sm:$0xf] }
  0x84   : > { %495 = vst [vmem:[#allocation2 + $0x44] sm:$0x1] %v494_v33  ;;  %v871_v11 = vsel %vm3401_vm12, %v866_v2, %v870_v54  ;;  %v1022_v12 = vor.u32 %v1021_v4, %v1018_v3  ;;  %v1035_v14 = vrot.slane %v1033_v62, 5  ;;  %v1039_v13 = vshll.u32 %v1002_v31, 16  ;;  %v3011_v16 = vld [vmem:[%s3717_s2 + $0x208] sm:$0xff]  ;;  %v3010_v34 = vld [vmem:[%s3717_s2 + $0x200] sm:$0xff] }
  0x85   : > { %2133 = vmatmul.bf16.gmra.mxu3 %v2597_v63  ;;  %v2937_v22 = vld [vmem:[#allocation3 + $0xdc] sm:$0xf]  ;;  %900 = vst [vmem:[#allocation3 + $0xe8] sm:$0xf] %v871_v11  ;;  %v2501_v37 = vor.u32 %v2917_v0, %v2500_v25  ;;  %v902_v38 = vld [vmem:[#allocation2 + $0x8] sm:$0xe]  ;;  %2261 = vmatpush.bf16.msra.mxu0 %v3011_v16 }
  0x86   : > { %v2586_v24 = vld [vmem:[#allocation3 + $0xfc] sm:$0xf0]  ;;  %v1023_v27 = vrot.slane %v1022_v12, 4  ;;  %v1036_v29 = vor.u32 %v1035_v14, %v1032_v8  ;;  %v1041_v32 = vrot.slane %v1039_v13, 5  ;;  %993 = vst [vmem:[#allocation3 + $0x60] sm:$0xf] %v985_v23  ;;  %3074 = vmatpush.bf16.msra.mxu2 %v3011_v16 }
  0x87   : > { %v2589_v21 = vor.u32 %v2937_v22, %v2586_v24  ;;  %994 = vst [vmem:[#allocation3 + $0x84] sm:$0xf] %v986_v10  ;;  %v903_v50 = vld [vmem:[#allocation2 + $0xc] sm:$0x1]  ;;  %v904_v42 = vld [vmem:[#allocation2 + $0x10] sm:$0xe] }
  0x88   : > { %v1028_v39 = vsel %vm3401_vm12, %v1023_v27, %v1027_v18  ;;  %v1037_v40 = vrot.slane %v1036_v29, 4  ;;  %v905_v43 = vld [vmem:[#allocation2 + $0x14] sm:$0x1]  ;;  %v2458_v53 = vrot.slane %v902_v38, 9  ;;  %v936_v44 = vrot.slane %v903_v50, 5 }
  0x89   : > { %2075 = vmatmul.bf16.gmra.mxu1 %v2589_v21  ;;  %1135 = vst [vmem:[#allocation3 + $0x1c] sm:$0xf] %v1028_v39  ;;  %v2459_v45 = vrot.slane %v904_v42, 9  ;;  %v940_v46 = vrot.slane %v905_v43, 5  ;;  %v880_v47 = vrot.slane %v879_v26, 4  ;;  %2262 = vmatpush.bf16.msra.mxu0 %v3010_v34 }
  0x8a   : > { %v1042_v35 = vsel %vm3401_vm12, %v1037_v40, %v1041_v32  ;;  %v1003_v7 = vld [vmem:[#allocation2 + $0x20] sm:$0xf]  ;;  %v1004_v5 = vld [vmem:[#allocation2 + $0x24] sm:$0x1]  ;;  %v937_v48 = vsel %vm3269_vm8, %v2458_v53, %v936_v44  ;;  %v1005_v51 = vld [vmem:[#allocation2 + $0x28] sm:$0xf]  ;;  %3075 = vmatpush.bf16.msra.mxu2 %v3010_v34 }
  0x8b   : > { %2205 = vmatmul.bf16.vlgmr.msrb.gmra.mxu2 %v2501_v37  ;;  %v773_v28 = vld [vmem:[#allocation2 + $0x44] sm:$0x1]  ;;  %1136 = vst [vmem:[#allocation3 + $0x40] sm:$0xf] %v1042_v35  ;;  %v941_v49 = vsel %vm3269_vm8, %v2459_v45, %v940_v46  ;;  %v1006_v54 = vld [vmem:[#allocation2 + $0x2c] sm:$0x1] }
  0x8c   : > { %v882_v52 = vshll.u32 %v773_v28, 16  ;;  %974 = vst [vmem:[#allocation3 + $0x14] sm:$0xf] %v937_v48  ;;  %v1044_v55 = vshrl.u32 %v1003_v7, 16  ;;  %v1047_v57 = vshll.u32 %v1003_v7, 16  ;;  %v1053_v17 = vshll.u32 %v1004_v5, 16 }
  0x8d   : > { %975 = vst [vmem:[#allocation3 + $0x38] sm:$0xf] %v941_v49  ;;  %v1058_v58 = vshrl.u32 %v1005_v51, 16  ;;  %v1061_v30 = vshll.u32 %v1005_v51, 16  ;;  %v1067_v15 = vshll.u32 %v1006_v54, 16 }
  0x8e   : > { %v884_v41 = vrot.slane %v882_v52, 5  ;;  %v1046_v31 = vrot.slane %v1044_v55, 4  ;;  %v1049_v56 = vrot.slane %v1047_v57, 5  ;;  %v1055_v59 = vrot.slane %v1053_v17, 5  ;;  %v1143_v60 = vld [vmem:[#allocation2 + $0x10] sm:$0xe] }
  0x8f   : > { %v1060_v63 = vrot.slane %v1058_v58, 4  ;;  %v1063_v25 = vrot.slane %v1061_v30, 5  ;;  %v1144_v0 = vld [vmem:[#allocation2 + $0x14] sm:$0x1]  ;;  %v2536_v1 = vld [vmem:[#allocation3 + $0x60] sm:$0xf] }
  0x90   : > { %v885_v61 = vsel %vm3401_vm12, %v880_v47, %v884_v41  ;;  %v2913_v62 = vld [vmem:[#allocation3 + $0x1c] sm:$0xf]  ;;  %v1050_v2 = vor.u32 %v1049_v56, %v1046_v31  ;;  %v1069_v3 = vrot.slane %v1067_v15, 5  ;;  %v1145_v4 = vld [vmem:[#allocation2 + $0x18] sm:$0xe]  ;;  %v2466_v6 = vrot.slane %v1143_v60, 9 }
  0x91   : > { %901 = vst [vmem:[#allocation3 + $0x10c] sm:$0xf] %v885_v61  ;;  %v1064_v18 = vor.u32 %v1063_v25, %v1060_v63  ;;  %v1146_v8 = vld [vmem:[#allocation2 + $0x1c] sm:$0x1]  ;;  %v1177_v23 = vrot.slane %v1144_v0, 5  ;;  %v2467_v10 = vrot.slane %v1145_v4, 9 }
  0x92   : > { %v2502_v33 = vld [vmem:[#allocation3 + $0x3c] sm:$0xf0]  ;;  %v2926_v12 = vld [vmem:[#allocation3 + $0x80] sm:$0xf0]  ;;  %v1051_v13 = vrot.slane %v1050_v2, 4  ;;  %v1181_v16 = vrot.slane %v1146_v8, 5 }
  0x93   : > { %v2505_v11 = vor.u32 %v2913_v62, %v2502_v33  ;;  %v2912_v14 = vld [vmem:[#allocation3 + $0x14] sm:$0xf]  ;;  %v2600_v22 = vld [vmem:[#allocation3 + $0xe8] sm:$0xf]  ;;  %v1065_v26 = vrot.slane %v1064_v18, 4  ;;  %v1178_v27 = vsel %vm3269_vm8, %v2466_v6, %v1177_v23  ;;  %v2537_v39 = vor.u32 %v2926_v12, %v2536_v1 }
  0x94   : > { %v2494_v24 = vld [vmem:[#allocation3 + $0x34] sm:$0xf0]  ;;  %v987_v29 = vld [vmem:[#allocation2 + $0x30] sm:$0xf]  ;;  %v1056_v34 = vsel %vm3401_vm12, %v1051_v13, %v1055_v59  ;;  %v1182_v37 = vsel %vm3269_vm8, %v2467_v10, %v1181_v16  ;;  %1215 = vst [vmem:[#allocation3 + $0x20] sm:$0xf] %v1178_v27 }
  0x95   : > { %2234 = vmatmul.bf16.vlgmr.msrb.gmra.mxu3 %v2505_v11  ;;  %v2497_v32 = vor.u32 %v2912_v14, %v2494_v24  ;;  %v988_v21 = vld [vmem:[#allocation2 + $0x38] sm:$0xf]  ;;  %v907_v50 = vld [vmem:[#allocation2 + $0x1c] sm:$0x1]  ;;  %v1070_v40 = vsel %vm3401_vm12, %v1065_v26, %v1069_v3  ;;  %1137 = vst [vmem:[#allocation3 + $0x64] sm:$0xf] %v1056_v34 }
  0x96   : > { %v906_v38 = vld [vmem:[#allocation2 + $0x18] sm:$0xe]  ;;  %v908_v42 = vld [vmem:[#allocation2 + $0x20] sm:$0xe]  ;;  %v909_v43 = vld [vmem:[#allocation2 + $0x24] sm:$0x1] }
  0x97   : > { %1138 = vst [vmem:[#allocation3 + $0x88] sm:$0xf] %v1070_v40  ;;  %v2460_v53 = vrot.slane %v906_v38, 9  ;;  %v944_v44 = vrot.slane %v907_v50, 5  ;;  %v2461_v45 = vrot.slane %v908_v42, 9  ;;  %v948_v46 = vrot.slane %v909_v43, 5 }
  0x98   : > { %v2943_v47 = vld [vmem:[#allocation3 + $0x108] sm:$0xf0]  ;;  %1216 = vst [vmem:[#allocation3 + $0x44] sm:$0xf] %v1182_v37  ;;  %v1007_v35 = vld [vmem:[#allocation2 + $0x30] sm:$0xf] }
  0x99   : > { %v2601_v7 = vor.u32 %v2943_v47, %v2600_v22  ;;  %2176 = vmatmul.bf16.vlgmr.msra.gmra.mxu1 %v2497_v32  ;;  %995 = vst [vmem:[#allocation3 + $0xa8] sm:$0xf] %v987_v29  ;;  %v945_v5 = vsel %vm3269_vm8, %v2460_v53, %v944_v44  ;;  %v949_v28 = vsel %vm3269_vm8, %v2461_v45, %v948_v46  ;;  %v1008_v48 = vld [vmem:[#allocation2 + $0x34] sm:$0x1]  ;;  %v1009_v49 = vld [vmem:[#allocation2 + $0x38] sm:$0xf] }
  0x9a   : > { %996 = vst [vmem:[#allocation3 + $0xcc] sm:$0xf] %v988_v21  ;;  %v1010_v51 = vld [vmem:[#allocation2 + $0x3c] sm:$0x1]  ;;  %v1072_v52 = vshrl.u32 %v1007_v35, 16  ;;  %v1075_v54 = vshll.u32 %v1007_v35, 16 }
  0x9b   : > { %2162 = vmatmul.bf16.gmra.mxu0 %v2601_v7  ;;  %2210 = vmatmul.bf16.gmra.mxu2 %v2537_v39  ;;  %976 = vst [vmem:[#allocation3 + $0x5c] sm:$0xf] %v945_v5  ;;  %v1081_v55 = vshll.u32 %v1008_v48, 16  ;;  %v1086_v57 = vshrl.u32 %v1009_v49, 16  ;;  %v1089_v17 = vshll.u32 %v1009_v49, 16  ;;  %v1095_v41 = vshll.u32 %v1010_v51, 16 }
  0x9c   : > { %977 = vst [vmem:[#allocation3 + $0x80] sm:$0xf] %v949_v28  ;;  %v1074_v31 = vrot.slane %v1072_v52, 4  ;;  %v1077_v58 = vrot.slane %v1075_v54, 5  ;;  %v2922_v30 = vld [vmem:[#allocation3 + $0x64] sm:$0xf] }
  0x9d   : > { %v1083_v56 = vrot.slane %v1081_v55, 5  ;;  %v1088_v59 = vrot.slane %v1086_v57, 4  ;;  %v1091_v15 = vrot.slane %v1089_v17, 5  ;;  %v1147_v62 = vld [vmem:[#allocation2 + $0x20] sm:$0xe]  ;;  %v1097_v0 = vrot.slane %v1095_v41, 5 }
  0x9e   : > { %v2538_v60 = vld [vmem:[#allocation3 + $0x84] sm:$0xf0]  ;;  %v1078_v61 = vor.u32 %v1077_v58, %v1074_v31  ;;  %v1148_v63 = vld [vmem:[#allocation2 + $0x24] sm:$0x1]  ;;  %v1149_v1 = vld [vmem:[#allocation2 + $0x28] sm:$0xe] }
  0x9f   : > { %v1092_v25 = vor.u32 %v1091_v15, %v1088_v59  ;;  %v1150_v2 = vld [vmem:[#allocation2 + $0x2c] sm:$0x1]  ;;  %v2468_v4 = vrot.slane %v1147_v62, 9  ;;  %v1185_v6 = vrot.slane %v1148_v63, 5  ;;  %v2541_v33 = vor.u32 %v2922_v30, %v2538_v60  ;;  %v2508_v10 = vld [vmem:[#allocation3 + $0x20] sm:$0xf] }
  0xa0   : > { %v1079_v3 = vrot.slane %v1078_v61, 4  ;;  %v2469_v8 = vrot.slane %v1149_v1, 9  ;;  %v1189_v23 = vrot.slane %v1150_v2, 5  ;;  %v2918_v11 = vld [vmem:[#allocation3 + $0x40] sm:$0xf0] }
  0xa1   : > { %v1093_v18 = vrot.slane %v1092_v25, 4  ;;  %v2572_v12 = vld [vmem:[#allocation3 + $0xa8] sm:$0xf]  ;;  %v2935_v14 = vld [vmem:[#allocation3 + $0xc8] sm:$0xf0]  ;;  %v1186_v22 = vsel %vm3269_vm8, %v2468_v4, %v1185_v6  ;;  %v2509_v44 = vor.u32 %v2918_v11, %v2508_v10 }
  0xa2   : > { %v2921_v13 = vld [vmem:[#allocation3 + $0x5c] sm:$0xf]  ;;  %v1084_v16 = vsel %vm3401_vm12, %v1079_v3, %v1083_v56  ;;  %v278_v24 = vld [vmem:[#allocation2 + $0x48] sm:$0x1]  ;;  %v1190_v29 = vsel %vm3269_vm8, %v2469_v8, %v1189_v23  ;;  %v989_v34 = vld [vmem:[#allocation2 + $0x40] sm:$0xf]  ;;  %v2573_v45 = vor.u32 %v2935_v14, %v2572_v12 }
  0xa3   : > { %v2530_v26 = vld [vmem:[#allocation3 + $0x7c] sm:$0xf0]  ;;  %v1098_v27 = vsel %vm3401_vm12, %v1093_v18, %v1097_v0  ;;  %1139 = vst [vmem:[#allocation3 + $0xac] sm:$0xf] %v1084_v16  ;;  %v279_v32 = vsel %vm3169_vm2, 0, %v278_v24 }
  0xa4   : > { %1140 = vst [vmem:[#allocation3 + $0xd0] sm:$0xf] %v1098_v27  ;;  %v910_v37 = vld [vmem:[#allocation2 + $0x28] sm:$0xe]  ;;  %v911_v21 = vld [vmem:[#allocation2 + $0x2c] sm:$0x1]  ;;  %v2533_v38 = vor.u32 %v2921_v13, %v2530_v26 }
  0xa5   : > { %2239 = vmatmul.bf16.gmra.mxu3 %v2541_v33  ;;  %1217 = vst [vmem:[#allocation3 + $0x68] sm:$0xf] %v1186_v22  ;;  %v912_v50 = vld [vmem:[#allocation2 + $0x30] sm:$0xe]  ;;  %v913_v39 = vld [vmem:[#allocation2 + $0x34] sm:$0x1] }
  0xa6   : > { %1218 = vst [vmem:[#allocation3 + $0x8c] sm:$0xf] %v1190_v29  ;;  %v2462_v40 = vrot.slane %v910_v37, 9  ;;  %v952_v42 = vrot.slane %v911_v21, 5  ;;  %v2463_v43 = vrot.slane %v912_v50, 9  ;;  %v956_v53 = vrot.slane %v913_v39, 5 }
  0xa7   : > { %280 = vst [vmem:[#allocation2 + $0x48] sm:$0x1] %v279_v32  ;;  %v310_v46 = vld [vmem:[#allocation2 + $0x4c] sm:$0x1]  ;;  %v1011_v9 = vld [vmem:[#allocation2 + $0x40] sm:$0xf] }
  0xa8   : > { %997 = vst [vmem:[#allocation3 + $0xf0] sm:$0xf] %v989_v34  ;;  %v953_v47 = vsel %vm3269_vm8, %v2462_v40, %v952_v42  ;;  %v957_v35 = vsel %vm3269_vm8, %v2463_v43, %v956_v53  ;;  %v311_v7 = vsel %vm3197_vm4, 0, %v310_v46  ;;  %v1012_v5 = vld [vmem:[#allocation2 + $0x44] sm:$0x1]  ;;  %v1100_v28 = vshrl.u32 %v1011_v9, 16 }
  0xa9   : > { %2181 = vmatmul.bf16.gmra.mxu1 %v2533_v38  ;;  %978 = vst [vmem:[#allocation3 + $0xa4] sm:$0xf] %v953_v47  ;;  %v1103_v48 = vshll.u32 %v1011_v9, 16  ;;  %v1109_v49 = vshll.u32 %v1012_v5, 16  ;;  %v1151_v51 = vld [vmem:[#allocation2 + $0x30] sm:$0xe] }
  0xaa   : > { %979 = vst [vmem:[#allocation3 + $0xc8] sm:$0xf] %v957_v35  ;;  %v1102_v52 = vrot.slane %v1100_v28, 4  ;;  %v2470_v55 = vrot.slane %v1151_v51, 9  ;;  %v2931_v57 = vld [vmem:[#allocation3 + $0xac] sm:$0xf] }
  0xab   : > { %2263 = vmatmul.bf16.vlgmr.msra.gmra.mxu0 %v2509_v44  ;;  %2215 = vmatmul.bf16.gmra.mxu2 %v2573_v45  ;;  %312 = vst [vmem:[#allocation2 + $0x4c] sm:$0x1] %v311_v7  ;;  %v1105_v54 = vrot.slane %v1103_v48, 5  ;;  %v2574_v17 = vld [vmem:[#allocation3 + $0xcc] sm:$0xf0]  ;;  %v1111_v58 = vrot.slane %v1109_v49, 5 }
  0xac   : > { %v1152_v41 = vld [vmem:[#allocation2 + $0x34] sm:$0x1]  ;;  %v1153_v31 = vld [vmem:[#allocation2 + $0x38] sm:$0xe]  ;;  %v1154_v30 = vld [vmem:[#allocation2 + $0x3c] sm:$0x1]  ;;  %v2577_v3 = vor.u32 %v2931_v57, %v2574_v17 }
  0xad   : > { %v1106_v20 = vor.u32 %v1105_v54, %v1102_v52  ;;  %v1193_v56 = vrot.slane %v1152_v41, 5  ;;  %v2471_v59 = vrot.slane %v1153_v31, 9  ;;  %v1197_v61 = vrot.slane %v1154_v30, 5  ;;  %v2544_v8 = vld [vmem:[#allocation3 + $0x68] sm:$0xf] }
  0xae   : > { %v990_v15 = vld [vmem:[#allocation2 + $0x48] sm:$0xf]  ;;  %v2927_v23 = vld [vmem:[#allocation3 + $0x88] sm:$0xf0]  ;;  %v1155_v16 = vld [vmem:[#allocation2 + $0x40] sm:$0xe] }
  0xaf   : > { %v1013_v60 = vld [vmem:[#allocation2 + $0x48] sm:$0xf]  ;;  %998 = vst [vmem:[#allocation3 + $0x114] sm:$0xf] %v990_v15  ;;  %v1107_v62 = vrot.slane %v1106_v20, 4  ;;  %v1194_v25 = vsel %vm3269_vm8, %v2470_v55, %v1193_v56  ;;  %v1198_v2 = vsel %vm3269_vm8, %v2471_v59, %v1197_v61  ;;  %v2472_v29 = vrot.slane %v1155_v16, 9 }
  0xb0   : > { %v1114_v63 = vshrl.u32 %v1013_v60, 16  ;;  %v2930_v0 = vld [vmem:[#allocation3 + $0xa4] sm:$0xf]  ;;  %v1117_v1 = vshll.u32 %v1013_v60, 16  ;;  %1219 = vst [vmem:[#allocation3 + $0xb0] sm:$0xf] %v1194_v25  ;;  %v2545_v53 = vor.u32 %v2927_v23, %v2544_v8 }
  0xb1   : > { %v2566_v6 = vld [vmem:[#allocation3 + $0xc4] sm:$0xf0]  ;;  %v1112_v33 = vsel %vm3401_vm12, %v1107_v62, %v1111_v58  ;;  %1220 = vst [vmem:[#allocation3 + $0xd4] sm:$0xf] %v1198_v2  ;;  %v2608_v10 = vld [vmem:[#allocation3 + $0xf0] sm:$0xf] }
  0xb2   : > { %v1116_v18 = vrot.slane %v1114_v63, 4  ;;  %v1014_v11 = vld [vmem:[#allocation2 + $0x4c] sm:$0x1]  ;;  %v1119_v12 = vrot.slane %v1117_v1, 5  ;;  %1141 = vst [vmem:[#allocation3 + $0xf4] sm:$0xf] %v1112_v33  ;;  %v2569_v34 = vor.u32 %v2930_v0, %v2566_v6 }
  0xb3   : > { %v3657_v4 = vpop.f32.mrf.mxu1  ;;  %v1123_v13 = vshll.u32 %v1014_v11, 16  ;;  %v1156_v22 = vld [vmem:[#allocation2 + $0x44] sm:$0x1]  ;;  %v1157_v26 = vld [vmem:[#allocation2 + $0x48] sm:$0xe] }
  0xb4   : > { %v1120_v24 = vor.u32 %v1119_v12, %v1116_v18  ;;  %v1158_v27 = vld [vmem:[#allocation2 + $0x4c] sm:$0x1]  ;;  %v1201_v32 = vrot.slane %v1156_v22, 5  ;;  %v2473_v21 = vrot.slane %v1157_v26, 9  ;;  %v914_v50 = vld [vmem:[#allocation2 + $0x38] sm:$0xe] }
  0xb5   : > { %2244 = vmatmul.bf16.gmra.mxu3 %v2577_v3  ;;  %v1125_v37 = vrot.slane %v1123_v13, 5  ;;  %v1205_v38 = vrot.slane %v1158_v27, 5  ;;  %v915_v43 = vld [vmem:[#allocation2 + $0x3c] sm:$0x1]  ;;  %v916_v46 = vld [vmem:[#allocation2 + $0x40] sm:$0xe] }
  0xb6   : > { %v3661_v14 = vpop.f32.mrf.mxu0  ;;  %v2944_v39 = vld [vmem:[#allocation3 + $0x110] sm:$0xf0]  ;;  %v1121_v40 = vrot.slane %v1120_v24, 4  ;;  %v1202_v42 = vsel %vm3269_vm8, %v2472_v29, %v1201_v32  ;;  %v2464_v9 = vrot.slane %v914_v50, 9  ;;  %v960_v5 = vrot.slane %v915_v43, 5 }
  0xb7   : > { %v2609_v44 = vor.u32 %v2944_v39, %v2608_v10  ;;  %v1206_v45 = vsel %vm3269_vm8, %v2473_v21, %v1205_v38  ;;  %1221 = vst [vmem:[#allocation3 + $0xf8] sm:$0xf] %v1202_v42  ;;  %v917_v35 = vld [vmem:[#allocation2 + $0x44] sm:$0x1]  ;;  %v2465_v28 = vrot.slane %v916_v46, 9 }
  0xb8   : > { %v1126_v47 = vsel %vm3401_vm12, %v1121_v40, %v1125_v37  ;;  %1222 = vst [vmem:[#allocation3 + $0x11c] sm:$0xf] %v1206_v45  ;;  %v964_v48 = vrot.slane %v917_v35, 5  ;;  %v961_v51 = vsel %vm3269_vm8, %v2464_v9, %v960_v5  ;;  %v2580_v17 = vld [vmem:[#allocation3 + $0xb0] sm:$0xf] }
  0xb9   : > { %2186 = vmatmul.bf16.gmra.mxu1 %v2569_v34  ;;  %1142 = vst [vmem:[#allocation3 + $0x118] sm:$0xf] %v1126_v47  ;;  %v2940_v36 = vld [vmem:[#allocation3 + $0xf4] sm:$0xf] }
  0xba   : > { %v965_v52 = vsel %vm3269_vm8, %v2465_v28, %v964_v48  ;;  %980 = vst [vmem:[#allocation3 + $0xec] sm:$0xf] %v961_v51  ;;  %v2936_v41 = vld [vmem:[#allocation3 + $0xd0] sm:$0xf0] }
  0xbb   : > { %v3669_v7 = vpop.f32.mrf.mxu1  ;;  %2268 = vmatmul.bf16.gmra.mxu0 %v2545_v53  ;;  %2220 = vmatmul.bf16.gmra.mxu2 %v2609_v44  ;;  %981 = vst [vmem:[#allocation3 + $0x110] sm:$0xf] %v965_v52  ;;  %v2581_v60 = vor.u32 %v2936_v41, %v2580_v17 }
  0xbe   : > { %v2034_v49 = vpop.f32.mrf.mxu0  ;;  %v2616_v58 = vld [vmem:[#allocation3 + $0xf8] sm:$0xf] }
  0xbf   : > { %v2945_v30 = vld [vmem:[#allocation3 + $0x118] sm:$0xf0] }
  0xc0   : > { %v2610_v54 = vld [vmem:[#allocation3 + $0x114] sm:$0xf0]  ;;  %v2090_v56 = vpop.f32.mrf.mxu2  ;;  %v2617_v19 = vor.u32 %v2945_v30, %v2616_v58 }
  0xc1   : > { %v2613_v55 = vor.u32 %v2940_v36, %v2610_v54  ;;  %v2939_v31 = vld [vmem:[#allocation3 + $0xec] sm:$0xf] }
  0xc2   : > { %v2602_v59 = vld [vmem:[#allocation3 + $0x10c] sm:$0xf0] }
  0xc3   : > { %v3675_v57 = vpop.f32.mrf.mxu1  ;;  %v2605_v15 = vor.u32 %v2939_v31, %v2602_v59 }
  0xc5   : > { %2249 = vmatmul.bf16.gmra.mxu3 %v2613_v55 }
  0xc6   : > { %v2037_v20 = vpop.f32.mrf.mxu0 }
  0xc8   : > { %v2092_v25 = vpop.f32.mrf.mxu2 }
  0xc9   : > { %2191 = vmatmul.bf16.gmra.mxu1 %v2605_v15 }
  0xca   : > { %v2119_v62 = vpop.f32.mrf.mxu3 }
  0xcb   : > { %v2049_v61 = vpop.f32.mrf.mxu1  ;;  %2273 = vmatmul.bf16.gmra.mxu0 %v2581_v60  ;;  %2278 = vmatmul.bf16.vlgmr.msra.gmra.mxu2 %v2617_v19 }
  0xce   : > { %v2039_v63 = vpop.f32.mrf.mxu0 }
  0xd2   : > { %v2121_v6 = vpop.f32.mrf.mxu3 }
  0xd3   : > { %v2061_v0 = vpop.f32.mrf.mxu1 }
  0xd4   : > { %v2062_v1 = vadd.f32 %v2061_v0, %v3661_v14 }
  0xd6   : > { %v2091_v2 = vadd.f32 %v2090_v56, %v2062_v1  ;;  %v2148_v3 = vpop.f32.mrf.mxu0 }
  0xd7   : > { %v2095_v18 = vpop.f32.mrf.mxu2 }
  0xd8   : > { %v2120_v33 = vadd.f32 %v2119_v62, %v2091_v2 }
  0xda   : > { %v2149_v8 = vadd.f32 %v2148_v3, %v2120_v33  ;;  %v2124_v16 = vpop.f32.mrf.mxu3 }
  0xdb   : > { %v2063_v23 = vpop.f32.mrf.mxu1 }
  0xdc   : > { %v2064_v10 = vadd.f32 %v2063_v23, %v2034_v49 }
  0xde   : > { %v2093_v11 = vadd.f32 %v2092_v25, %v2064_v10  ;;  %v2150_v13 = vpop.f32.mrf.mxu0 }
  0xdf   : > { %v2097_v24 = vpop.f32.mrf.mxu2 }
  0xe0   : > { %v2122_v12 = vadd.f32 %v2121_v6, %v2093_v11 }
  0xe2   : > { %v2126_v34 = vpop.f32.mrf.mxu3  ;;  %v2151_v25 = vadd.f32 %v2150_v13, %v2122_v12 }
  0xe3   : > { %v2066_v22 = vpop.f32.mrf.mxu1 }
  0xe4   : > { %v2067_v26 = vadd.f32 %v2066_v22, %v2037_v20 }
  0xe6   : > { %v2096_v27 = vadd.f32 %v2095_v18, %v2067_v26 }
  0xe8   : > { %v2125_v29 = vadd.f32 %v2124_v16, %v2096_v27  ;;  %v2153_v32 = vpop.f32.mrf.mxu0 }
  0xea   : > { %v2154_v14 = vadd.f32 %v2153_v32, %v2125_v29  ;;  %v2129_v42 = vpop.f32.mrf.mxu3 }
  0xeb   : > { %v2068_v37 = vpop.f32.mrf.mxu1 }
  0xec   : > { %v2069_v21 = vadd.f32 %v2068_v37, %v2039_v63 }
  0xed   : > { %v2100_v38 = vpop.f32.mrf.mxu2 }
  0xee   : > { %v2098_v50 = vadd.f32 %v2097_v24, %v2069_v21 }
  0xf0   : > { %v2127_v39 = vadd.f32 %v2126_v34, %v2098_v50  ;;  %v2155_v40 = vpop.f32.mrf.mxu0 }
  0xf2   : > { %v2131_v5 = vpop.f32.mrf.mxu3  ;;  %v2156_v12 = vadd.f32 %v2155_v40, %v2127_v39 }
  0xf3   : > { %v2071_v43 = vpop.f32.mrf.mxu1 }
  0xf4   : > { %v2072_v44 = vadd.f32 %v2071_v43, %v3657_v4 }
  0xf5   : > { %v2102_v53 = vpop.f32.mrf.mxu2 }
  0xf6   : > { %v2101_v45 = vadd.f32 %v2100_v38, %v2072_v44 }
  0xf8   : > { %v2130_v46 = vadd.f32 %v2129_v42, %v2101_v45 }
  0xfb   : > { %v2073_v9 = vpop.f32.mrf.mxu1 }
  0xfc   : > { %v2074_v35 = vadd.f32 %v2073_v9, %v3669_v7 }
  0xfd   : > { %v2158_v47 = vpop.f32.mrf.mxu0 }
  0xfe   : > { %v2159_v28 = vadd.f32 %v2158_v47, %v2130_v46  ;;  %v2105_v48 = vpop.f32.mrf.mxu2  ;;  %v2103_v49 = vadd.f32 %v2102_v53, %v2074_v35 }
 0x100   : > { %v3680_v51 = vadd.f32 %v2131_v5, %v2103_v49 }
 0x105   : > { %v2160_v41 = vpop.f32.mrf.mxu0 }
 0x106   : > { %v2107_v52 = vpop.f32.mrf.mxu2  ;;  %v2076_v36 = vpop.f32.mrf.mxu1 }
 0x107   : > { %v2077_v55 = vadd.f32 %v2076_v36, %v3675_v57 }
 0x108   : > { %v2134_v54 = vpop.f32.mrf.mxu3 }
 0x109   : > { %v2106_v17 = vadd.f32 %v2105_v48, %v2077_v55  ;;  %v2161_v55 = vadd.f32 %v2160_v41, %v3680_v51 }
 0x10b   : > { %v2135_v49 = vadd.f32 %v2134_v54, %v2106_v17 }
 0x10e   : > { %v2206_v4 = vpop.f32.mrf.mxu2  ;;  %v2078_v31 = vpop.f32.mrf.mxu1 }
 0x10f   : > { %v2079_v58 = vadd.f32 %v2078_v31, %v2049_v61 }
 0x110   : > { %v3683_v20 = vpop.f32.mrf.mxu3 }
 0x111   : > { %v3685_v30 = vadd.f32 %v2107_v52, %v2079_v58 }
 0x113   : > { %v2137_v54 = vadd.f32 %v3683_v20, %v3685_v30 }
 0x116   : > { %v2208_v7 = vpop.f32.mrf.mxu2  ;;  %v2177_v56 = vpop.f32.mrf.mxu1 }
 0x117   : > { %v2178_v57 = vadd.f32 %v2177_v56, %v2149_v8 }
 0x118   : > { %v2163_v59 = vpop.f32.mrf.mxu0  ;;  %v2235_v15 = vpop.f32.mrf.mxu3 }
 0x119   : > { %v2207_v3 = vadd.f32 %v2206_v4, %v2178_v57 }
 0x11b   : > { %v2236_v18 = vadd.f32 %v2235_v15, %v2207_v3 }
 0x11e   : > { %v2211_v60 = vpop.f32.mrf.mxu2  ;;  %v2179_v19 = vpop.f32.mrf.mxu1 }
 0x11f   : > { %v2180_v0 = vadd.f32 %v2179_v19, %v2151_v25 }
 0x120   : > { %v3687_v62 = vpop.f32.mrf.mxu0  ;;  %v2237_v63 = vpop.f32.mrf.mxu3 }
 0x121   : > { %v2209_v33 = vadd.f32 %v2208_v7, %v2180_v0  ;;  %v2164_v7 = vadd.f32 %v2163_v59, %v2135_v49  ;;  %v2166_v59 = vadd.f32 %v3687_v62, %v2137_v54 }
 0x123   : > { %v2238_v23 = vadd.f32 %v2237_v63, %v2209_v33 }
 0x126   : > { %v2213_v1 = vpop.f32.mrf.mxu2  ;;  %v2182_v2 = vpop.f32.mrf.mxu1 }
 0x127   : > { %v2183_v10 = vadd.f32 %v2182_v2, %v2154_v14 }
 0x128   : > { %v2264_v6 = vpop.f32.mrf.mxu0  ;;  %v2240_v61 = vpop.f32.mrf.mxu3 }
 0x129   : > { %v2265_v22 = vadd.f32 %v2264_v6, %v2236_v18  ;;  %v2212_v29 = vadd.f32 %v2211_v60, %v2183_v10 }
 0x12b   : > { %v2314_v8 = vmul.f32 %v2265_v22, %v2265_v22  ;;  %v2241_v37 = vadd.f32 %v2240_v61, %v2212_v29 }
 0x12e   : > { %v2216_v11 = vpop.f32.mrf.mxu2  ;;  %v2184_v16 = vpop.f32.mrf.mxu1 }
 0x12f   : > { %v2185_v21 = vadd.f32 %v2184_v16, %v2156_v12 }
 0x130   : > { %v2266_v24 = vpop.f32.mrf.mxu0  ;;  %v2242_v26 = vpop.f32.mrf.mxu3 }
 0x131   : > { %v2267_v27 = vadd.f32 %v2266_v24, %v2238_v23  ;;  %v2214_v40 = vadd.f32 %v2213_v1, %v2185_v21 }
 0x133   : > { %v3037_v13 = vpack.c.bf16 %v2267_v27, %v2265_v22  ;;  %v2300_v32 = vadd.f32 %v2267_v27, %v2265_v22  ;;  %v2315_v34 = vmul.f32 %v2267_v27, %v2267_v27  ;;  %v2243_v46 = vadd.f32 %v2242_v26, %v2214_v40 }
 0x135   : > { %3038 = vst [vmem:[%s3694_s17] sm:$0xff] %v3037_v13   ;;  %v2322_v14 = vadd.f32 %v2315_v34, %v2314_v8 }
 0x136   : > { %v2218_v38 = vpop.f32.mrf.mxu2  ;;  %v2187_v50 = vpop.f32.mrf.mxu1 }
 0x137   : > { %v2188_v9 = vadd.f32 %v2187_v50, %v2159_v28 }
 0x138   : > { %v2269_v42 = vpop.f32.mrf.mxu0  ;;  %v2245_v43 = vpop.f32.mrf.mxu3 }
 0x139   : > { %v2270_v39 = vadd.f32 %v2269_v42, %v2241_v37  ;;  %v2217_v36 = vadd.f32 %v2216_v11, %v2188_v9 }
 0x13b   : > { %v2301_v53 = vadd.f32 %v2300_v32, %v2270_v39  ;;  %v2316_v44 = vmul.f32 %v2270_v39, %v2270_v39  ;;  %v2246_v15 = vadd.f32 %v2245_v43, %v2217_v36 }
 0x13d   : > { %v2323_v45 = vadd.f32 %v2322_v14, %v2316_v44 }
 0x13e   : > { %v2221_v47 = vpop.f32.mrf.mxu2  ;;  %v2189_v35 = vpop.f32.mrf.mxu1 }
 0x13f   : > { %v2190_v60 = vadd.f32 %v2189_v35, %v2161_v55 }
 0x140   : > { %v2271_v5 = vpop.f32.mrf.mxu0  ;;  %v2247_v48 = vpop.f32.mrf.mxu3 }
 0x141   : > { %v2272_v52 = vadd.f32 %v2271_v5, %v2243_v46  ;;  %v2219_v0 = vadd.f32 %v2218_v38, %v2190_v60 }
 0x143   : > { %v3042_v4 = vpack.c.bf16 %v2272_v52, %v2270_v39  ;;  %v2302_v31 = vadd.f32 %v2301_v53, %v2272_v52  ;;  %v2317_v58 = vmul.f32 %v2272_v52, %v2272_v52  ;;  %v2248_v6 = vadd.f32 %v2247_v48, %v2219_v0 }
 0x145   : > { %3057 = vst [vmem:[%s3694_s17 + $0x8] sm:$0xff] %v3042_v4   ;;  %v2324_v56 = vadd.f32 %v2323_v45, %v2317_v58 }
 0x146   : > { %v2223_v19 = vpop.f32.mrf.mxu2  ;;  %v2192_v63 = vpop.f32.mrf.mxu1 }
 0x147   : > { %v2193_v28 = vadd.f32 %v2192_v63, %v2164_v7 }
 0x148   : > { %v2274_v25 = vpop.f32.mrf.mxu0  ;;  %v2250_v57 = vpop.f32.mrf.mxu3 }
 0x149   : > { %v2275_v17 = vadd.f32 %v2274_v25, %v2246_v15  ;;  %v2222_v1 = vadd.f32 %v2221_v47, %v2193_v28 }
 0x14b   : > { %v2303_v51 = vadd.f32 %v2302_v31, %v2275_v17  ;;  %v2318_v41 = vmul.f32 %v2275_v17, %v2275_v17  ;;  %v2251_v2 = vadd.f32 %v2250_v57, %v2222_v1 }
 0x14d   : > { %v2325_v3 = vadd.f32 %v2324_v56, %v2318_v41 }
 0x14e   : > { %v2279_v61 = vpop.f32.mrf.mxu2  ;;  %v2194_v33 = vpop.f32.mrf.mxu1 }
 0x14f   : > { %v2280_v18 = vadd.f32 %v2279_v61, %v2251_v2  ;;  %v2195_v23 = vadd.f32 %v2194_v33, %v2166_v59 }
 0x150   : > { %v2276_v10 = vpop.f32.mrf.mxu0  ;;  %v2252_v30 = vpop.f32.mrf.mxu3 }
 0x151   : > { %v2277_v11 = vadd.f32 %v2276_v10, %v2248_v6  ;;  %v2224_v16 = vadd.f32 %v2223_v19, %v2195_v23  ;;  %v2320_v20 = vmul.f32 %v2280_v18, %v2280_v18 }
 0x153   : > { %v3047_v22 = vpack.c.bf16 %v2277_v11, %v2275_v17  ;;  %v2304_v24 = vadd.f32 %v2303_v51, %v2277_v11  ;;  %v2319_v26 = vmul.f32 %v2277_v11, %v2277_v11  ;;  %v2253_v27 = vadd.f32 %v2252_v30, %v2224_v16 }
 0x155   : > { %3058 = vst [vmem:[%s3694_s17 + $0x10] sm:$0xff] %v3047_v22   ;;  %v2326_v29 = vadd.f32 %v2325_v3, %v2319_v26  ;;  %v2305_v62 = vadd.f32 %v2304_v24, %v2280_v18 }
 0x156   : > { %v2281_v12 = vpop.f32.mrf.mxu2 }
 0x157   : > { %v2327_v8 = vadd.f32 %v2326_v29, %v2320_v20  ;;  %v2282_v13 = vadd.f32 %v2281_v12, %v2253_v27 }
 0x159   : > { %v3052_v32 = vpack.c.bf16 %v2282_v13, %v2280_v18  ;;  %v2306_v34 = vadd.f32 %v2305_v62, %v2282_v13  ;;  %v2321_v14 = vmul.f32 %v2282_v13, %v2282_v13 }
 0x15b   : > { %3059 = vst [vmem:[%s3694_s17 + $0x18] sm:$0xff] %v3052_v32   ;;  %v2307_v37 = vrot.slane %v2306_v34, 4  ;;  %v2328_v21 = vadd.f32 %v2327_v8, %v2321_v14 }
 0x15d   : > { %v2308_v38 = vadd.f32 %v2307_v37, %v2306_v34  ;;  %v2329_v50 = vrot.slane %v2328_v21, 4 }
 0x15f   : > { %v2309_v42 = vrot.slane %v2308_v38, 2  ;;  %v2330_v43 = vadd.f32 %v2329_v50, %v2328_v21 }
 0x161   : > { %v2310_v39 = vadd.f32 %v2309_v42, %v2308_v38  ;;  %v2331_v40 = vrot.slane %v2330_v43, 2 }
 0x163   : > { %v2311_v53 = vrot.slane %v2310_v39, 1  ;;  %v2332_v44 = vadd.f32 %v2331_v40, %v2330_v43 }
 0x165   : > { %v2312_v45 = vadd.f32 %v2311_v53, %v2310_v39  ;;  %v2333_v46 = vrot.slane %v2332_v44, 1 }
 0x167   : > { %2313 = vst [vmem:[%s238_s21] sm:$0x1] %v2312_v45  ;;  %v2334_v9 = vadd.f32 %v2333_v46, %v2332_v44 }
 0x169   : > { %2335 = vst [vmem:[%s241_s24] sm:$0x1] %v2334_v9 }
 0x16a PF: > { %s16_s18 = sadd.s32 1, %s3093_s18  }
 0x16b   : > { %p13_p4 = scmp.ge.s32.totalorder %s16_s18, 4  }
 0x16d   :  { %15 = sbr.rel (!%p13_p4) target bundleno = 1 (0x1), region = 89 }

</bundles_post_ra>
